<compile_context>
chip_gen: v6e
topology: v6e:2x2x1
jax: 0.10.0
libtpu: 0.0.40
codegen_flags: <defaults>
</compile_context>

<pallas_src>
import jax
import jax.numpy as jnp
import numpy as np
from jax import lax
from jax.experimental import pallas as pl
from jax.experimental.pallas import tpu as pltpu


# ----------------------------------------------------------------------------- fused kernel

def _self_attention_kernel(x_ref, wih_ref, whh_ref, bg_ref,
                           w1_ref, b1_ref, w2_ref, b2_ref,
                           wh_ref, sel_ref, bh_ref,
                           out_ref, lstm_scr):
    """Fused BiLSTM + structured self-attention + folded fc->label head.

    x_ref:   (B, T, E)
    wih_ref: (E, 8H)   = [W_ih_fwd.T | W_ih_bwd.T]           (gate order i,f,g,o per dir)
    whh_ref: (2H, 8H)  = blockdiag(W_hh_fwd.T, W_hh_bwd.T)
    bg_ref:  (1, 8H)   = [b_fwd | b_bwd]  (b_ih + b_hh per direction)
    w1_ref:  (2H, 350), b1_ref: (1, 350)      W_s1
    w2_ref:  (350, 30), b2_ref: (1, 30)       W_s2
    wh_ref:  (2H, OUT*30) folded fc->label weight; wh[d, k*30+s] = (Wfc.T @ Wlab.T)[s*2H+d, k]
    sel_ref: (OUT*30, OUT) static 0/1 selector; sel[k*30+s, k] = 1
    bh_ref:  (1, OUT)  = bfc @ Wlab.T + blab
    out_ref: (B, OUT)
    lstm_scr: VMEM scratch (B, T, 2H)
    """
    B, T, E = x_ref.shape
    H2 = lstm_scr.shape[2]
    H = H2 // 2
    H4 = 4 * H
    n_hops = w2_ref.shape[1]               # 30 attention hops
    OUT = out_ref.shape[1]

    # ---- BiLSTM ---------------------------------------------------------------
    # Hoisted input projection for BOTH directions in one MXU matmul.
    x_flat = x_ref[...].reshape(B * T, E)
    gx = jnp.dot(x_flat, wih_ref[...], preferred_element_type=jnp.float32) + bg_ref[...]
    gx3 = gx.reshape(B, T, 2 * H4)                                  # (B, T, 8H)
    whh = whh_ref[...]                                              # (2H, 8H) block-diag

    def gates(g, c):
        i = jax.nn.sigmoid(g[:, 0:H])                               # PyTorch order i,f,g,o
        f = jax.nn.sigmoid(g[:, H:2 * H])
        gg = jnp.tanh(g[:, 2 * H:3 * H])
        o = jax.nn.sigmoid(g[:, 3 * H:4 * H])
        c_new = f * c + i * gg
        return o * jnp.tanh(c_new), c_new

    h_cat = jnp.zeros((B, H2), jnp.float32)                         # [h_fwd | h_bwd]
    c_f = jnp.zeros((B, H), jnp.float32)
    c_b = jnp.zeros((B, H), jnp.float32)

    # Fused fwd/bwd recurrence, fully unrolled (T static & small).  The only serial
    # dependency is ONE (B,2H)x(2H,8H) block-diagonal matmul per step.
    for t in range(T):
        tb = T - 1 - t
        rec = jnp.dot(h_cat, whh, preferred_element_type=jnp.float32)   # (B, 8H)
        g_f = gx3[:, t, 0:H4] + rec[:, 0:H4]
        g_b = gx3[:, tb, H4:2 * H4] + rec[:, H4:2 * H4]
        h_f, c_f = gates(g_f, c_f)
        h_b, c_b = gates(g_b, c_b)
        h_cat = jnp.concatenate([h_f, h_b], axis=1)
        lstm_scr[:, t, 0:H] = h_f                                    # cheap VMEM stores
        lstm_scr[:, tb, H:H2] = h_b

    # ---- Attention + folded head (batched over B) -------------------------------
    o_flat = lstm_scr[...].reshape(B * T, H2)                        # (B*T, 2H)
    s1 = jnp.tanh(jnp.dot(o_flat, w1_ref[...], preferred_element_type=jnp.float32)
                  + b1_ref[...])                                     # (B*T, 350)
    sc = jnp.dot(s1, w2_ref[...], preferred_element_type=jnp.float32) + b2_ref[...]  # (B*T, 30)
    n = jnp.dot(o_flat, wh_ref[...], preferred_element_type=jnp.float32)             # (B*T, OUT*30)

    sc3 = sc.reshape(B, T, n_hops)
    n3 = n.reshape(B, T, OUT * n_hops)

    # Softmax over the sequence axis (== softmax(dim=2) after permute(0,2,1) in PyTorch).
    m = jnp.max(sc3, axis=1, keepdims=True)
    e = jnp.exp(sc3 - m)
    p3 = e / jnp.sum(e, axis=1, keepdims=True)                       # p3[b,t,s] = attn[b,s,t]

    # logits[b,k] = sum_{t,s} p3[b,t,s] * n3[b,t,k*30+s] + bh[k]
    q3 = jnp.concatenate([p3] * OUT, axis=2)                         # (B, T, OUT*30)
    r = jnp.sum(q3 * n3, axis=1)                                     # (B, OUT*30)
    out_ref[...] = jnp.dot(r, sel_ref[...],
                           preferred_element_type=jnp.float32) + bh_ref[...]


# ----------------------------------------------------------------------------- wrapper

def self_attention_forward(x, q):
    B, T, _E = x.shape
    H2 = q['w1'].shape[0]
    OUT = q['bh'].shape[1]
    vmem = pl.BlockSpec(memory_space=pltpu.MemorySpace.VMEM)
    return pl.pallas_call(
        _self_attention_kernel,
        out_shape=jax.ShapeDtypeStruct((B, OUT), jnp.float32),
        in_specs=[vmem] * 11,
        out_specs=vmem,
        scratch_shapes=[pltpu.VMEM((B, T, H2), jnp.float32)],
    )(x, q['wih'], q['whh'], q['bg'],
      q['w1'], q['b1'], q['w2'], q['b2'],
      q['wh'], q['sel'], q['bh'])


def prepare_params(p):
    """One-time parameter prep (NOT run per forward call).

    - Concatenate fwd/bwd input-projection weights/biases into (E, 8H) / (1, 8H).
    - Build the block-diagonal (2H, 8H) recurrent weight so fwd+bwd use one matmul/step.
    - Fold fc_layer -> label (no nonlinearity between them) into one (30*2H, OUT) matrix,
      pre-permuted to (2H, OUT*30) so the head fuses with pure 2D matmuls.
    - Build the static (OUT*30, OUT) selector for the final per-class reduction.
    """
    H = p['whh_f_t'].shape[0]
    H2 = 2 * H
    n_hops = p['w2_t'].shape[1]                    # 30
    OUT = p['wlab_t'].shape[1]

    wih_cat = jnp.concatenate([p['wih_f_t'], p['wih_b_t']], axis=1)      # (E, 8H)
    bg_cat = jnp.concatenate([p['b_f'], p['b_b']], axis=1)               # (1, 8H)

    whh_blk = jnp.zeros((H2, 8 * H), jnp.float32)
    whh_blk = whh_blk.at[0:H, 0:4 * H].set(p['whh_f_t'])
    whh_blk = whh_blk.at[H:H2, 4 * H:8 * H].set(p['whh_b_t'])

    w_head = p['wfc_t'] @ p['wlab_t']              # (30*2H, OUT)
    b_head = p['bfc'] @ p['wlab_t'] + p['blab']    # (1, OUT)
    w3 = w_head.reshape(n_hops, H2, OUT)                            # [s, d, k]
    wh = jnp.transpose(w3, (1, 2, 0)).reshape(H2, OUT * n_hops)     # [d, k*30 + s]

    sel = np.zeros((OUT * n_hops, OUT), np.float32)                 # sel[k*30+s, k] = 1
    for k in range(OUT):
        sel[k * n_hops:(k + 1) * n_hops, k] = 1.0

    return {
        'wih': wih_cat, 'whh': whh_blk, 'bg': bg_cat,
        'w1': p['w1_t'], 'b1': p['b1'], 'w2': p['w2_t'], 'b2': p['b2'],
        'wh': wh, 'sel': jnp.asarray(sel), 'bh': b_head,
    }


# ----------------------------------------------------------------------------- pure-JAX reference
# Faithful (unfolded, unfused) reference of the PyTorch forward, for validation.

def reference_forward(x, p):
    B, T, _E = x.shape
    H = p['whh_f_t'].shape[0]

    def lstm_dir(xs, wih_t, whh_t, b, reverse):
        def step(carry, x_t):
            h, c = carry
            g = x_t @ wih_t + h @ whh_t + b[0]
            i = jax.nn.sigmoid(g[:, :H]); f = jax.nn.sigmoid(g[:, H:2 * H])
            gg = jnp.tanh(g[:, 2 * H:3 * H]); o = jax.nn.sigmoid(g[:, 3 * H:])
            c = f * c + i * gg
            h = o * jnp.tanh(c)
            return (h, c), h
        init = (jnp.zeros((B, H), jnp.float32), jnp.zeros((B, H), jnp.float32))
        _, hs = lax.scan(step, init, xs, reverse=reverse)
        return hs

    x_tbe = jnp.transpose(x, (1, 0, 2))
    hf = lstm_dir(x_tbe, p['wih_f_t'], p['whh_f_t'], p['b_f'], False)
    hb = lstm_dir(x_tbe, p['wih_b_t'], p['whh_b_t'], p['b_b'], True)
    out = jnp.transpose(jnp.concatenate([hf, hb], axis=-1), (1, 0, 2))     # (B,T,2H)
    s1 = jnp.tanh(out @ p['w1_t'] + p['b1'])
    sc = s1 @ p['w2_t'] + p['b2']
    attn = jax.nn.softmax(jnp.transpose(sc, (0, 2, 1)), axis=-1)
    hid = jnp.einsum('bst,btd->bsd', attn, out).reshape(B, -1)
    fc = hid @ p['wfc_t'] + p['bfc']
    return fc @ p['wlab_t'] + p['blab']


# ----------------------------------------------------------------------------- main

if __name__ == "__main__":
    B, T, E, H, OUT = 2, 8, 32, 32, 2      # batch, seq, embedding_length, hidden_size, output_size
    key = jax.random.PRNGKey(0)
    ks = jax.random.split(key, 16)
    s = 0.1
    # Deterministic synthetic parameters (PyTorch Linear/LSTM weights, pre-transposed).
    params = {
        'wih_f_t': jax.random.normal(ks[0], (E, 4 * H), jnp.float32) * s,      # W_ih.T (fwd)
        'whh_f_t': jax.random.normal(ks[1], (H, 4 * H), jnp.float32) * s,      # W_hh.T (fwd)
        'b_f':     jax.random.normal(ks[2], (1, 4 * H), jnp.float32) * s,      # b_ih + b_hh (fwd)
        'wih_b_t': jax.random.normal(ks[3], (E, 4 * H), jnp.float32) * s,      # reverse dir
        'whh_b_t': jax.random.normal(ks[4], (H, 4 * H), jnp.float32) * s,
        'b_b':     jax.random.normal(ks[5], (1, 4 * H), jnp.float32) * s,
        'w1_t':    jax.random.normal(ks[6], (2 * H, 350), jnp.float32) * s,    # W_s1.T
        'b1':      jax.random.normal(ks[7], (1, 350), jnp.float32) * s,
        'w2_t':    jax.random.normal(ks[8], (350, 30), jnp.float32) * s,       # W_s2.T
        'b2':      jax.random.normal(ks[9], (1, 30), jnp.float32) * s,
        'wfc_t':   jax.random.normal(ks[10], (30 * 2 * H, 2000), jnp.float32) * s,  # fc_layer.T
        'bfc':     jax.random.normal(ks[11], (1, 2000), jnp.float32) * s,
        'wlab_t':  jax.random.normal(ks[12], (2000, OUT), jnp.float32) * s,    # label.T
        'blab':    jax.random.normal(ks[13], (1, OUT), jnp.float32) * s,
    }
    x = jax.random.normal(ks[14], (B, T, E), jnp.float32)

    prepped = prepare_params(params)            # one-time fold / concat / block-diag prep
    fwd = jax.jit(self_attention_forward)

    logits = fwd(x, prepped)
    jax.block_until_ready(logits)

    ref = reference_forward(x, params)
    assert logits.shape == (B, OUT), logits.shape
    assert np.allclose(np.asarray(logits), np.asarray(ref), rtol=2e-3, atol=2e-3), \
        float(np.max(np.abs(np.asarray(logits) - np.asarray(ref))))

    print("KERNEL_OK")
</pallas_src>

<mosaic_0001>
module attributes {stable_mosaic.version = 11 : i64} {
  func.func @_self_attention_kernel(%arg0: memref<2x8x32xf32, #tpu.memory_space<vmem>>, %arg1: memref<32x256xf32, #tpu.memory_space<vmem>>, %arg2: memref<64x256xf32, #tpu.memory_space<vmem>>, %arg3: memref<1x256xf32, #tpu.memory_space<vmem>>, %arg4: memref<64x350xf32, #tpu.memory_space<vmem>>, %arg5: memref<1x350xf32, #tpu.memory_space<vmem>>, %arg6: memref<350x30xf32, #tpu.memory_space<vmem>>, %arg7: memref<1x30xf32, #tpu.memory_space<vmem>>, %arg8: memref<64x60xf32, #tpu.memory_space<vmem>>, %arg9: memref<60x2xf32, #tpu.memory_space<vmem>>, %arg10: memref<1x2xf32, #tpu.memory_space<vmem>>, %arg11: memref<2x2xf32, #tpu.memory_space<vmem>>, %arg12: memref<2x8x64xf32, #tpu.memory_space<vmem>>) attributes {dimension_semantics = [], scalar_prefetch = 0 : i64, scratch_operands = 1 : i64, tpu.core_type = #tpu.core_type<tc>} {
    %c0 = arith.constant 0 : index
    %c0_0 = arith.constant 0 : index
    %c0_1 = arith.constant 0 : index
    %0 = vector.load %arg0[%c0, %c0_0, %c0_1] : memref<2x8x32xf32, #tpu.memory_space<vmem>>, vector<2x8x32xf32>
    %1 = vector.shape_cast %0 : vector<2x8x32xf32> to vector<16x32xf32>
    %c0_2 = arith.constant 0 : index
    %c0_3 = arith.constant 0 : index
    %2 = vector.load %arg1[%c0_2, %c0_3] : memref<32x256xf32, #tpu.memory_space<vmem>>, vector<32x256xf32>
    %cst = arith.constant dense<0.000000e+00> : vector<16x256xf32>
    %3 = tpu.matmul %1, %2, %cst {dimension_numbers = #tpu.dot_dimension_numbers<[1], [0], [0], [1], [0, 0, 1, 1], [], []>} : vector<16x32xf32>, vector<32x256xf32>, vector<16x256xf32> -> vector<16x256xf32>
    %c0_4 = arith.constant 0 : index
    %c0_5 = arith.constant 0 : index
    %4 = vector.load %arg3[%c0_4, %c0_5] : memref<1x256xf32, #tpu.memory_space<vmem>>, vector<1x256xf32>
    %5 = vector.broadcast %4 : vector<1x256xf32> to vector<16x256xf32>
    %6 = arith.addf %3, %5 : vector<16x256xf32>
    %7 = vector.shape_cast %6 : vector<16x256xf32> to vector<2x8x256xf32>
    %c0_6 = arith.constant 0 : index
    %c0_7 = arith.constant 0 : index
    %8 = vector.load %arg2[%c0_6, %c0_7] : memref<64x256xf32, #tpu.memory_space<vmem>>, vector<64x256xf32>
    %cst_8 = arith.constant 0.000000e+00 : f32
    %9 = vector.broadcast %cst_8 : f32 to vector<2x64xf32>
    %cst_9 = arith.constant 0.000000e+00 : f32
    %10 = vector.broadcast %cst_9 : f32 to vector<2x32xf32>
    %cst_10 = arith.constant 0.000000e+00 : f32
    %11 = vector.broadcast %cst_10 : f32 to vector<2x32xf32>
    %cst_11 = arith.constant dense<0.000000e+00> : vector<2x256xf32>
    %12 = tpu.matmul %9, %8, %cst_11 {dimension_numbers = #tpu.dot_dimension_numbers<[1], [0], [0], [1], [0, 0, 1, 1], [], []>} : vector<2x64xf32>, vector<64x256xf32>, vector<2x256xf32> -> vector<2x256xf32>
    %13 = vector.extract_strided_slice %7 {offsets = [0, 0, 0], sizes = [2, 1, 128], strides = [1, 1, 1]} : vector<2x8x256xf32> to vector<2x1x128xf32>
    %14 = vector.shape_cast %13 : vector<2x1x128xf32> to vector<2x128xf32>
    %15 = vector.extract_strided_slice %12 {offsets = [0, 0], sizes = [2, 128], strides = [1, 1]} : vector<2x256xf32> to vector<2x128xf32>
    %16 = arith.addf %14, %15 : vector<2x128xf32>
    %17 = vector.extract_strided_slice %7 {offsets = [0, 7, 128], sizes = [2, 1, 128], strides = [1, 1, 1]} : vector<2x8x256xf32> to vector<2x1x128xf32>
    %18 = vector.shape_cast %17 : vector<2x1x128xf32> to vector<2x128xf32>
    %19 = vector.extract_strided_slice %12 {offsets = [0, 128], sizes = [2, 128], strides = [1, 1]} : vector<2x256xf32> to vector<2x128xf32>
    %20 = arith.addf %18, %19 : vector<2x128xf32>
    %21 = vector.extract_strided_slice %16 {offsets = [0, 0], sizes = [2, 32], strides = [1, 1]} : vector<2x128xf32> to vector<2x32xf32>
    %22 = arith.negf %21 : vector<2x32xf32>
    %23 = math.exp %22 : vector<2x32xf32>
    %cst_12 = arith.constant 1.000000e+00 : f32
    %24 = vector.broadcast %cst_12 : f32 to vector<2x32xf32>
    %25 = arith.addf %24, %23 : vector<2x32xf32>
    %26 = arith.divf %24, %25 : vector<2x32xf32>
    %27 = vector.extract_strided_slice %16 {offsets = [0, 32], sizes = [2, 32], strides = [1, 1]} : vector<2x128xf32> to vector<2x32xf32>
    %28 = arith.negf %27 : vector<2x32xf32>
    %29 = math.exp %28 : vector<2x32xf32>
    %cst_13 = arith.constant 1.000000e+00 : f32
    %30 = vector.broadcast %cst_13 : f32 to vector<2x32xf32>
    %31 = arith.addf %30, %29 : vector<2x32xf32>
    %32 = arith.divf %30, %31 : vector<2x32xf32>
    %33 = vector.extract_strided_slice %16 {offsets = [0, 64], sizes = [2, 32], strides = [1, 1]} : vector<2x128xf32> to vector<2x32xf32>
    %34 = math.tanh %33 : vector<2x32xf32>
    %35 = vector.extract_strided_slice %16 {offsets = [0, 96], sizes = [2, 32], strides = [1, 1]} : vector<2x128xf32> to vector<2x32xf32>
    %36 = arith.negf %35 : vector<2x32xf32>
    %37 = math.exp %36 : vector<2x32xf32>
    %cst_14 = arith.constant 1.000000e+00 : f32
    %38 = vector.broadcast %cst_14 : f32 to vector<2x32xf32>
    %39 = arith.addf %38, %37 : vector<2x32xf32>
    %40 = arith.divf %38, %39 : vector<2x32xf32>
    %41 = arith.mulf %32, %10 : vector<2x32xf32>
    %42 = arith.mulf %26, %34 : vector<2x32xf32>
    %43 = arith.addf %41, %42 : vector<2x32xf32>
    %44 = math.tanh %43 : vector<2x32xf32>
    %45 = arith.mulf %40, %44 : vector<2x32xf32>
    %46 = vector.extract_strided_slice %20 {offsets = [0, 0], sizes = [2, 32], strides = [1, 1]} : vector<2x128xf32> to vector<2x32xf32>
    %47 = arith.negf %46 : vector<2x32xf32>
    %48 = math.exp %47 : vector<2x32xf32>
    %cst_15 = arith.constant 1.000000e+00 : f32
    %49 = vector.broadcast %cst_15 : f32 to vector<2x32xf32>
    %50 = arith.addf %49, %48 : vector<2x32xf32>
    %51 = arith.divf %49, %50 : vector<2x32xf32>
    %52 = vector.extract_strided_slice %20 {offsets = [0, 32], sizes = [2, 32], strides = [1, 1]} : vector<2x128xf32> to vector<2x32xf32>
    %53 = arith.negf %52 : vector<2x32xf32>
    %54 = math.exp %53 : vector<2x32xf32>
    %cst_16 = arith.constant 1.000000e+00 : f32
    %55 = vector.broadcast %cst_16 : f32 to vector<2x32xf32>
    %56 = arith.addf %55, %54 : vector<2x32xf32>
    %57 = arith.divf %55, %56 : vector<2x32xf32>
    %58 = vector.extract_strided_slice %20 {offsets = [0, 64], sizes = [2, 32], strides = [1, 1]} : vector<2x128xf32> to vector<2x32xf32>
    %59 = math.tanh %58 : vector<2x32xf32>
    %60 = vector.extract_strided_slice %20 {offsets = [0, 96], sizes = [2, 32], strides = [1, 1]} : vector<2x128xf32> to vector<2x32xf32>
    %61 = arith.negf %60 : vector<2x32xf32>
    %62 = math.exp %61 : vector<2x32xf32>
    %cst_17 = arith.constant 1.000000e+00 : f32
    %63 = vector.broadcast %cst_17 : f32 to vector<2x32xf32>
    %64 = arith.addf %63, %62 : vector<2x32xf32>
    %65 = arith.divf %63, %64 : vector<2x32xf32>
    %66 = arith.mulf %57, %11 : vector<2x32xf32>
    %67 = arith.mulf %51, %59 : vector<2x32xf32>
    %68 = arith.addf %66, %67 : vector<2x32xf32>
    %69 = math.tanh %68 : vector<2x32xf32>
    %70 = arith.mulf %65, %69 : vector<2x32xf32>
    %71 = tpu.concatenate %45, %70 in 1 : vector<2x32xf32>, vector<2x32xf32> -> vector<2x64xf32>
    %c0_18 = arith.constant 0 : index
    %c0_19 = arith.constant 0 : index
    %c0_20 = arith.constant 0 : index
    %72 = vector.load %arg12[%c0_18, %c0_19, %c0_20] : memref<2x8x64xf32, #tpu.memory_space<vmem>>, vector<2x1x32xf32>
    %73 = vector.shape_cast %72 : vector<2x1x32xf32> to vector<2x32xf32>
    %74 = vector.shape_cast %45 : vector<2x32xf32> to vector<2x1x32xf32>
    tpu.vector_store %arg12[%c0_18, %c0_19, %c0_20], %74 {strides = array<i32>} : memref<2x8x64xf32, #tpu.memory_space<vmem>>, vector<2x1x32xf32>,
    %c0_21 = arith.constant 0 : index
    %c7 = arith.constant 7 : index
    %c32 = arith.constant 32 : index
    %75 = vector.load %arg12[%c0_21, %c7, %c32] : memref<2x8x64xf32, #tpu.memory_space<vmem>>, vector<2x1x32xf32>
    %76 = vector.shape_cast %75 : vector<2x1x32xf32> to vector<2x32xf32>
    %77 = vector.shape_cast %70 : vector<2x32xf32> to vector<2x1x32xf32>
    tpu.vector_store %arg12[%c0_21, %c7, %c32], %77 {strides = array<i32>} : memref<2x8x64xf32, #tpu.memory_space<vmem>>, vector<2x1x32xf32>,
    %cst_22 = arith.constant dense<0.000000e+00> : vector<2x256xf32>
    %78 = tpu.matmul %71, %8, %cst_22 {dimension_numbers = #tpu.dot_dimension_numbers<[1], [0], [0], [1], [0, 0, 1, 1], [], []>} : vector<2x64xf32>, vector<64x256xf32>, vector<2x256xf32> -> vector<2x256xf32>
    %79 = vector.extract_strided_slice %7 {offsets = [0, 1, 0], sizes = [2, 1, 128], strides = [1, 1, 1]} : vector<2x8x256xf32> to vector<2x1x128xf32>
    %80 = vector.shape_cast %79 : vector<2x1x128xf32> to vector<2x128xf32>
    %81 = vector.extract_strided_slice %78 {offsets = [0, 0], sizes = [2, 128], strides = [1, 1]} : vector<2x256xf32> to vector<2x128xf32>
    %82 = arith.addf %80, %81 : vector<2x128xf32>
    %83 = vector.extract_strided_slice %7 {offsets = [0, 6, 128], sizes = [2, 1, 128], strides = [1, 1, 1]} : vector<2x8x256xf32> to vector<2x1x128xf32>
    %84 = vector.shape_cast %83 : vector<2x1x128xf32> to vector<2x128xf32>
    %85 = vector.extract_strided_slice %78 {offsets = [0, 128], sizes = [2, 128], strides = [1, 1]} : vector<2x256xf32> to vector<2x128xf32>
    %86 = arith.addf %84, %85 : vector<2x128xf32>
    %87 = vector.extract_strided_slice %82 {offsets = [0, 0], sizes = [2, 32], strides = [1, 1]} : vector<2x128xf32> to vector<2x32xf32>
    %88 = arith.negf %87 : vector<2x32xf32>
    %89 = math.exp %88 : vector<2x32xf32>
    %cst_23 = arith.constant 1.000000e+00 : f32
    %90 = vector.broadcast %cst_23 : f32 to vector<2x32xf32>
    %91 = arith.addf %90, %89 : vector<2x32xf32>
    %92 = arith.divf %90, %91 : vector<2x32xf32>
    %93 = vector.extract_strided_slice %82 {offsets = [0, 32], sizes = [2, 32], strides = [1, 1]} : vector<2x128xf32> to vector<2x32xf32>
    %94 = arith.negf %93 : vector<2x32xf32>
    %95 = math.exp %94 : vector<2x32xf32>
    %cst_24 = arith.constant 1.000000e+00 : f32
    %96 = vector.broadcast %cst_24 : f32 to vector<2x32xf32>
    %97 = arith.addf %96, %95 : vector<2x32xf32>
    %98 = arith.divf %96, %97 : vector<2x32xf32>
    %99 = vector.extract_strided_slice %82 {offsets = [0, 64], sizes = [2, 32], strides = [1, 1]} : vector<2x128xf32> to vector<2x32xf32>
    %100 = math.tanh %99 : vector<2x32xf32>
    %101 = vector.extract_strided_slice %82 {offsets = [0, 96], sizes = [2, 32], strides = [1, 1]} : vector<2x128xf32> to vector<2x32xf32>
    %102 = arith.negf %101 : vector<2x32xf32>
    %103 = math.exp %102 : vector<2x32xf32>
    %cst_25 = arith.constant 1.000000e+00 : f32
    %104 = vector.broadcast %cst_25 : f32 to vector<2x32xf32>
    %105 = arith.addf %104, %103 : vector<2x32xf32>
    %106 = arith.divf %104, %105 : vector<2x32xf32>
    %107 = arith.mulf %98, %43 : vector<2x32xf32>
    %108 = arith.mulf %92, %100 : vector<2x32xf32>
    %109 = arith.addf %107, %108 : vector<2x32xf32>
    %110 = math.tanh %109 : vector<2x32xf32>
    %111 = arith.mulf %106, %110 : vector<2x32xf32>
    %112 = vector.extract_strided_slice %86 {offsets = [0, 0], sizes = [2, 32], strides = [1, 1]} : vector<2x128xf32> to vector<2x32xf32>
    %113 = arith.negf %112 : vector<2x32xf32>
    %114 = math.exp %113 : vector<2x32xf32>
    %cst_26 = arith.constant 1.000000e+00 : f32
    %115 = vector.broadcast %cst_26 : f32 to vector<2x32xf32>
    %116 = arith.addf %115, %114 : vector<2x32xf32>
    %117 = arith.divf %115, %116 : vector<2x32xf32>
    %118 = vector.extract_strided_slice %86 {offsets = [0, 32], sizes = [2, 32], strides = [1, 1]} : vector<2x128xf32> to vector<2x32xf32>
    %119 = arith.negf %118 : vector<2x32xf32>
    %120 = math.exp %119 : vector<2x32xf32>
    %cst_27 = arith.constant 1.000000e+00 : f32
    %121 = vector.broadcast %cst_27 : f32 to vector<2x32xf32>
    %122 = arith.addf %121, %120 : vector<2x32xf32>
    %123 = arith.divf %121, %122 : vector<2x32xf32>
    %124 = vector.extract_strided_slice %86 {offsets = [0, 64], sizes = [2, 32], strides = [1, 1]} : vector<2x128xf32> to vector<2x32xf32>
    %125 = math.tanh %124 : vector<2x32xf32>
    %126 = vector.extract_strided_slice %86 {offsets = [0, 96], sizes = [2, 32], strides = [1, 1]} : vector<2x128xf32> to vector<2x32xf32>
    %127 = arith.negf %126 : vector<2x32xf32>
    %128 = math.exp %127 : vector<2x32xf32>
    %cst_28 = arith.constant 1.000000e+00 : f32
    %129 = vector.broadcast %cst_28 : f32 to vector<2x32xf32>
    %130 = arith.addf %129, %128 : vector<2x32xf32>
    %131 = arith.divf %129, %130 : vector<2x32xf32>
    %132 = arith.mulf %123, %68 : vector<2x32xf32>
    %133 = arith.mulf %117, %125 : vector<2x32xf32>
    %134 = arith.addf %132, %133 : vector<2x32xf32>
    %135 = math.tanh %134 : vector<2x32xf32>
    %136 = arith.mulf %131, %135 : vector<2x32xf32>
    %137 = tpu.concatenate %111, %136 in 1 : vector<2x32xf32>, vector<2x32xf32> -> vector<2x64xf32>
    %c0_29 = arith.constant 0 : index
    %c1 = arith.constant 1 : index
    %c0_30 = arith.constant 0 : index
    %138 = vector.load %arg12[%c0_29, %c1, %c0_30] : memref<2x8x64xf32, #tpu.memory_space<vmem>>, vector<2x1x32xf32>
    %139 = vector.shape_cast %138 : vector<2x1x32xf32> to vector<2x32xf32>
    %140 = vector.shape_cast %111 : vector<2x32xf32> to vector<2x1x32xf32>
    tpu.vector_store %arg12[%c0_29, %c1, %c0_30], %140 {strides = array<i32>} : memref<2x8x64xf32, #tpu.memory_space<vmem>>, vector<2x1x32xf32>,
    %c0_31 = arith.constant 0 : index
    %c6 = arith.constant 6 : index
    %c32_32 = arith.constant 32 : index
    %141 = vector.load %arg12[%c0_31, %c6, %c32_32] : memref<2x8x64xf32, #tpu.memory_space<vmem>>, vector<2x1x32xf32>
    %142 = vector.shape_cast %141 : vector<2x1x32xf32> to vector<2x32xf32>
    %143 = vector.shape_cast %136 : vector<2x32xf32> to vector<2x1x32xf32>
    tpu.vector_store %arg12[%c0_31, %c6, %c32_32], %143 {strides = array<i32>} : memref<2x8x64xf32, #tpu.memory_space<vmem>>, vector<2x1x32xf32>,
    %cst_33 = arith.constant dense<0.000000e+00> : vector<2x256xf32>
    %144 = tpu.matmul %137, %8, %cst_33 {dimension_numbers = #tpu.dot_dimension_numbers<[1], [0], [0], [1], [0, 0, 1, 1], [], []>} : vector<2x64xf32>, vector<64x256xf32>, vector<2x256xf32> -> vector<2x256xf32>
    %145 = vector.extract_strided_slice %7 {offsets = [0, 2, 0], sizes = [2, 1, 128], strides = [1, 1, 1]} : vector<2x8x256xf32> to vector<2x1x128xf32>
    %146 = vector.shape_cast %145 : vector<2x1x128xf32> to vector<2x128xf32>
    %147 = vector.extract_strided_slice %144 {offsets = [0, 0], sizes = [2, 128], strides = [1, 1]} : vector<2x256xf32> to vector<2x128xf32>
    %148 = arith.addf %146, %147 : vector<2x128xf32>
    %149 = vector.extract_strided_slice %7 {offsets = [0, 5, 128], sizes = [2, 1, 128], strides = [1, 1, 1]} : vector<2x8x256xf32> to vector<2x1x128xf32>
    %150 = vector.shape_cast %149 : vector<2x1x128xf32> to vector<2x128xf32>
    %151 = vector.extract_strided_slice %144 {offsets = [0, 128], sizes = [2, 128], strides = [1, 1]} : vector<2x256xf32> to vector<2x128xf32>
    %152 = arith.addf %150, %151 : vector<2x128xf32>
    %153 = vector.extract_strided_slice %148 {offsets = [0, 0], sizes = [2, 32], strides = [1, 1]} : vector<2x128xf32> to vector<2x32xf32>
    %154 = arith.negf %153 : vector<2x32xf32>
    %155 = math.exp %154 : vector<2x32xf32>
    %cst_34 = arith.constant 1.000000e+00 : f32
    %156 = vector.broadcast %cst_34 : f32 to vector<2x32xf32>
    %157 = arith.addf %156, %155 : vector<2x32xf32>
    %158 = arith.divf %156, %157 : vector<2x32xf32>
    %159 = vector.extract_strided_slice %148 {offsets = [0, 32], sizes = [2, 32], strides = [1, 1]} : vector<2x128xf32> to vector<2x32xf32>
    %160 = arith.negf %159 : vector<2x32xf32>
    %161 = math.exp %160 : vector<2x32xf32>
    %cst_35 = arith.constant 1.000000e+00 : f32
    %162 = vector.broadcast %cst_35 : f32 to vector<2x32xf32>
    %163 = arith.addf %162, %161 : vector<2x32xf32>
    %164 = arith.divf %162, %163 : vector<2x32xf32>
    %165 = vector.extract_strided_slice %148 {offsets = [0, 64], sizes = [2, 32], strides = [1, 1]} : vector<2x128xf32> to vector<2x32xf32>
    %166 = math.tanh %165 : vector<2x32xf32>
    %167 = vector.extract_strided_slice %148 {offsets = [0, 96], sizes = [2, 32], strides = [1, 1]} : vector<2x128xf32> to vector<2x32xf32>
    %168 = arith.negf %167 : vector<2x32xf32>
    %169 = math.exp %168 : vector<2x32xf32>
    %cst_36 = arith.constant 1.000000e+00 : f32
    %170 = vector.broadcast %cst_36 : f32 to vector<2x32xf32>
    %171 = arith.addf %170, %169 : vector<2x32xf32>
    %172 = arith.divf %170, %171 : vector<2x32xf32>
    %173 = arith.mulf %164, %109 : vector<2x32xf32>
    %174 = arith.mulf %158, %166 : vector<2x32xf32>
    %175 = arith.addf %173, %174 : vector<2x32xf32>
    %176 = math.tanh %175 : vector<2x32xf32>
    %177 = arith.mulf %172, %176 : vector<2x32xf32>
    %178 = vector.extract_strided_slice %152 {offsets = [0, 0], sizes = [2, 32], strides = [1, 1]} : vector<2x128xf32> to vector<2x32xf32>
    %179 = arith.negf %178 : vector<2x32xf32>
    %180 = math.exp %179 : vector<2x32xf32>
    %cst_37 = arith.constant 1.000000e+00 : f32
    %181 = vector.broadcast %cst_37 : f32 to vector<2x32xf32>
    %182 = arith.addf %181, %180 : vector<2x32xf32>
    %183 = arith.divf %181, %182 : vector<2x32xf32>
    %184 = vector.extract_strided_slice %152 {offsets = [0, 32], sizes = [2, 32], strides = [1, 1]} : vector<2x128xf32> to vector<2x32xf32>
    %185 = arith.negf %184 : vector<2x32xf32>
    %186 = math.exp %185 : vector<2x32xf32>
    %cst_38 = arith.constant 1.000000e+00 : f32
    %187 = vector.broadcast %cst_38 : f32 to vector<2x32xf32>
    %188 = arith.addf %187, %186 : vector<2x32xf32>
    %189 = arith.divf %187, %188 : vector<2x32xf32>
    %190 = vector.extract_strided_slice %152 {offsets = [0, 64], sizes = [2, 32], strides = [1, 1]} : vector<2x128xf32> to vector<2x32xf32>
    %191 = math.tanh %190 : vector<2x32xf32>
    %192 = vector.extract_strided_slice %152 {offsets = [0, 96], sizes = [2, 32], strides = [1, 1]} : vector<2x128xf32> to vector<2x32xf32>
    %193 = arith.negf %192 : vector<2x32xf32>
    %194 = math.exp %193 : vector<2x32xf32>
    %cst_39 = arith.constant 1.000000e+00 : f32
    %195 = vector.broadcast %cst_39 : f32 to vector<2x32xf32>
    %196 = arith.addf %195, %194 : vector<2x32xf32>
    %197 = arith.divf %195, %196 : vector<2x32xf32>
    %198 = arith.mulf %189, %134 : vector<2x32xf32>
    %199 = arith.mulf %183, %191 : vector<2x32xf32>
    %200 = arith.addf %198, %199 : vector<2x32xf32>
    %201 = math.tanh %200 : vector<2x32xf32>
    %202 = arith.mulf %197, %201 : vector<2x32xf32>
    %203 = tpu.concatenate %177, %202 in 1 : vector<2x32xf32>, vector<2x32xf32> -> vector<2x64xf32>
    %c0_40 = arith.constant 0 : index
    %c2 = arith.constant 2 : index
    %c0_41 = arith.constant 0 : index
    %204 = vector.load %arg12[%c0_40, %c2, %c0_41] : memref<2x8x64xf32, #tpu.memory_space<vmem>>, vector<2x1x32xf32>
    %205 = vector.shape_cast %204 : vector<2x1x32xf32> to vector<2x32xf32>
    %206 = vector.shape_cast %177 : vector<2x32xf32> to vector<2x1x32xf32>
    tpu.vector_store %arg12[%c0_40, %c2, %c0_41], %206 {strides = array<i32>} : memref<2x8x64xf32, #tpu.memory_space<vmem>>, vector<2x1x32xf32>,
    %c0_42 = arith.constant 0 : index
    %c5 = arith.constant 5 : index
    %c32_43 = arith.constant 32 : index
    %207 = vector.load %arg12[%c0_42, %c5, %c32_43] : memref<2x8x64xf32, #tpu.memory_space<vmem>>, vector<2x1x32xf32>
    %208 = vector.shape_cast %207 : vector<2x1x32xf32> to vector<2x32xf32>
    %209 = vector.shape_cast %202 : vector<2x32xf32> to vector<2x1x32xf32>
    tpu.vector_store %arg12[%c0_42, %c5, %c32_43], %209 {strides = array<i32>} : memref<2x8x64xf32, #tpu.memory_space<vmem>>, vector<2x1x32xf32>,
    %cst_44 = arith.constant dense<0.000000e+00> : vector<2x256xf32>
    %210 = tpu.matmul %203, %8, %cst_44 {dimension_numbers = #tpu.dot_dimension_numbers<[1], [0], [0], [1], [0, 0, 1, 1], [], []>} : vector<2x64xf32>, vector<64x256xf32>, vector<2x256xf32> -> vector<2x256xf32>
    %211 = vector.extract_strided_slice %7 {offsets = [0, 3, 0], sizes = [2, 1, 128], strides = [1, 1, 1]} : vector<2x8x256xf32> to vector<2x1x128xf32>
    %212 = vector.shape_cast %211 : vector<2x1x128xf32> to vector<2x128xf32>
    %213 = vector.extract_strided_slice %210 {offsets = [0, 0], sizes = [2, 128], strides = [1, 1]} : vector<2x256xf32> to vector<2x128xf32>
    %214 = arith.addf %212, %213 : vector<2x128xf32>
    %215 = vector.extract_strided_slice %7 {offsets = [0, 4, 128], sizes = [2, 1, 128], strides = [1, 1, 1]} : vector<2x8x256xf32> to vector<2x1x128xf32>
    %216 = vector.shape_cast %215 : vector<2x1x128xf32> to vector<2x128xf32>
    %217 = vector.extract_strided_slice %210 {offsets = [0, 128], sizes = [2, 128], strides = [1, 1]} : vector<2x256xf32> to vector<2x128xf32>
    %218 = arith.addf %216, %217 : vector<2x128xf32>
    %219 = vector.extract_strided_slice %214 {offsets = [0, 0], sizes = [2, 32], strides = [1, 1]} : vector<2x128xf32> to vector<2x32xf32>
    %220 = arith.negf %219 : vector<2x32xf32>
    %221 = math.exp %220 : vector<2x32xf32>
    %cst_45 = arith.constant 1.000000e+00 : f32
    %222 = vector.broadcast %cst_45 : f32 to vector<2x32xf32>
    %223 = arith.addf %222, %221 : vector<2x32xf32>
    %224 = arith.divf %222, %223 : vector<2x32xf32>
    %225 = vector.extract_strided_slice %214 {offsets = [0, 32], sizes = [2, 32], strides = [1, 1]} : vector<2x128xf32> to vector<2x32xf32>
    %226 = arith.negf %225 : vector<2x32xf32>
    %227 = math.exp %226 : vector<2x32xf32>
    %cst_46 = arith.constant 1.000000e+00 : f32
    %228 = vector.broadcast %cst_46 : f32 to vector<2x32xf32>
    %229 = arith.addf %228, %227 : vector<2x32xf32>
    %230 = arith.divf %228, %229 : vector<2x32xf32>
    %231 = vector.extract_strided_slice %214 {offsets = [0, 64], sizes = [2, 32], strides = [1, 1]} : vector<2x128xf32> to vector<2x32xf32>
    %232 = math.tanh %231 : vector<2x32xf32>
    %233 = vector.extract_strided_slice %214 {offsets = [0, 96], sizes = [2, 32], strides = [1, 1]} : vector<2x128xf32> to vector<2x32xf32>
    %234 = arith.negf %233 : vector<2x32xf32>
    %235 = math.exp %234 : vector<2x32xf32>
    %cst_47 = arith.constant 1.000000e+00 : f32
    %236 = vector.broadcast %cst_47 : f32 to vector<2x32xf32>
    %237 = arith.addf %236, %235 : vector<2x32xf32>
    %238 = arith.divf %236, %237 : vector<2x32xf32>
    %239 = arith.mulf %230, %175 : vector<2x32xf32>
    %240 = arith.mulf %224, %232 : vector<2x32xf32>
    %241 = arith.addf %239, %240 : vector<2x32xf32>
    %242 = math.tanh %241 : vector<2x32xf32>
    %243 = arith.mulf %238, %242 : vector<2x32xf32>
    %244 = vector.extract_strided_slice %218 {offsets = [0, 0], sizes = [2, 32], strides = [1, 1]} : vector<2x128xf32> to vector<2x32xf32>
    %245 = arith.negf %244 : vector<2x32xf32>
    %246 = math.exp %245 : vector<2x32xf32>
    %cst_48 = arith.constant 1.000000e+00 : f32
    %247 = vector.broadcast %cst_48 : f32 to vector<2x32xf32>
    %248 = arith.addf %247, %246 : vector<2x32xf32>
    %249 = arith.divf %247, %248 : vector<2x32xf32>
    %250 = vector.extract_strided_slice %218 {offsets = [0, 32], sizes = [2, 32], strides = [1, 1]} : vector<2x128xf32> to vector<2x32xf32>
    %251 = arith.negf %250 : vector<2x32xf32>
    %252 = math.exp %251 : vector<2x32xf32>
    %cst_49 = arith.constant 1.000000e+00 : f32
    %253 = vector.broadcast %cst_49 : f32 to vector<2x32xf32>
    %254 = arith.addf %253, %252 : vector<2x32xf32>
    %255 = arith.divf %253, %254 : vector<2x32xf32>
    %256 = vector.extract_strided_slice %218 {offsets = [0, 64], sizes = [2, 32], strides = [1, 1]} : vector<2x128xf32> to vector<2x32xf32>
    %257 = math.tanh %256 : vector<2x32xf32>
    %258 = vector.extract_strided_slice %218 {offsets = [0, 96], sizes = [2, 32], strides = [1, 1]} : vector<2x128xf32> to vector<2x32xf32>
    %259 = arith.negf %258 : vector<2x32xf32>
    %260 = math.exp %259 : vector<2x32xf32>
    %cst_50 = arith.constant 1.000000e+00 : f32
    %261 = vector.broadcast %cst_50 : f32 to vector<2x32xf32>
    %262 = arith.addf %261, %260 : vector<2x32xf32>
    %263 = arith.divf %261, %262 : vector<2x32xf32>
    %264 = arith.mulf %255, %200 : vector<2x32xf32>
    %265 = arith.mulf %249, %257 : vector<2x32xf32>
    %266 = arith.addf %264, %265 : vector<2x32xf32>
    %267 = math.tanh %266 : vector<2x32xf32>
    %268 = arith.mulf %263, %267 : vector<2x32xf32>
    %269 = tpu.concatenate %243, %268 in 1 : vector<2x32xf32>, vector<2x32xf32> -> vector<2x64xf32>
    %c0_51 = arith.constant 0 : index
    %c3 = arith.constant 3 : index
    %c0_52 = arith.constant 0 : index
    %270 = vector.load %arg12[%c0_51, %c3, %c0_52] : memref<2x8x64xf32, #tpu.memory_space<vmem>>, vector<2x1x32xf32>
    %271 = vector.shape_cast %270 : vector<2x1x32xf32> to vector<2x32xf32>
    %272 = vector.shape_cast %243 : vector<2x32xf32> to vector<2x1x32xf32>
    tpu.vector_store %arg12[%c0_51, %c3, %c0_52], %272 {strides = array<i32>} : memref<2x8x64xf32, #tpu.memory_space<vmem>>, vector<2x1x32xf32>,
    %c0_53 = arith.constant 0 : index
    %c4 = arith.constant 4 : index
    %c32_54 = arith.constant 32 : index
    %273 = vector.load %arg12[%c0_53, %c4, %c32_54] : memref<2x8x64xf32, #tpu.memory_space<vmem>>, vector<2x1x32xf32>
    %274 = vector.shape_cast %273 : vector<2x1x32xf32> to vector<2x32xf32>
    %275 = vector.shape_cast %268 : vector<2x32xf32> to vector<2x1x32xf32>
    tpu.vector_store %arg12[%c0_53, %c4, %c32_54], %275 {strides = array<i32>} : memref<2x8x64xf32, #tpu.memory_space<vmem>>, vector<2x1x32xf32>,
    %cst_55 = arith.constant dense<0.000000e+00> : vector<2x256xf32>
    %276 = tpu.matmul %269, %8, %cst_55 {dimension_numbers = #tpu.dot_dimension_numbers<[1], [0], [0], [1], [0, 0, 1, 1], [], []>} : vector<2x64xf32>, vector<64x256xf32>, vector<2x256xf32> -> vector<2x256xf32>
    %277 = vector.extract_strided_slice %7 {offsets = [0, 4, 0], sizes = [2, 1, 128], strides = [1, 1, 1]} : vector<2x8x256xf32> to vector<2x1x128xf32>
    %278 = vector.shape_cast %277 : vector<2x1x128xf32> to vector<2x128xf32>
    %279 = vector.extract_strided_slice %276 {offsets = [0, 0], sizes = [2, 128], strides = [1, 1]} : vector<2x256xf32> to vector<2x128xf32>
    %280 = arith.addf %278, %279 : vector<2x128xf32>
    %281 = vector.extract_strided_slice %7 {offsets = [0, 3, 128], sizes = [2, 1, 128], strides = [1, 1, 1]} : vector<2x8x256xf32> to vector<2x1x128xf32>
    %282 = vector.shape_cast %281 : vector<2x1x128xf32> to vector<2x128xf32>
    %283 = vector.extract_strided_slice %276 {offsets = [0, 128], sizes = [2, 128], strides = [1, 1]} : vector<2x256xf32> to vector<2x128xf32>
    %284 = arith.addf %282, %283 : vector<2x128xf32>
    %285 = vector.extract_strided_slice %280 {offsets = [0, 0], sizes = [2, 32], strides = [1, 1]} : vector<2x128xf32> to vector<2x32xf32>
    %286 = arith.negf %285 : vector<2x32xf32>
    %287 = math.exp %286 : vector<2x32xf32>
    %cst_56 = arith.constant 1.000000e+00 : f32
    %288 = vector.broadcast %cst_56 : f32 to vector<2x32xf32>
    %289 = arith.addf %288, %287 : vector<2x32xf32>
    %290 = arith.divf %288, %289 : vector<2x32xf32>
    %291 = vector.extract_strided_slice %280 {offsets = [0, 32], sizes = [2, 32], strides = [1, 1]} : vector<2x128xf32> to vector<2x32xf32>
    %292 = arith.negf %291 : vector<2x32xf32>
    %293 = math.exp %292 : vector<2x32xf32>
    %cst_57 = arith.constant 1.000000e+00 : f32
    %294 = vector.broadcast %cst_57 : f32 to vector<2x32xf32>
    %295 = arith.addf %294, %293 : vector<2x32xf32>
    %296 = arith.divf %294, %295 : vector<2x32xf32>
    %297 = vector.extract_strided_slice %280 {offsets = [0, 64], sizes = [2, 32], strides = [1, 1]} : vector<2x128xf32> to vector<2x32xf32>
    %298 = math.tanh %297 : vector<2x32xf32>
    %299 = vector.extract_strided_slice %280 {offsets = [0, 96], sizes = [2, 32], strides = [1, 1]} : vector<2x128xf32> to vector<2x32xf32>
    %300 = arith.negf %299 : vector<2x32xf32>
    %301 = math.exp %300 : vector<2x32xf32>
    %cst_58 = arith.constant 1.000000e+00 : f32
    %302 = vector.broadcast %cst_58 : f32 to vector<2x32xf32>
    %303 = arith.addf %302, %301 : vector<2x32xf32>
    %304 = arith.divf %302, %303 : vector<2x32xf32>
    %305 = arith.mulf %296, %241 : vector<2x32xf32>
    %306 = arith.mulf %290, %298 : vector<2x32xf32>
    %307 = arith.addf %305, %306 : vector<2x32xf32>
    %308 = math.tanh %307 : vector<2x32xf32>
    %309 = arith.mulf %304, %308 : vector<2x32xf32>
    %310 = vector.extract_strided_slice %284 {offsets = [0, 0], sizes = [2, 32], strides = [1, 1]} : vector<2x128xf32> to vector<2x32xf32>
    %311 = arith.negf %310 : vector<2x32xf32>
    %312 = math.exp %311 : vector<2x32xf32>
    %cst_59 = arith.constant 1.000000e+00 : f32
    %313 = vector.broadcast %cst_59 : f32 to vector<2x32xf32>
    %314 = arith.addf %313, %312 : vector<2x32xf32>
    %315 = arith.divf %313, %314 : vector<2x32xf32>
    %316 = vector.extract_strided_slice %284 {offsets = [0, 32], sizes = [2, 32], strides = [1, 1]} : vector<2x128xf32> to vector<2x32xf32>
    %317 = arith.negf %316 : vector<2x32xf32>
    %318 = math.exp %317 : vector<2x32xf32>
    %cst_60 = arith.constant 1.000000e+00 : f32
    %319 = vector.broadcast %cst_60 : f32 to vector<2x32xf32>
    %320 = arith.addf %319, %318 : vector<2x32xf32>
    %321 = arith.divf %319, %320 : vector<2x32xf32>
    %322 = vector.extract_strided_slice %284 {offsets = [0, 64], sizes = [2, 32], strides = [1, 1]} : vector<2x128xf32> to vector<2x32xf32>
    %323 = math.tanh %322 : vector<2x32xf32>
    %324 = vector.extract_strided_slice %284 {offsets = [0, 96], sizes = [2, 32], strides = [1, 1]} : vector<2x128xf32> to vector<2x32xf32>
    %325 = arith.negf %324 : vector<2x32xf32>
    %326 = math.exp %325 : vector<2x32xf32>
    %cst_61 = arith.constant 1.000000e+00 : f32
    %327 = vector.broadcast %cst_61 : f32 to vector<2x32xf32>
    %328 = arith.addf %327, %326 : vector<2x32xf32>
    %329 = arith.divf %327, %328 : vector<2x32xf32>
    %330 = arith.mulf %321, %266 : vector<2x32xf32>
    %331 = arith.mulf %315, %323 : vector<2x32xf32>
    %332 = arith.addf %330, %331 : vector<2x32xf32>
    %333 = math.tanh %332 : vector<2x32xf32>
    %334 = arith.mulf %329, %333 : vector<2x32xf32>
    %335 = tpu.concatenate %309, %334 in 1 : vector<2x32xf32>, vector<2x32xf32> -> vector<2x64xf32>
    %c0_62 = arith.constant 0 : index
    %c4_63 = arith.constant 4 : index
    %c0_64 = arith.constant 0 : index
    %336 = vector.load %arg12[%c0_62, %c4_63, %c0_64] : memref<2x8x64xf32, #tpu.memory_space<vmem>>, vector<2x1x32xf32>
    %337 = vector.shape_cast %336 : vector<2x1x32xf32> to vector<2x32xf32>
    %338 = vector.shape_cast %309 : vector<2x32xf32> to vector<2x1x32xf32>
    tpu.vector_store %arg12[%c0_62, %c4_63, %c0_64], %338 {strides = array<i32>} : memref<2x8x64xf32, #tpu.memory_space<vmem>>, vector<2x1x32xf32>,
    %c0_65 = arith.constant 0 : index
    %c3_66 = arith.constant 3 : index
    %c32_67 = arith.constant 32 : index
    %339 = vector.load %arg12[%c0_65, %c3_66, %c32_67] : memref<2x8x64xf32, #tpu.memory_space<vmem>>, vector<2x1x32xf32>
    %340 = vector.shape_cast %339 : vector<2x1x32xf32> to vector<2x32xf32>
    %341 = vector.shape_cast %334 : vector<2x32xf32> to vector<2x1x32xf32>
    tpu.vector_store %arg12[%c0_65, %c3_66, %c32_67], %341 {strides = array<i32>} : memref<2x8x64xf32, #tpu.memory_space<vmem>>, vector<2x1x32xf32>,
    %cst_68 = arith.constant dense<0.000000e+00> : vector<2x256xf32>
    %342 = tpu.matmul %335, %8, %cst_68 {dimension_numbers = #tpu.dot_dimension_numbers<[1], [0], [0], [1], [0, 0, 1, 1], [], []>} : vector<2x64xf32>, vector<64x256xf32>, vector<2x256xf32> -> vector<2x256xf32>
    %343 = vector.extract_strided_slice %7 {offsets = [0, 5, 0], sizes = [2, 1, 128], strides = [1, 1, 1]} : vector<2x8x256xf32> to vector<2x1x128xf32>
    %344 = vector.shape_cast %343 : vector<2x1x128xf32> to vector<2x128xf32>
    %345 = vector.extract_strided_slice %342 {offsets = [0, 0], sizes = [2, 128], strides = [1, 1]} : vector<2x256xf32> to vector<2x128xf32>
    %346 = arith.addf %344, %345 : vector<2x128xf32>
    %347 = vector.extract_strided_slice %7 {offsets = [0, 2, 128], sizes = [2, 1, 128], strides = [1, 1, 1]} : vector<2x8x256xf32> to vector<2x1x128xf32>
    %348 = vector.shape_cast %347 : vector<2x1x128xf32> to vector<2x128xf32>
    %349 = vector.extract_strided_slice %342 {offsets = [0, 128], sizes = [2, 128], strides = [1, 1]} : vector<2x256xf32> to vector<2x128xf32>
    %350 = arith.addf %348, %349 : vector<2x128xf32>
    %351 = vector.extract_strided_slice %346 {offsets = [0, 0], sizes = [2, 32], strides = [1, 1]} : vector<2x128xf32> to vector<2x32xf32>
    %352 = arith.negf %351 : vector<2x32xf32>
    %353 = math.exp %352 : vector<2x32xf32>
    %cst_69 = arith.constant 1.000000e+00 : f32
    %354 = vector.broadcast %cst_69 : f32 to vector<2x32xf32>
    %355 = arith.addf %354, %353 : vector<2x32xf32>
    %356 = arith.divf %354, %355 : vector<2x32xf32>
    %357 = vector.extract_strided_slice %346 {offsets = [0, 32], sizes = [2, 32], strides = [1, 1]} : vector<2x128xf32> to vector<2x32xf32>
    %358 = arith.negf %357 : vector<2x32xf32>
    %359 = math.exp %358 : vector<2x32xf32>
    %cst_70 = arith.constant 1.000000e+00 : f32
    %360 = vector.broadcast %cst_70 : f32 to vector<2x32xf32>
    %361 = arith.addf %360, %359 : vector<2x32xf32>
    %362 = arith.divf %360, %361 : vector<2x32xf32>
    %363 = vector.extract_strided_slice %346 {offsets = [0, 64], sizes = [2, 32], strides = [1, 1]} : vector<2x128xf32> to vector<2x32xf32>
    %364 = math.tanh %363 : vector<2x32xf32>
    %365 = vector.extract_strided_slice %346 {offsets = [0, 96], sizes = [2, 32], strides = [1, 1]} : vector<2x128xf32> to vector<2x32xf32>
    %366 = arith.negf %365 : vector<2x32xf32>
    %367 = math.exp %366 : vector<2x32xf32>
    %cst_71 = arith.constant 1.000000e+00 : f32
    %368 = vector.broadcast %cst_71 : f32 to vector<2x32xf32>
    %369 = arith.addf %368, %367 : vector<2x32xf32>
    %370 = arith.divf %368, %369 : vector<2x32xf32>
    %371 = arith.mulf %362, %307 : vector<2x32xf32>
    %372 = arith.mulf %356, %364 : vector<2x32xf32>
    %373 = arith.addf %371, %372 : vector<2x32xf32>
    %374 = math.tanh %373 : vector<2x32xf32>
    %375 = arith.mulf %370, %374 : vector<2x32xf32>
    %376 = vector.extract_strided_slice %350 {offsets = [0, 0], sizes = [2, 32], strides = [1, 1]} : vector<2x128xf32> to vector<2x32xf32>
    %377 = arith.negf %376 : vector<2x32xf32>
    %378 = math.exp %377 : vector<2x32xf32>
    %cst_72 = arith.constant 1.000000e+00 : f32
    %379 = vector.broadcast %cst_72 : f32 to vector<2x32xf32>
    %380 = arith.addf %379, %378 : vector<2x32xf32>
    %381 = arith.divf %379, %380 : vector<2x32xf32>
    %382 = vector.extract_strided_slice %350 {offsets = [0, 32], sizes = [2, 32], strides = [1, 1]} : vector<2x128xf32> to vector<2x32xf32>
    %383 = arith.negf %382 : vector<2x32xf32>
    %384 = math.exp %383 : vector<2x32xf32>
    %cst_73 = arith.constant 1.000000e+00 : f32
    %385 = vector.broadcast %cst_73 : f32 to vector<2x32xf32>
    %386 = arith.addf %385, %384 : vector<2x32xf32>
    %387 = arith.divf %385, %386 : vector<2x32xf32>
    %388 = vector.extract_strided_slice %350 {offsets = [0, 64], sizes = [2, 32], strides = [1, 1]} : vector<2x128xf32> to vector<2x32xf32>
    %389 = math.tanh %388 : vector<2x32xf32>
    %390 = vector.extract_strided_slice %350 {offsets = [0, 96], sizes = [2, 32], strides = [1, 1]} : vector<2x128xf32> to vector<2x32xf32>
    %391 = arith.negf %390 : vector<2x32xf32>
    %392 = math.exp %391 : vector<2x32xf32>
    %cst_74 = arith.constant 1.000000e+00 : f32
    %393 = vector.broadcast %cst_74 : f32 to vector<2x32xf32>
    %394 = arith.addf %393, %392 : vector<2x32xf32>
    %395 = arith.divf %393, %394 : vector<2x32xf32>
    %396 = arith.mulf %387, %332 : vector<2x32xf32>
    %397 = arith.mulf %381, %389 : vector<2x32xf32>
    %398 = arith.addf %396, %397 : vector<2x32xf32>
    %399 = math.tanh %398 : vector<2x32xf32>
    %400 = arith.mulf %395, %399 : vector<2x32xf32>
    %401 = tpu.concatenate %375, %400 in 1 : vector<2x32xf32>, vector<2x32xf32> -> vector<2x64xf32>
    %c0_75 = arith.constant 0 : index
    %c5_76 = arith.constant 5 : index
    %c0_77 = arith.constant 0 : index
    %402 = vector.load %arg12[%c0_75, %c5_76, %c0_77] : memref<2x8x64xf32, #tpu.memory_space<vmem>>, vector<2x1x32xf32>
    %403 = vector.shape_cast %402 : vector<2x1x32xf32> to vector<2x32xf32>
    %404 = vector.shape_cast %375 : vector<2x32xf32> to vector<2x1x32xf32>
    tpu.vector_store %arg12[%c0_75, %c5_76, %c0_77], %404 {strides = array<i32>} : memref<2x8x64xf32, #tpu.memory_space<vmem>>, vector<2x1x32xf32>,
    %c0_78 = arith.constant 0 : index
    %c2_79 = arith.constant 2 : index
    %c32_80 = arith.constant 32 : index
    %405 = vector.load %arg12[%c0_78, %c2_79, %c32_80] : memref<2x8x64xf32, #tpu.memory_space<vmem>>, vector<2x1x32xf32>
    %406 = vector.shape_cast %405 : vector<2x1x32xf32> to vector<2x32xf32>
    %407 = vector.shape_cast %400 : vector<2x32xf32> to vector<2x1x32xf32>
    tpu.vector_store %arg12[%c0_78, %c2_79, %c32_80], %407 {strides = array<i32>} : memref<2x8x64xf32, #tpu.memory_space<vmem>>, vector<2x1x32xf32>,
    %cst_81 = arith.constant dense<0.000000e+00> : vector<2x256xf32>
    %408 = tpu.matmul %401, %8, %cst_81 {dimension_numbers = #tpu.dot_dimension_numbers<[1], [0], [0], [1], [0, 0, 1, 1], [], []>} : vector<2x64xf32>, vector<64x256xf32>, vector<2x256xf32> -> vector<2x256xf32>
    %409 = vector.extract_strided_slice %7 {offsets = [0, 6, 0], sizes = [2, 1, 128], strides = [1, 1, 1]} : vector<2x8x256xf32> to vector<2x1x128xf32>
    %410 = vector.shape_cast %409 : vector<2x1x128xf32> to vector<2x128xf32>
    %411 = vector.extract_strided_slice %408 {offsets = [0, 0], sizes = [2, 128], strides = [1, 1]} : vector<2x256xf32> to vector<2x128xf32>
    %412 = arith.addf %410, %411 : vector<2x128xf32>
    %413 = vector.extract_strided_slice %7 {offsets = [0, 1, 128], sizes = [2, 1, 128], strides = [1, 1, 1]} : vector<2x8x256xf32> to vector<2x1x128xf32>
    %414 = vector.shape_cast %413 : vector<2x1x128xf32> to vector<2x128xf32>
    %415 = vector.extract_strided_slice %408 {offsets = [0, 128], sizes = [2, 128], strides = [1, 1]} : vector<2x256xf32> to vector<2x128xf32>
    %416 = arith.addf %414, %415 : vector<2x128xf32>
    %417 = vector.extract_strided_slice %412 {offsets = [0, 0], sizes = [2, 32], strides = [1, 1]} : vector<2x128xf32> to vector<2x32xf32>
    %418 = arith.negf %417 : vector<2x32xf32>
    %419 = math.exp %418 : vector<2x32xf32>
    %cst_82 = arith.constant 1.000000e+00 : f32
    %420 = vector.broadcast %cst_82 : f32 to vector<2x32xf32>
    %421 = arith.addf %420, %419 : vector<2x32xf32>
    %422 = arith.divf %420, %421 : vector<2x32xf32>
    %423 = vector.extract_strided_slice %412 {offsets = [0, 32], sizes = [2, 32], strides = [1, 1]} : vector<2x128xf32> to vector<2x32xf32>
    %424 = arith.negf %423 : vector<2x32xf32>
    %425 = math.exp %424 : vector<2x32xf32>
    %cst_83 = arith.constant 1.000000e+00 : f32
    %426 = vector.broadcast %cst_83 : f32 to vector<2x32xf32>
    %427 = arith.addf %426, %425 : vector<2x32xf32>
    %428 = arith.divf %426, %427 : vector<2x32xf32>
    %429 = vector.extract_strided_slice %412 {offsets = [0, 64], sizes = [2, 32], strides = [1, 1]} : vector<2x128xf32> to vector<2x32xf32>
    %430 = math.tanh %429 : vector<2x32xf32>
    %431 = vector.extract_strided_slice %412 {offsets = [0, 96], sizes = [2, 32], strides = [1, 1]} : vector<2x128xf32> to vector<2x32xf32>
    %432 = arith.negf %431 : vector<2x32xf32>
    %433 = math.exp %432 : vector<2x32xf32>
    %cst_84 = arith.constant 1.000000e+00 : f32
    %434 = vector.broadcast %cst_84 : f32 to vector<2x32xf32>
    %435 = arith.addf %434, %433 : vector<2x32xf32>
    %436 = arith.divf %434, %435 : vector<2x32xf32>
    %437 = arith.mulf %428, %373 : vector<2x32xf32>
    %438 = arith.mulf %422, %430 : vector<2x32xf32>
    %439 = arith.addf %437, %438 : vector<2x32xf32>
    %440 = math.tanh %439 : vector<2x32xf32>
    %441 = arith.mulf %436, %440 : vector<2x32xf32>
    %442 = vector.extract_strided_slice %416 {offsets = [0, 0], sizes = [2, 32], strides = [1, 1]} : vector<2x128xf32> to vector<2x32xf32>
    %443 = arith.negf %442 : vector<2x32xf32>
    %444 = math.exp %443 : vector<2x32xf32>
    %cst_85 = arith.constant 1.000000e+00 : f32
    %445 = vector.broadcast %cst_85 : f32 to vector<2x32xf32>
    %446 = arith.addf %445, %444 : vector<2x32xf32>
    %447 = arith.divf %445, %446 : vector<2x32xf32>
    %448 = vector.extract_strided_slice %416 {offsets = [0, 32], sizes = [2, 32], strides = [1, 1]} : vector<2x128xf32> to vector<2x32xf32>
    %449 = arith.negf %448 : vector<2x32xf32>
    %450 = math.exp %449 : vector<2x32xf32>
    %cst_86 = arith.constant 1.000000e+00 : f32
    %451 = vector.broadcast %cst_86 : f32 to vector<2x32xf32>
    %452 = arith.addf %451, %450 : vector<2x32xf32>
    %453 = arith.divf %451, %452 : vector<2x32xf32>
    %454 = vector.extract_strided_slice %416 {offsets = [0, 64], sizes = [2, 32], strides = [1, 1]} : vector<2x128xf32> to vector<2x32xf32>
    %455 = math.tanh %454 : vector<2x32xf32>
    %456 = vector.extract_strided_slice %416 {offsets = [0, 96], sizes = [2, 32], strides = [1, 1]} : vector<2x128xf32> to vector<2x32xf32>
    %457 = arith.negf %456 : vector<2x32xf32>
    %458 = math.exp %457 : vector<2x32xf32>
    %cst_87 = arith.constant 1.000000e+00 : f32
    %459 = vector.broadcast %cst_87 : f32 to vector<2x32xf32>
    %460 = arith.addf %459, %458 : vector<2x32xf32>
    %461 = arith.divf %459, %460 : vector<2x32xf32>
    %462 = arith.mulf %453, %398 : vector<2x32xf32>
    %463 = arith.mulf %447, %455 : vector<2x32xf32>
    %464 = arith.addf %462, %463 : vector<2x32xf32>
    %465 = math.tanh %464 : vector<2x32xf32>
    %466 = arith.mulf %461, %465 : vector<2x32xf32>
    %467 = tpu.concatenate %441, %466 in 1 : vector<2x32xf32>, vector<2x32xf32> -> vector<2x64xf32>
    %c0_88 = arith.constant 0 : index
    %c6_89 = arith.constant 6 : index
    %c0_90 = arith.constant 0 : index
    %468 = vector.load %arg12[%c0_88, %c6_89, %c0_90] : memref<2x8x64xf32, #tpu.memory_space<vmem>>, vector<2x1x32xf32>
    %469 = vector.shape_cast %468 : vector<2x1x32xf32> to vector<2x32xf32>
    %470 = vector.shape_cast %441 : vector<2x32xf32> to vector<2x1x32xf32>
    tpu.vector_store %arg12[%c0_88, %c6_89, %c0_90], %470 {strides = array<i32>} : memref<2x8x64xf32, #tpu.memory_space<vmem>>, vector<2x1x32xf32>,
    %c0_91 = arith.constant 0 : index
    %c1_92 = arith.constant 1 : index
    %c32_93 = arith.constant 32 : index
    %471 = vector.load %arg12[%c0_91, %c1_92, %c32_93] : memref<2x8x64xf32, #tpu.memory_space<vmem>>, vector<2x1x32xf32>
    %472 = vector.shape_cast %471 : vector<2x1x32xf32> to vector<2x32xf32>
    %473 = vector.shape_cast %466 : vector<2x32xf32> to vector<2x1x32xf32>
    tpu.vector_store %arg12[%c0_91, %c1_92, %c32_93], %473 {strides = array<i32>} : memref<2x8x64xf32, #tpu.memory_space<vmem>>, vector<2x1x32xf32>,
    %cst_94 = arith.constant dense<0.000000e+00> : vector<2x256xf32>
    %474 = tpu.matmul %467, %8, %cst_94 {dimension_numbers = #tpu.dot_dimension_numbers<[1], [0], [0], [1], [0, 0, 1, 1], [], []>} : vector<2x64xf32>, vector<64x256xf32>, vector<2x256xf32> -> vector<2x256xf32>
    %475 = vector.extract_strided_slice %7 {offsets = [0, 7, 0], sizes = [2, 1, 128], strides = [1, 1, 1]} : vector<2x8x256xf32> to vector<2x1x128xf32>
    %476 = vector.shape_cast %475 : vector<2x1x128xf32> to vector<2x128xf32>
    %477 = vector.extract_strided_slice %474 {offsets = [0, 0], sizes = [2, 128], strides = [1, 1]} : vector<2x256xf32> to vector<2x128xf32>
    %478 = arith.addf %476, %477 : vector<2x128xf32>
    %479 = vector.extract_strided_slice %7 {offsets = [0, 0, 128], sizes = [2, 1, 128], strides = [1, 1, 1]} : vector<2x8x256xf32> to vector<2x1x128xf32>
    %480 = vector.shape_cast %479 : vector<2x1x128xf32> to vector<2x128xf32>
    %481 = vector.extract_strided_slice %474 {offsets = [0, 128], sizes = [2, 128], strides = [1, 1]} : vector<2x256xf32> to vector<2x128xf32>
    %482 = arith.addf %480, %481 : vector<2x128xf32>
    %483 = vector.extract_strided_slice %478 {offsets = [0, 0], sizes = [2, 32], strides = [1, 1]} : vector<2x128xf32> to vector<2x32xf32>
    %484 = arith.negf %483 : vector<2x32xf32>
    %485 = math.exp %484 : vector<2x32xf32>
    %cst_95 = arith.constant 1.000000e+00 : f32
    %486 = vector.broadcast %cst_95 : f32 to vector<2x32xf32>
    %487 = arith.addf %486, %485 : vector<2x32xf32>
    %488 = arith.divf %486, %487 : vector<2x32xf32>
    %489 = vector.extract_strided_slice %478 {offsets = [0, 32], sizes = [2, 32], strides = [1, 1]} : vector<2x128xf32> to vector<2x32xf32>
    %490 = arith.negf %489 : vector<2x32xf32>
    %491 = math.exp %490 : vector<2x32xf32>
    %cst_96 = arith.constant 1.000000e+00 : f32
    %492 = vector.broadcast %cst_96 : f32 to vector<2x32xf32>
    %493 = arith.addf %492, %491 : vector<2x32xf32>
    %494 = arith.divf %492, %493 : vector<2x32xf32>
    %495 = vector.extract_strided_slice %478 {offsets = [0, 64], sizes = [2, 32], strides = [1, 1]} : vector<2x128xf32> to vector<2x32xf32>
    %496 = math.tanh %495 : vector<2x32xf32>
    %497 = vector.extract_strided_slice %478 {offsets = [0, 96], sizes = [2, 32], strides = [1, 1]} : vector<2x128xf32> to vector<2x32xf32>
    %498 = arith.negf %497 : vector<2x32xf32>
    %499 = math.exp %498 : vector<2x32xf32>
    %cst_97 = arith.constant 1.000000e+00 : f32
    %500 = vector.broadcast %cst_97 : f32 to vector<2x32xf32>
    %501 = arith.addf %500, %499 : vector<2x32xf32>
    %502 = arith.divf %500, %501 : vector<2x32xf32>
    %503 = arith.mulf %494, %439 : vector<2x32xf32>
    %504 = arith.mulf %488, %496 : vector<2x32xf32>
    %505 = arith.addf %503, %504 : vector<2x32xf32>
    %506 = math.tanh %505 : vector<2x32xf32>
    %507 = arith.mulf %502, %506 : vector<2x32xf32>
    %508 = vector.extract_strided_slice %482 {offsets = [0, 0], sizes = [2, 32], strides = [1, 1]} : vector<2x128xf32> to vector<2x32xf32>
    %509 = arith.negf %508 : vector<2x32xf32>
    %510 = math.exp %509 : vector<2x32xf32>
    %cst_98 = arith.constant 1.000000e+00 : f32
    %511 = vector.broadcast %cst_98 : f32 to vector<2x32xf32>
    %512 = arith.addf %511, %510 : vector<2x32xf32>
    %513 = arith.divf %511, %512 : vector<2x32xf32>
    %514 = vector.extract_strided_slice %482 {offsets = [0, 32], sizes = [2, 32], strides = [1, 1]} : vector<2x128xf32> to vector<2x32xf32>
    %515 = arith.negf %514 : vector<2x32xf32>
    %516 = math.exp %515 : vector<2x32xf32>
    %cst_99 = arith.constant 1.000000e+00 : f32
    %517 = vector.broadcast %cst_99 : f32 to vector<2x32xf32>
    %518 = arith.addf %517, %516 : vector<2x32xf32>
    %519 = arith.divf %517, %518 : vector<2x32xf32>
    %520 = vector.extract_strided_slice %482 {offsets = [0, 64], sizes = [2, 32], strides = [1, 1]} : vector<2x128xf32> to vector<2x32xf32>
    %521 = math.tanh %520 : vector<2x32xf32>
    %522 = vector.extract_strided_slice %482 {offsets = [0, 96], sizes = [2, 32], strides = [1, 1]} : vector<2x128xf32> to vector<2x32xf32>
    %523 = arith.negf %522 : vector<2x32xf32>
    %524 = math.exp %523 : vector<2x32xf32>
    %cst_100 = arith.constant 1.000000e+00 : f32
    %525 = vector.broadcast %cst_100 : f32 to vector<2x32xf32>
    %526 = arith.addf %525, %524 : vector<2x32xf32>
    %527 = arith.divf %525, %526 : vector<2x32xf32>
    %528 = arith.mulf %519, %464 : vector<2x32xf32>
    %529 = arith.mulf %513, %521 : vector<2x32xf32>
    %530 = arith.addf %528, %529 : vector<2x32xf32>
    %531 = math.tanh %530 : vector<2x32xf32>
    %532 = arith.mulf %527, %531 : vector<2x32xf32>
    %c0_101 = arith.constant 0 : index
    %c7_102 = arith.constant 7 : index
    %c0_103 = arith.constant 0 : index
    %533 = vector.load %arg12[%c0_101, %c7_102, %c0_103] : memref<2x8x64xf32, #tpu.memory_space<vmem>>, vector<2x1x32xf32>
    %534 = vector.shape_cast %533 : vector<2x1x32xf32> to vector<2x32xf32>
    %535 = vector.shape_cast %507 : vector<2x32xf32> to vector<2x1x32xf32>
    tpu.vector_store %arg12[%c0_101, %c7_102, %c0_103], %535 {strides = array<i32>} : memref<2x8x64xf32, #tpu.memory_space<vmem>>, vector<2x1x32xf32>,
    %c0_104 = arith.constant 0 : index
    %c0_105 = arith.constant 0 : index
    %c32_106 = arith.constant 32 : index
    %536 = vector.load %arg12[%c0_104, %c0_105, %c32_106] : memref<2x8x64xf32, #tpu.memory_space<vmem>>, vector<2x1x32xf32>
    %537 = vector.shape_cast %536 : vector<2x1x32xf32> to vector<2x32xf32>
    %538 = vector.shape_cast %532 : vector<2x32xf32> to vector<2x1x32xf32>
    tpu.vector_store %arg12[%c0_104, %c0_105, %c32_106], %538 {strides = array<i32>} : memref<2x8x64xf32, #tpu.memory_space<vmem>>, vector<2x1x32xf32>,
    %c0_107 = arith.constant 0 : index
    %c0_108 = arith.constant 0 : index
    %c0_109 = arith.constant 0 : index
    %539 = vector.load %arg12[%c0_107, %c0_108, %c0_109] : memref<2x8x64xf32, #tpu.memory_space<vmem>>, vector<2x8x64xf32>
    %540 = vector.shape_cast %539 : vector<2x8x64xf32> to vector<16x64xf32>
    %c0_110 = arith.constant 0 : index
    %c0_111 = arith.constant 0 : index
    %541 = vector.load %arg4[%c0_110, %c0_111] : memref<64x350xf32, #tpu.memory_space<vmem>>, vector<64x350xf32>
    %cst_112 = arith.constant dense<0.000000e+00> : vector<16x350xf32>
    %542 = tpu.matmul %540, %541, %cst_112 {dimension_numbers = #tpu.dot_dimension_numbers<[1], [0], [0], [1], [0, 0, 1, 1], [], []>} : vector<16x64xf32>, vector<64x350xf32>, vector<16x350xf32> -> vector<16x350xf32>
    %c0_113 = arith.constant 0 : index
    %c0_114 = arith.constant 0 : index
    %543 = vector.load %arg5[%c0_113, %c0_114] : memref<1x350xf32, #tpu.memory_space<vmem>>, vector<1x350xf32>
    %544 = vector.broadcast %543 : vector<1x350xf32> to vector<16x350xf32>
    %545 = arith.addf %542, %544 : vector<16x350xf32>
    %546 = math.tanh %545 : vector<16x350xf32>
    %c0_115 = arith.constant 0 : index
    %c0_116 = arith.constant 0 : index
    %547 = vector.load %arg6[%c0_115, %c0_116] : memref<350x30xf32, #tpu.memory_space<vmem>>, vector<350x30xf32>
    %cst_117 = arith.constant dense<0.000000e+00> : vector<16x30xf32>
    %548 = tpu.matmul %546, %547, %cst_117 {dimension_numbers = #tpu.dot_dimension_numbers<[1], [0], [0], [1], [0, 0, 1, 1], [], []>} : vector<16x350xf32>, vector<350x30xf32>, vector<16x30xf32> -> vector<16x30xf32>
    %c0_118 = arith.constant 0 : index
    %c0_119 = arith.constant 0 : index
    %549 = vector.load %arg7[%c0_118, %c0_119] : memref<1x30xf32, #tpu.memory_space<vmem>>, vector<1x30xf32>
    %550 = vector.broadcast %549 : vector<1x30xf32> to vector<16x30xf32>
    %551 = arith.addf %548, %550 : vector<16x30xf32>
    %c0_120 = arith.constant 0 : index
    %c0_121 = arith.constant 0 : index
    %552 = vector.load %arg8[%c0_120, %c0_121] : memref<64x60xf32, #tpu.memory_space<vmem>>, vector<64x60xf32>
    %cst_122 = arith.constant dense<0.000000e+00> : vector<16x60xf32>
    %553 = tpu.matmul %540, %552, %cst_122 {dimension_numbers = #tpu.dot_dimension_numbers<[1], [0], [0], [1], [0, 0, 1, 1], [], []>} : vector<16x64xf32>, vector<64x60xf32>, vector<16x60xf32> -> vector<16x60xf32>
    %554 = vector.shape_cast %551 : vector<16x30xf32> to vector<2x8x30xf32>
    %555 = vector.shape_cast %553 : vector<16x60xf32> to vector<2x8x60xf32>
    %cst_123 = arith.constant dense<0xFF800000> : vector<2x30xf32>
    %556 = vector.multi_reduction <maximumf>, %554, %cst_123 [1] : vector<2x8x30xf32> to vector<2x30xf32>
    %557 = vector.shape_cast %556 : vector<2x30xf32> to vector<2x1x30xf32>
    %558 = vector.broadcast %557 : vector<2x1x30xf32> to vector<2x8x30xf32>
    %559 = arith.subf %554, %558 : vector<2x8x30xf32>
    %560 = math.exp %559 : vector<2x8x30xf32>
    %cst_124 = arith.constant dense<0.000000e+00> : vector<2x30xf32>
    %561 = vector.multi_reduction <add>, %560, %cst_124 [1] : vector<2x8x30xf32> to vector<2x30xf32>
    %562 = vector.shape_cast %561 : vector<2x30xf32> to vector<2x1x30xf32>
    %563 = vector.broadcast %562 : vector<2x1x30xf32> to vector<2x8x30xf32>
    %564 = arith.divf %560, %563 : vector<2x8x30xf32>
    %565 = tpu.concatenate %564, %564 in 2 : vector<2x8x30xf32>, vector<2x8x30xf32> -> vector<2x8x60xf32>
    %566 = arith.mulf %565, %555 : vector<2x8x60xf32>
    %cst_125 = arith.constant dense<0.000000e+00> : vector<2x60xf32>
    %567 = vector.multi_reduction <add>, %566, %cst_125 [1] : vector<2x8x60xf32> to vector<2x60xf32>
    %c0_126 = arith.constant 0 : index
    %c0_127 = arith.constant 0 : index
    %568 = vector.load %arg9[%c0_126, %c0_127] : memref<60x2xf32, #tpu.memory_space<vmem>>, vector<60x2xf32>
    %cst_128 = arith.constant dense<0.000000e+00> : vector<2x2xf32>
    %569 = tpu.matmul %567, %568, %cst_128 {dimension_numbers = #tpu.dot_dimension_numbers<[1], [0], [0], [1], [0, 0, 1, 1], [], []>} : vector<2x60xf32>, vector<60x2xf32>, vector<2x2xf32> -> vector<2x2xf32>
    %c0_129 = arith.constant 0 : index
    %c0_130 = arith.constant 0 : index
    %570 = vector.load %arg10[%c0_129, %c0_130] : memref<1x2xf32, #tpu.memory_space<vmem>>, vector<1x2xf32>
    %571 = vector.broadcast %570 : vector<1x2xf32> to vector<2x2xf32>
    %572 = arith.addf %569, %571 : vector<2x2xf32>
    %c0_131 = arith.constant 0 : index
    %c0_132 = arith.constant 0 : index
    %573 = vector.load %arg11[%c0_131, %c0_132] : memref<2x2xf32, #tpu.memory_space<vmem>>, vector<2x2xf32>
    tpu.vector_store %arg11[%c0_131, %c0_132], %572 {strides = array<i32>} : memref<2x2xf32, #tpu.memory_space<vmem>>, vector<2x2xf32>,
    return
  }
}

</mosaic_0001>

<bundles_post_ra>
// kernel: self_attention_forward.1
= control target key start
LH: loop header
LB: loop body
LE: loop exit
PB: predicated region body
PF: predicated region fallthrough
CT: control target
= control target key end

     0   :  { %vm61_vm0 = vcmask 261120   ;;  %v3202_v20 = vmov 0.0   ;;  %s4387_s0 = inlined_call_operand.vmem [shape: f32[2,8,32], index: 0, kind: input, shape index: {}]   ;;  %s4388_s1 = inlined_call_operand.vmem [shape: f32[32,256], index: 1, kind: input, shape index: {}]   ;;  %s4389_s2 = inlined_call_operand.vmem [shape: f32[64,256], index: 2, kind: input, shape index: {}]   ;;  %s4390_s3 = inlined_call_operand.vmem [shape: f32[1,256], index: 3, kind: input, shape index: {}]   ;;  %s4391_s4 = inlined_call_operand.vmem [shape: f32[64,350], index: 4, kind: input, shape index: {}]   ;;  %s4392_s5 = inlined_call_operand.vmem [shape: f32[1,350], index: 5, kind: input, shape index: {}]   ;;  %s4393_s6 = inlined_call_operand.vmem [shape: f32[350,30], index: 6, kind: input, shape index: {}]   ;;  %s4394_s7 = inlined_call_operand.vmem [shape: f32[1,30], index: 7, kind: input, shape index: {}]   ;;  %s4395_s8 = inlined_call_operand.vmem [shape: f32[64,60], index: 8, kind: input, shape index: {}]   ;;  %s4396_s9 = inlined_call_operand.vmem [shape: f32[60,2], index: 9, kind: input, shape index: {}]   ;;  %s4397_s10 = inlined_call_operand.vmem [shape: f32[1,2], index: 10, kind: input, shape index: {}]   ;;  %s4398_s11 = inlined_call_operand.hbm [shape: f32[2,2], index: 11, kind: output, shape index: {}]  }
   0x1   :  { %v3271_v0 = vld [vmem:[%s4389_s2 + $0x78] sm:$0xff]  ;;  %v3276_v1 = vld [vmem:[%s4389_s2 + $0x70] sm:$0xff]  ;;  %v3285_v3 = vld [vmem:[%s4389_s2 + $0x68] sm:$0xff]  ;;  %132 = vmatprep.mubr.f32.mxu0 %v3202_v20 }
   0x2   :  { %v48_v2 = vld [vmem:[%s4388_s1 + $0x38] sm:$0xff]  ;;  %181 = vmatprep.subr.mxu1 %v3271_v0  ;;  %v47_v4 = vld [vmem:[%s4388_s1 + $0x30] sm:$0xff]  ;;  %v3293_v5 = vld [vmem:[%s4389_s2 + $0x60] sm:$0xff] }
   0x3   :  { %92 = vmatprep.subr.mxu0 %v48_v2  ;;  %182 = vmatpush1.msra.mxu1 %v3276_v1  ;;  %v46_v6 = vld [vmem:[%s4388_s1 + $0x28] sm:$0xff]  ;;  %v3302_v7 = vld [vmem:[%s4389_s2 + $0x58] sm:$0xff]  ;;  %v45_v8 = vld [vmem:[%s4388_s1 + $0x20] sm:$0xff] }
   0x4   :  { %93 = vmatpush1.msra.mxu0 %v47_v4  ;;  %183 = vmatprep.subr.mxu1 %v3285_v3  ;;  %v3311_v9 = vld [vmem:[%s4389_s2 + $0x50] sm:$0xff]  ;;  %v44_v10 = vld [vmem:[%s4388_s1 + $0x18] sm:$0xff]  ;;  %v3320_v11 = vld [vmem:[%s4389_s2 + $0x48] sm:$0xff] }
   0x5   :  { %94 = vmatprep.subr.mxu0 %v46_v6  ;;  %184 = vmatpush1.msra.mxu1 %v3293_v5  ;;  %v43_v12 = vld [vmem:[%s4388_s1 + $0x10] sm:$0xff]  ;;  %v42_v13 = vld [vmem:[%s4388_s1 + $0x8] sm:$0xff]  ;;  %v3332_v14 = vld [vmem:[%s4389_s2 + $0x40] sm:$0xff] }
   0x6   :  { %95 = vmatpush1.msra.mxu0 %v45_v8  ;;  %185 = vmatprep.subr.mxu1 %v3302_v7  ;;  %v41_v15 = vld [vmem:[%s4388_s1] sm:$0xff]  ;;  %v3341_v16 = vld [vmem:[%s4389_s2 + $0x38] sm:$0xff]  ;;  %v3347_v17 = vld [vmem:[%s4389_s2 + $0x30] sm:$0xff] }
   0x7   :  { %96 = vmatprep.subr.mxu0 %v44_v10  ;;  %186 = vmatpush1.msra.mxu1 %v3311_v9  ;;  %v39_v18 = vld [vmem:[%s4387_s0] sm:$0xff]  ;;  %v3356_v19 = vld [vmem:[%s4389_s2 + $0x28] sm:$0xff] }
   0x8   :  { %97 = vmatpush1.msra.mxu0 %v43_v12  ;;  %187 = vmatprep.subr.mxu1 %v3320_v11  ;;  %v3363_v21 = vld [vmem:[%s4389_s2 + $0x20] sm:$0xff] }
   0x9   :  { %98 = vmatprep.subr.mxu0 %v42_v13  ;;  %188 = vmatpush1.msra.mxu1 %v3332_v14 }
   0xa   :  { %99 = vmatpush1.msra.mxu0 %v41_v15  ;;  %189 = vmatprep.subr.mxu1 %v3341_v16 }
   0xb   :  { %16 = vsyncpa [#allocation4], 0  ;;  %190 = vmatpush1.msra.mxu1 %v3347_v17  ;;  %2664 = vmatmul.mubr.msk.f32.vlgmr.msra.gmra.mxu0 %vm61_vm0, %v39_v18  ;;  %v3370_v22 = vld [vmem:[%s4389_s2 + $0x18] sm:$0xff]  ;;  %v3377_v23 = vld [vmem:[%s4389_s2 + $0x10] sm:$0xff]  ;;  %v51_v27 = vlaneseq  ;;  %s3204_s12 = smov 32   ;;  %vm4399_vm1 = vcmask 1041409  }
   0xc   :  { %191 = vmatprep.subr.mxu1 %v3356_v19  ;;  %138 = vmatprep.mubr.f32.mxu0 %v3202_v20  ;;  %v40_v24 = vld [vmem:[%s4387_s0 + $0x8] sm:$0xff]  ;;  %v3393_v26 = vld [vmem:[%s4389_s2] sm:$0xff]  ;;  %vm161_vm2 = vcmask 523264   ;;  %vm578_vm3 = vcmask 1042434   ;;  %vm810_vm4 = vcmask 1043459   ;;  %vm1042_vm5 = vcmask 1044484  }
   0xd   :  { %192 = vmatpush1.msra.mxu1 %v3363_v21  ;;  %v3386_v25 = vld [vmem:[%s4389_s2 + $0x8] sm:$0xff]  ;;  %229 = vmatprep.mubr.f32.mxu1 %v3202_v20  ;;  %v3436_v28 = vshrl.u32 %v51_v27, 7  ;;  %v49_v31 = vld [vmem:[%s4390_s3] sm:$0x3]  ;;  %s3203_s3 = smov 64   ;;  %vm1273_vm6 = vcmask 1045509  }
   0xe   :  { %193 = vmatprep.subr.mxu1 %v3370_v22  ;;  %399 = vmatprep.subr.mxu0 %v3271_v0  ;;  %vm1505_vm7 = vcmask 1046534   ;;  %vm1736_vm8 = vcmask 1047559   ;;  %vm368_vm9 = vcmask 253952   ;;  %vm377_vm10 = vcmask 523527   ;;  %s3205_s20 = smov 30   ;;  %s3207_s27 = smov [#allocation3]  }
   0xf   :  { %194 = vmatpush1.msra.mxu1 %v3377_v23  ;;  %2665 = vmatmul.mubr.msk.f32.gmra.mxu0 %vm61_vm0, %v40_v24  ;;  %v53_v29 = vsub.s32 0, %v3436_v28  ;;  %v57_v33 = vsub.s32 1, %v3436_v28  ;;  %vm598_vm11 = vcmask 254977   ;;  %vm830_vm12 = vcmask 256002   ;;  %s2656_s28 = sshll.u32 %s3207_s27, 4  ;;  %s2657_s28 = int_to_ptr.vmem [resolvable:$true] %s2656_s28 }
  0x10   :  { %195 = vmatprep.subr.mxu1 %v3386_v25  ;;  %400 = vmatpush1.msra.mxu0 %v3276_v1  ;;  %vm607_vm13 = vcmask 522502   ;;  %vm1061_vm14 = vcmask 257027   ;;  %vm839_vm15 = vcmask 521477   ;;  %p3185_p1 = scmp.lt.s32.totalorder %s2657_s28, %s2657_s28 }
  0x11   :  { %196 = vmatpush1.msra.mxu1 %v3393_v26  ;;  %401 = vmatprep.subr.mxu0 %v3285_v3  ;;  %v54_v34 = vrot.slane %v49_v31, %v53_v29  ;;  %v58_v37 = vrot.slane %v49_v31, %v57_v33 }
  0x12   :  { %230 = vmatmul.mubr.f32.vlgmr.msra.gmra.mxu1 %v3202_v20  ;;  %402 = vmatpush1.msra.mxu0 %v3293_v5 }
  0x13   :  { %403 = vmatprep.subr.mxu0 %v3302_v7  ;;  %447 = vmatprep.mubr.f32.mxu0 %v3202_v20 }
  0x14   :  { %404 = vmatpush1.msra.mxu0 %v3311_v9  ;;  %630 = vmatprep.subr.mxu1 %v3271_v0 }
  0x15   :  { %405 = vmatprep.subr.mxu0 %v3320_v11  ;;  %631 = vmatpush1.msra.mxu1 %v3276_v1 }
  0x16   :  { %406 = vmatpush1.msra.mxu0 %v3332_v14  ;;  %632 = vmatprep.subr.mxu1 %v3285_v3 }
  0x17   :  { %407 = vmatprep.subr.mxu0 %v3341_v16  ;;  %633 = vmatpush1.msra.mxu1 %v3293_v5 }
  0x18   :  { %408 = vmatpush1.msra.mxu0 %v3347_v17  ;;  %634 = vmatprep.subr.mxu1 %v3302_v7 }
  0x19   :  { %409 = vmatprep.subr.mxu0 %v3356_v19  ;;  %635 = vmatpush1.msra.mxu1 %v3311_v9 }
  0x1a   :  { %410 = vmatpush1.msra.mxu0 %v3363_v21  ;;  %636 = vmatprep.subr.mxu1 %v3320_v11 }
  0x1b   :  { %411 = vmatprep.subr.mxu0 %v3370_v22  ;;  %637 = vmatpush1.msra.mxu1 %v3332_v14 }
  0x1c   :  { %412 = vmatpush1.msra.mxu0 %v3377_v23  ;;  %638 = vmatprep.subr.mxu1 %v3341_v16 }
  0x1d   :  { %413 = vmatprep.subr.mxu0 %v3386_v25  ;;  %639 = vmatpush1.msra.mxu1 %v3347_v17 }
  0x1e   :  { %414 = vmatpush1.msra.mxu0 %v3393_v26  ;;  %640 = vmatprep.subr.mxu1 %v3356_v19 }
  0x1f   :  { %641 = vmatpush1.msra.mxu1 %v3363_v21  ;;  %678 = vmatprep.mubr.f32.mxu1 %v3202_v20 }
  0x20   :  { %642 = vmatprep.subr.mxu1 %v3370_v22  ;;  %862 = vmatprep.subr.mxu0 %v3271_v0 }
  0x21   :  { %643 = vmatpush1.msra.mxu1 %v3377_v23 }
  0x22   :  { %644 = vmatprep.subr.mxu1 %v3386_v25 }
  0x23   :  { %645 = vmatpush1.msra.mxu1 %v3393_v26 }
  0x24   :  { %1093 = vmatprep.subr.mxu1 %v3271_v0 }
  0xcb   :  { %v134_v30 = vpop.f32.mrf.mxu0 }
  0xcc   :  { %v3456_v49 = vadd.f32 %v134_v30, %v54_v34 }
  0xcd   :  { %v136_v32 = vpop.f32.mrf.mxu0 }
  0xce   :  { %v3450_v44 = vadd.f32 %v136_v32, %v58_v37 }
  0xcf   :  { %v140_v35 = vpop.f32.mrf.mxu0 }
  0xd0   :  { %v3445_v36 = vadd.f32 %v140_v35, %v54_v34 }
  0xd1   :  { %v142_v40 = vpop.f32.mrf.mxu0 }
  0xd2   :  { %v231_v38 = vpop.f32.mrf.mxu1  ;;  %v3452_v46 = vadd.f32 %v142_v40, %v58_v37 }
  0xd3   :  { %v237_v39 = vrot.slane %v231_v38, 1  ;;  %v240_v50 = vadd.f32 %v231_v38, %v3456_v49 }
  0xd4   :  { %v233_v41 = vpop.f32.mrf.mxu1 }
  0xd5   :  { %v241_v42 = vadd.f32 %v237_v39, %v3445_v36  ;;  %v243_v43 = vrot.slane %v233_v41, 1  ;;  %v244_v45 = vrot.slane %v233_v41, 2  ;;  %v2666_v58 = vmul.f32 -1.442695, %v240_v50 }
  0xd7   :  { %2889 = vtanh.f32 %v241_v42  ;;  %v247_v47 = vadd.f32 %v243_v43, %v3450_v44  ;;  %v248_v48 = vadd.f32 %v244_v45, %v3452_v46  ;;  %v2667_v55 = vmul.f32 -1.442695, %v241_v42 }
  0xd9   :  { %2891 = vtanh.f32 %v247_v47  ;;  %v2668_v56 = vmul.f32 -1.442695, %v247_v47  ;;  %v2669_v57 = vmul.f32 -1.442695, %v248_v48 }
  0xda   :  { %2893 = vtanh.f32 %v248_v48 }
  0xdb   :  { %2895 = vtanh.f32 %v240_v50 }
  0xdc   :  { %2897 = vpow2.f32 %v2667_v55 }
  0xdd   :  { %2899 = vpow2.f32 %v2668_v56 }
  0xde   :  { %2901 = vpow2.f32 %v2669_v57 }
  0xdf   :  { %2903 = vpow2.f32 %v2666_v58 }
  0xe4   :  { %v2890_v51 = vpop.eup %2889 }
  0xe5   :  { %269 = vrot.lane.b32.xlu0 %v2890_v51, %s3203_s3 }
  0xe6   :  { %v2892_v52 = vpop.eup %2891 }
  0xe7   :  { %v2894_v53 = vpop.eup %2893 }
  0xe8   :  { %317 = vrot.lane.b32.xlu1 %v2894_v53, %s3203_s3  ;;  %v2896_v54 = vpop.eup %2895 }
  0xe9   :  { %315 = vrot.lane.b32.xlu0 %v2892_v52, %s3203_s3  ;;  %v2898_v59 = vpop.eup %2897 }
  0xea   :  { %v256_v60 = vadd.f32 1.0, %v2898_v59  ;;  %v2900_v61 = vpop.eup %2899 }
  0xeb   :  { %v2902_v62 = vpop.eup %2901  ;;  %v303_v63 = vadd.f32 1.0, %v2900_v61 }
  0xec   :  { %267 = vrot.lane.b32.xlu1 %v2896_v54, %s3203_s3  ;;  %2905 = vrcp.f32 %v256_v60  ;;  %v304_v2 = vadd.f32 1.0, %v2902_v62  ;;  %v2904_v4 = vpop.eup %2903 }
  0xed   :  { %2907 = vrcp.f32 %v303_v63  ;;  %v255_v6 = vadd.f32 1.0, %v2904_v4 }
  0xee   :  { %2909 = vrcp.f32 %v304_v2 }
  0xef   :  { %2911 = vrcp.f32 %v255_v6 }
  0xf9   :  { %v2906_v8 = vpop.eup %2905 }
  0xfa   :  { %v2908_v13 = vpop.eup %2907  ;;  %v264_v35 = vmul.f32 0.0, %v2906_v8 }
  0xfb   :  { %v2910_v18 = vpop.eup %2909  ;;  %v311_v39 = vmul.f32 0.0, %v2908_v13 }
  0xfc   :  { %v2912_v31 = vpop.eup %2911  ;;  %v312_v40 = vmul.f32 0.0, %v2910_v18 }
  0xfd   :  { %v263_v47 = vmul.f32 0.0, %v2912_v31 }
 0x157   :  { %v270_v10 = vpop.permute.xlu0 %269 }
 0x158   :  { %v274_v12 = vmul.f32 %v2906_v8, %v270_v10 }
 0x15a   :  { %279 = vrot.lane.b32.xlu0 %v274_v12, %s3204_s12  ;;  %v318_v24 = vpop.permute.xlu1 %317 }
 0x15b   :  { %v316_v15 = vpop.permute.xlu0 %315  ;;  %v322_v30 = vmul.f32 %v2910_v18, %v318_v24 }
 0x15c   :  { %v321_v27 = vmul.f32 %v2908_v13, %v316_v15 }
 0x15e   :  { %325 = vrot.lane.b32.xlu1 %v321_v27, %s3204_s12  ;;  %327 = vrot.lane.b32.xlu0 %v322_v30, %s3204_s12  ;;  %v268_v32 = vpop.permute.xlu1 %267 }
 0x15f   :  { %v273_v34 = vmul.f32 %v2912_v31, %v268_v32 }
 0x162   :  { %277 = vrot.lane.b32.xlu1 %v273_v34, %s3204_s12 }
 0x1cc   :  { %v280_v37 = vpop.permute.xlu0 %279 }
 0x1cd   :  { %v3467_v38 = vadd.f32 %v280_v37, %v264_v35 }
 0x1cf   :  { %2913 = vtanh.f32 %v3467_v38 }
 0x1d0   :  { %v326_v41 = vpop.permute.xlu1 %325  ;;  %v328_v42 = vpop.permute.xlu0 %327 }
 0x1d1   :  { %v3470_v43 = vadd.f32 %v326_v41, %v311_v39  ;;  %v3472_v45 = vadd.f32 %v328_v42, %v312_v40 }
 0x1d3   :  { %2915 = vtanh.f32 %v3470_v43 }
 0x1d4   :  { %2917 = vtanh.f32 %v3472_v45  ;;  %v278_v48 = vpop.permute.xlu1 %277 }
 0x1d5   :  { %v3476_v50 = vadd.f32 %v278_v48, %v263_v47 }
 0x1d7   :  { %2919 = vtanh.f32 %v3476_v50 }
 0x1dc   :  { %v2914_v51 = vpop.eup %2913 }
 0x1dd   :  { %291 = vrot.lane.b32.xlu0 %v2914_v51, %s3203_s3 }
 0x1e0   :  { %v2916_v52 = vpop.eup %2915 }
 0x1e1   :  { %v2918_v53 = vpop.eup %2917  ;;  %337 = vrot.lane.b32.xlu1 %v2916_v52, %s3203_s3 }
 0x1e2   :  { %339 = vrot.lane.b32.xlu0 %v2918_v53, %s3203_s3 }
 0x1e4   :  { %v2920_v54 = vpop.eup %2919 }
 0x1e5   :  { %289 = vrot.lane.b32.xlu1 %v2920_v54, %s3203_s3 }
 0x24f   :  { %v292_v55 = vpop.permute.xlu0 %291 }
 0x250   :  { %v3485_v59 = vmul.f32 %v2906_v8, %v292_v55 }
 0x252   :  { %v347_v2 = vrot.slane %v3485_v59, 7 }
 0x253   :  { %v338_v56 = vpop.permute.xlu1 %337 }
 0x254   :  { %v340_v57 = vpop.permute.xlu0 %339  ;;  %v3483_v58 = vmul.f32 %v2908_v13, %v338_v56 }
 0x255   :  { %v3487_v60 = vmul.f32 %v2910_v18, %v340_v57 }
 0x256   :  { %v355_v61 = vrot.slane %v3483_v58, 7 }
 0x257   :  { %v356_v62 = vrot.slane %v3487_v60, 6  ;;  %v290_v63 = vpop.permute.xlu1 %289 }
 0x258   :  { %v3492_v4 = vmul.f32 %v2912_v31, %v290_v63 }
 0x259   :  { %v357_v6 = vsel %vm4399_vm1, %v356_v62, %v355_v61 }
 0x25a   :  { %358 = vrot.lane.b32.xlu1 %v357_v6, %s3203_s3  ;;  %v349_v8 = vsel %vm4399_vm1, %v347_v2, %v3492_v4  ;;  %vm1765_vm1 = vcmask 517377  }
 0x25b   :  { %350 = vrot.lane.b32.xlu0 %v349_v8, %s3204_s12 }
 0x2cc   :  { %v359_v10 = vpop.permute.xlu1 %358 }
 0x2cd   :  { %v351_v12 = vpop.permute.xlu0 %350 }
 0x2ce   :  { %v361_v13 = vsel %vm61_vm0, %v351_v12, %v359_v10 }
 0x2cf   :  { %2670 = vmatmul.mubr.msk.f32.vlgmr.msra.gmra.mxu0 %vm161_vm2, %v361_v13 }
 0x2d0   :  { %863 = vmatpush1.msra.mxu0 %v3276_v1  ;;  %910 = vmatprep.mubr.f32.mxu0 %v3202_v20 }
 0x2d1   :  { %864 = vmatprep.subr.mxu0 %v3285_v3 }
 0x2d2   :  { %865 = vmatpush1.msra.mxu0 %v3293_v5 }
 0x2d3   :  { %866 = vmatprep.subr.mxu0 %v3302_v7 }
 0x2d4   :  { %867 = vmatpush1.msra.mxu0 %v3311_v9 }
 0x2d5   :  { %868 = vmatprep.subr.mxu0 %v3320_v11 }
 0x2d6   :  { %869 = vmatpush1.msra.mxu0 %v3332_v14 }
 0x2d7   :  { %870 = vmatprep.subr.mxu0 %v3341_v16 }
 0x2d8   :  { %871 = vmatpush1.msra.mxu0 %v3347_v17 }
 0x2d9   :  { %872 = vmatprep.subr.mxu0 %v3356_v19 }
 0x2da   :  { %873 = vmatpush1.msra.mxu0 %v3363_v21 }
 0x2db   :  { %874 = vmatprep.subr.mxu0 %v3370_v22 }
 0x2dc   :  { %875 = vmatpush1.msra.mxu0 %v3377_v23 }
 0x2dd   :  { %876 = vmatprep.subr.mxu0 %v3386_v25 }
 0x2de   :  { %877 = vmatpush1.msra.mxu0 %v3393_v26 }
 0x2df   :  { %1325 = vmatprep.subr.mxu0 %v3271_v0 }
 0x38f   :  { %v449_v15 = vpop.f32.mrf.mxu0 }
 0x390   :  { %v459_v18 = vadd.f32 %v449_v15, %v3445_v36  ;;  %v455_v30 = vrot.slane %v449_v15, 7 }
 0x391   :  { %v451_v24 = vpop.f32.mrf.mxu0 }
 0x392   :  { %2921 = vtanh.f32 %v459_v18  ;;  %v461_v27 = vrot.slane %v451_v24, 2  ;;  %v462_v31 = vrot.slane %v451_v24, 3  ;;  %v458_v35 = vadd.f32 %v455_v30, %v3456_v49 }
 0x393   :  { %v2672_v42 = vmul.f32 -1.442695, %v459_v18 }
 0x394   :  { %v465_v32 = vadd.f32 %v461_v27, %v3450_v44  ;;  %v466_v34 = vadd.f32 %v462_v31, %v3452_v46  ;;  %v2671_v51 = vmul.f32 -1.442695, %v458_v35  ;;  %v484_v31 = vrot.slane %v3467_v38, 7 }
 0x396   :  { %2923 = vtanh.f32 %v465_v32  ;;  %v2673_v47 = vmul.f32 -1.442695, %v465_v32  ;;  %v2674_v48 = vmul.f32 -1.442695, %v466_v34 }
 0x397   :  { %2925 = vtanh.f32 %v466_v34 }
 0x398   :  { %2927 = vtanh.f32 %v458_v35 }
 0x399   :  { %2929 = vpow2.f32 %v2672_v42  ;;  %v483_v42 = vrot.slane %v3476_v50, 7 }
 0x39a   :  { %2931 = vpow2.f32 %v2673_v47 }
 0x39b   :  { %2933 = vpow2.f32 %v2674_v48 }
 0x39c   :  { %2935 = vpow2.f32 %v2671_v51 }
 0x39f   :  { %v2922_v37 = vpop.eup %2921 }
 0x3a0   :  { %493 = vrot.lane.b32.xlu0 %v2922_v37, %s3203_s3  ;;  %v537_v37 = vrot.slane %v3470_v43, 1 }
 0x3a3   :  { %v2924_v39 = vpop.eup %2923 }
 0x3a4   :  { %545 = vrot.lane.b32.xlu1 %v2924_v39, %s3203_s3  ;;  %v2926_v40 = vpop.eup %2925 }
 0x3a5   :  { %v2928_v41 = vpop.eup %2927  ;;  %547 = vrot.lane.b32.xlu0 %v2926_v40, %s3203_s3  ;;  %v538_v40 = vrot.slane %v3472_v45, 1 }
 0x3a6   :  { %v2930_v52 = vpop.eup %2929 }
 0x3a7   :  { %v474_v53 = vadd.f32 1.0, %v2930_v52  ;;  %v2932_v54 = vpop.eup %2931 }
 0x3a8   :  { %491 = vrot.lane.b32.xlu1 %v2928_v41, %s3203_s3  ;;  %v2934_v55 = vpop.eup %2933  ;;  %v527_v56 = vadd.f32 1.0, %v2932_v54 }
 0x3a9   :  { %2937 = vrcp.f32 %v474_v53  ;;  %v2936_v57 = vpop.eup %2935  ;;  %v528_v61 = vadd.f32 1.0, %v2934_v55 }
 0x3aa   :  { %v473_v62 = vadd.f32 1.0, %v2936_v57  ;;  %2939 = vrcp.f32 %v527_v56 }
 0x3ab   :  { %2941 = vrcp.f32 %v528_v61 }
 0x3ac   :  { %2943 = vrcp.f32 %v473_v62 }
 0x3b6   :  { %v2938_v63 = vpop.eup %2937 }
 0x3b7   :  { %v2940_v8 = vpop.eup %2939  ;;  %v488_v32 = vmul.f32 %v2938_v63, %v484_v31 }
 0x3b8   :  { %v2942_v13 = vpop.eup %2941  ;;  %v541_v39 = vmul.f32 %v2940_v8, %v537_v37 }
 0x3b9   :  { %v2944_v18 = vpop.eup %2943  ;;  %v542_v48 = vmul.f32 %v2942_v13, %v538_v40 }
 0x3ba   :  { %v487_v38 = vmul.f32 %v2944_v18, %v483_v42 }
 0x412   :  { %v494_v2 = vpop.permute.xlu0 %493 }
 0x413   :  { %v498_v6 = vmul.f32 %v2938_v63, %v494_v2 }
 0x415   :  { %503 = vrot.lane.b32.xlu0 %v498_v6, %s3204_s12 }
 0x416   :  { %v546_v10 = vpop.permute.xlu1 %545 }
 0x417   :  { %v551_v12 = vmul.f32 %v2940_v8, %v546_v10  ;;  %v548_v15 = vpop.permute.xlu0 %547 }
 0x418   :  { %v552_v24 = vmul.f32 %v2942_v13, %v548_v15 }
 0x419   :  { %555 = vrot.lane.b32.xlu1 %v551_v12, %s3204_s12 }
 0x41a   :  { %v492_v27 = vpop.permute.xlu1 %491  ;;  %557 = vrot.lane.b32.xlu0 %v552_v24, %s3204_s12 }
 0x41b   :  { %v497_v30 = vmul.f32 %v2944_v18, %v492_v27 }
 0x41d   :  { %501 = vrot.lane.b32.xlu1 %v497_v30, %s3204_s12 }
 0x487   :  { %v504_v34 = vpop.permute.xlu0 %503 }
 0x488   :  { %v3531_v35 = vadd.f32 %v504_v34, %v488_v32 }
 0x48a   :  { %2945 = vtanh.f32 %v3531_v35 }
 0x48b   :  { %v556_v41 = vpop.permute.xlu1 %555 }
 0x48c   :  { %v3537_v47 = vadd.f32 %v556_v41, %v541_v39  ;;  %v558_v51 = vpop.permute.xlu0 %557 }
 0x48d   :  { %v3540_v52 = vadd.f32 %v558_v51, %v542_v48 }
 0x48e   :  { %2947 = vtanh.f32 %v3537_v47 }
 0x48f   :  { %v502_v53 = vpop.permute.xlu1 %501  ;;  %2949 = vtanh.f32 %v3540_v52 }
 0x490   :  { %v3542_v54 = vadd.f32 %v502_v53, %v487_v38 }
 0x492   :  { %2951 = vtanh.f32 %v3542_v54 }
 0x497   :  { %v2946_v43 = vpop.eup %2945 }
 0x498   :  { %515 = vrot.lane.b32.xlu0 %v2946_v43, %s3203_s3 }
 0x49b   :  { %v2948_v45 = vpop.eup %2947 }
 0x49c   :  { %567 = vrot.lane.b32.xlu1 %v2948_v45, %s3203_s3  ;;  %v2950_v50 = vpop.eup %2949 }
 0x49d   :  { %569 = vrot.lane.b32.xlu0 %v2950_v50, %s3203_s3 }
 0x49f   :  { %v2952_v55 = vpop.eup %2951 }
 0x4a0   :  { %513 = vrot.lane.b32.xlu1 %v2952_v55, %s3203_s3 }
 0x50a   :  { %v516_v56 = vpop.permute.xlu0 %515 }
 0x50b   :  { %v3550_v61 = vmul.f32 %v2938_v63, %v516_v56 }
 0x50d   :  { %v577_v15 = vrot.slane %v3550_v61, 7 }
 0x50e   :  { %v568_v57 = vpop.permute.xlu1 %567 }
 0x50f   :  { %v3552_v62 = vmul.f32 %v2940_v8, %v568_v57  ;;  %v570_v2 = vpop.permute.xlu0 %569 }
 0x510   :  { %v3554_v6 = vmul.f32 %v2942_v13, %v570_v2 }
 0x511   :  { %v585_v10 = vrot.slane %v3552_v62, 5 }
 0x512   :  { %v514_v12 = vpop.permute.xlu1 %513  ;;  %v586_v27 = vrot.slane %v3554_v6, 4 }
 0x513   :  { %v3558_v24 = vmul.f32 %v2944_v18, %v514_v12 }
 0x514   :  { %v587_v31 = vsel %vm578_vm3, %v586_v27, %v585_v10 }
 0x515   :  { %v579_v30 = vsel %vm578_vm3, %v577_v15, %v3558_v24  ;;  %588 = vrot.lane.b32.xlu1 %v587_v31, %s3203_s3  ;;  %vm1070_vm3 = vcmask 520452  }
 0x516   :  { %580 = vrot.lane.b32.xlu0 %v579_v30, %s3204_s12 }
 0x587   :  { %v589_v8 = vpop.permute.xlu1 %588 }
 0x588   :  { %v581_v63 = vpop.permute.xlu0 %580 }
 0x589   :  { %v591_v13 = vsel %vm61_vm0, %v581_v63, %v589_v8 }
 0x58a   :  { %v611_v32 = vrot.slane %v591_v13, 1 }
 0x58c   :  { %2675 = vmatmul.mubr.msk.f32.vlgmr.msra.gmra.mxu1 %vm161_vm2, %v611_v32 }
 0x58d   :  { %1094 = vmatpush1.msra.mxu1 %v3276_v1  ;;  %1141 = vmatprep.mubr.f32.mxu1 %v3202_v20 }
 0x58e   :  { %1095 = vmatprep.subr.mxu1 %v3285_v3 }
 0x58f   :  { %1096 = vmatpush1.msra.mxu1 %v3293_v5 }
 0x590   :  { %1097 = vmatprep.subr.mxu1 %v3302_v7 }
 0x591   :  { %1098 = vmatpush1.msra.mxu1 %v3311_v9 }
 0x592   :  { %1099 = vmatprep.subr.mxu1 %v3320_v11 }
 0x593   :  { %1100 = vmatpush1.msra.mxu1 %v3332_v14 }
 0x594   :  { %1101 = vmatprep.subr.mxu1 %v3341_v16 }
 0x595   :  { %1102 = vmatpush1.msra.mxu1 %v3347_v17 }
 0x596   :  { %1103 = vmatprep.subr.mxu1 %v3356_v19 }
 0x597   :  { %1104 = vmatpush1.msra.mxu1 %v3363_v21 }
 0x598   :  { %1105 = vmatprep.subr.mxu1 %v3370_v22 }
 0x599   :  { %1106 = vmatpush1.msra.mxu1 %v3377_v23 }
 0x59a   :  { %1107 = vmatprep.subr.mxu1 %v3386_v25 }
 0x59b   :  { %1108 = vmatpush1.msra.mxu1 %v3393_v26 }
 0x59c   :  { %1557 = vmatprep.subr.mxu1 %v3271_v0 }
 0x64c   :  { %v680_v18 = vpop.f32.mrf.mxu1 }
 0x64d   :  { %v687_v34 = vrot.slane %v680_v18, 7  ;;  %v686_v42 = vrot.slane %v680_v18, 6 }
 0x64e   :  { %v682_v37 = vpop.f32.mrf.mxu1 }
 0x64f   :  { %v691_v39 = vadd.f32 %v687_v34, %v3445_v36  ;;  %v693_v40 = vrot.slane %v682_v37, 3  ;;  %v694_v41 = vrot.slane %v682_v37, 4  ;;  %v690_v38 = vadd.f32 %v686_v42, %v3456_v49 }
 0x651   :  { %2953 = vtanh.f32 %v691_v39  ;;  %v697_v48 = vadd.f32 %v693_v40, %v3450_v44  ;;  %v698_v51 = vadd.f32 %v694_v41, %v3452_v46  ;;  %v2677_v55 = vmul.f32 -1.442695, %v691_v39 }
 0x652   :  { %v2676_v2 = vmul.f32 -1.442695, %v690_v38 }
 0x653   :  { %2955 = vtanh.f32 %v697_v48  ;;  %v2678_v56 = vmul.f32 -1.442695, %v697_v48  ;;  %v2679_v57 = vmul.f32 -1.442695, %v698_v51 }
 0x654   :  { %2957 = vtanh.f32 %v698_v51 }
 0x655   :  { %2959 = vtanh.f32 %v690_v38 }
 0x656   :  { %2961 = vpow2.f32 %v2677_v55  ;;  %v769_v55 = vrot.slane %v3537_v47, 1 }
 0x657   :  { %2963 = vpow2.f32 %v2678_v56  ;;  %v770_v56 = vrot.slane %v3540_v52, 1 }
 0x658   :  { %2965 = vpow2.f32 %v2679_v57 }
 0x659   :  { %2967 = vpow2.f32 %v2676_v2 }
 0x65e   :  { %v2954_v53 = vpop.eup %2953 }
 0x65f   :  { %725 = vrot.lane.b32.xlu0 %v2954_v53, %s3203_s3  ;;  %v716_v53 = vrot.slane %v3531_v35, 7 }
 0x660   :  { %v2956_v43 = vpop.eup %2955 }
 0x661   :  { %v2958_v45 = vpop.eup %2957  ;;  %777 = vrot.lane.b32.xlu1 %v2956_v43, %s3203_s3 }
 0x662   :  { %v2960_v50 = vpop.eup %2959 }
 0x663   :  { %779 = vrot.lane.b32.xlu0 %v2958_v45, %s3203_s3  ;;  %v2962_v10 = vpop.eup %2961 }
 0x664   :  { %v706_v12 = vadd.f32 1.0, %v2962_v10  ;;  %v2964_v15 = vpop.eup %2963 }
 0x665   :  { %723 = vrot.lane.b32.xlu1 %v2960_v50, %s3203_s3  ;;  %v2966_v27 = vpop.eup %2965  ;;  %v759_v30 = vadd.f32 1.0, %v2964_v15 }
 0x666   :  { %2969 = vrcp.f32 %v706_v12  ;;  %v2968_v31 = vpop.eup %2967  ;;  %v760_v63 = vadd.f32 1.0, %v2966_v27  ;;  %v715_v12 = vrot.slane %v3542_v54, 7 }
 0x667   :  { %v705_v8 = vadd.f32 1.0, %v2968_v31  ;;  %2971 = vrcp.f32 %v759_v30 }
 0x668   :  { %2973 = vrcp.f32 %v760_v63 }
 0x669   :  { %2975 = vrcp.f32 %v705_v8 }
 0x673   :  { %v2970_v13 = vpop.eup %2969 }
 0x674   :  { %v2972_v34 = vpop.eup %2971  ;;  %v720_v43 = vmul.f32 %v2970_v13, %v716_v53 }
 0x675   :  { %v2974_v39 = vpop.eup %2973  ;;  %v773_v57 = vmul.f32 %v2972_v34, %v769_v55 }
 0x676   :  { %v2976_v48 = vpop.eup %2975  ;;  %v774_v10 = vmul.f32 %v2974_v39, %v770_v56 }
 0x677   :  { %v719_v35 = vmul.f32 %v2976_v48, %v715_v12 }
 0x6d1   :  { %v726_v32 = vpop.permute.xlu0 %725 }
 0x6d2   :  { %v730_v18 = vmul.f32 %v2970_v13, %v726_v32 }
 0x6d3   :  { %v778_v37 = vpop.permute.xlu1 %777 }
 0x6d4   :  { %735 = vrot.lane.b32.xlu0 %v730_v18, %s3204_s12  ;;  %v783_v40 = vmul.f32 %v2972_v34, %v778_v37 }
 0x6d5   :  { %v780_v41 = vpop.permute.xlu0 %779 }
 0x6d6   :  { %v784_v42 = vmul.f32 %v2974_v39, %v780_v41  ;;  %787 = vrot.lane.b32.xlu1 %v783_v40, %s3204_s12 }
 0x6d7   :  { %v724_v51 = vpop.permute.xlu1 %723 }
 0x6d8   :  { %789 = vrot.lane.b32.xlu0 %v784_v42, %s3204_s12  ;;  %v729_v38 = vmul.f32 %v2976_v48, %v724_v51 }
 0x6da   :  { %733 = vrot.lane.b32.xlu1 %v729_v38, %s3204_s12 }
 0x746   :  { %v736_v45 = vpop.permute.xlu0 %735 }
 0x747   :  { %v3596_v50 = vadd.f32 %v736_v45, %v720_v43 }
 0x748   :  { %v788_v2 = vpop.permute.xlu1 %787 }
 0x749   :  { %2977 = vtanh.f32 %v3596_v50  ;;  %v3602_v15 = vadd.f32 %v788_v2, %v773_v57 }
 0x74a   :  { %v790_v27 = vpop.permute.xlu0 %789 }
 0x74b   :  { %v3604_v30 = vadd.f32 %v790_v27, %v774_v10  ;;  %2979 = vtanh.f32 %v3602_v15 }
 0x74c   :  { %v734_v47 = vpop.permute.xlu1 %733 }
 0x74d   :  { %2981 = vtanh.f32 %v3604_v30  ;;  %v3608_v31 = vadd.f32 %v734_v47, %v719_v35 }
 0x74f   :  { %2983 = vtanh.f32 %v3608_v31 }
 0x756   :  { %v2978_v52 = vpop.eup %2977 }
 0x757   :  { %747 = vrot.lane.b32.xlu0 %v2978_v52, %s3203_s3 }
 0x758   :  { %v2980_v63 = vpop.eup %2979 }
 0x759   :  { %799 = vrot.lane.b32.xlu1 %v2980_v63, %s3203_s3 }
 0x75a   :  { %v2982_v54 = vpop.eup %2981 }
 0x75b   :  { %801 = vrot.lane.b32.xlu0 %v2982_v54, %s3203_s3 }
 0x75c   :  { %v2984_v8 = vpop.eup %2983 }
 0x75d   :  { %745 = vrot.lane.b32.xlu1 %v2984_v8, %s3203_s3 }
 0x7c9   :  { %v748_v32 = vpop.permute.xlu0 %747 }
 0x7ca   :  { %v3615_v37 = vmul.f32 %v2970_v13, %v748_v32 }
 0x7cb   :  { %v800_v18 = vpop.permute.xlu1 %799 }
 0x7cc   :  { %v3617_v40 = vmul.f32 %v2972_v34, %v800_v18  ;;  %v809_v43 = vrot.slane %v3615_v37, 7 }
 0x7cd   :  { %v802_v41 = vpop.permute.xlu0 %801 }
 0x7ce   :  { %v3619_v42 = vmul.f32 %v2974_v39, %v802_v41  ;;  %v817_v51 = vrot.slane %v3617_v40, 3 }
 0x7cf   :  { %v746_v53 = vpop.permute.xlu1 %745 }
 0x7d0   :  { %v818_v38 = vrot.slane %v3619_v42, 2  ;;  %v3624_v45 = vmul.f32 %v2976_v48, %v746_v53 }
 0x7d2   :  { %v819_v55 = vsel %vm810_vm4, %v818_v38, %v817_v51  ;;  %v811_v13 = vsel %vm810_vm4, %v809_v43, %v3624_v45  ;;  %vm1293_vm4 = vcmask 258052  }
 0x7d3   :  { %820 = vrot.lane.b32.xlu1 %v819_v55, %s3203_s3  ;;  %812 = vrot.lane.b32.xlu0 %v811_v13, %s3204_s12 }
 0x845   :  { %v821_v34 = vpop.permute.xlu1 %820  ;;  %v813_v39 = vpop.permute.xlu0 %812 }
 0x846   :  { %v823_v56 = vsel %vm61_vm0, %v813_v39, %v821_v34 }
 0x847   :  { %v843_v57 = vrot.slane %v823_v56, 2  ;;  %v948_v56 = vrot.slane %v3596_v50, 7 }
 0x849   :  { %2680 = vmatmul.mubr.msk.f32.vlgmr.msra.gmra.mxu0 %vm161_vm2, %v843_v57 }
 0x84a   :  { %1326 = vmatpush1.msra.mxu0 %v3276_v1  ;;  %1373 = vmatprep.mubr.f32.mxu0 %v3202_v20 }
 0x84b   :  { %1327 = vmatprep.subr.mxu0 %v3285_v3 }
 0x84c   :  { %1328 = vmatpush1.msra.mxu0 %v3293_v5 }
 0x84d   :  { %1329 = vmatprep.subr.mxu0 %v3302_v7 }
 0x84e   :  { %1330 = vmatpush1.msra.mxu0 %v3311_v9 }
 0x84f   :  { %1331 = vmatprep.subr.mxu0 %v3320_v11 }
 0x850   :  { %1332 = vmatpush1.msra.mxu0 %v3332_v14 }
 0x851   :  { %1333 = vmatprep.subr.mxu0 %v3341_v16 }
 0x852   :  { %1334 = vmatpush1.msra.mxu0 %v3347_v17 }
 0x853   :  { %1335 = vmatprep.subr.mxu0 %v3356_v19 }
 0x854   :  { %1336 = vmatpush1.msra.mxu0 %v3363_v21 }
 0x855   :  { %1337 = vmatprep.subr.mxu0 %v3370_v22 }
 0x856   :  { %1338 = vmatpush1.msra.mxu0 %v3377_v23 }
 0x857   :  { %1339 = vmatprep.subr.mxu0 %v3386_v25 }
 0x858   :  { %1340 = vmatpush1.msra.mxu0 %v3393_v26 }
 0x859   :  { %1788 = vmatprep.subr.mxu0 %v3271_v0 }
 0x909   :  { %v912_v1 = vpop.f32.mrf.mxu0 }
 0x90a   :  { %v919_v3 = vrot.slane %v912_v1, 6  ;;  %v918_v5 = vrot.slane %v912_v1, 5 }
 0x90b   :  { %v914_v7 = vpop.f32.mrf.mxu0 }
 0x90c   :  { %v923_v9 = vadd.f32 %v919_v3, %v3445_v36  ;;  %v925_v11 = vrot.slane %v914_v7, 4  ;;  %v922_v14 = vadd.f32 %v918_v5, %v3456_v49  ;;  %v926_v16 = vrot.slane %v914_v7, 5 }
 0x90d   :  { %v947_v3 = vrot.slane %v3608_v31, 7  ;;  %v1001_v7 = vrot.slane %v3602_v15, 1 }
 0x90e   :  { %2985 = vtanh.f32 %v923_v9  ;;  %v929_v17 = vadd.f32 %v925_v11, %v3450_v44  ;;  %v930_v19 = vadd.f32 %v926_v16, %v3452_v46  ;;  %v2682_v25 = vmul.f32 -1.442695, %v923_v9 }
 0x90f   :  { %2987 = vtanh.f32 %v922_v14  ;;  %v2681_v26 = vmul.f32 -1.442695, %v922_v14 }
 0x910   :  { %2989 = vtanh.f32 %v929_v17  ;;  %v2683_v48 = vmul.f32 -1.442695, %v929_v17  ;;  %v2684_v2 = vmul.f32 -1.442695, %v930_v19 }
 0x911   :  { %2991 = vtanh.f32 %v930_v19  ;;  %v1002_v19 = vrot.slane %v3604_v30, 1 }
 0x912   :  { %2993 = vpow2.f32 %v2682_v25 }
 0x913   :  { %2995 = vpow2.f32 %v2681_v26 }
 0x914   :  { %2997 = vpow2.f32 %v2683_v48 }
 0x915   :  { %2999 = vpow2.f32 %v2684_v2 }
 0x91b   :  { %v2986_v21 = vpop.eup %2985 }
 0x91c   :  { %957 = vrot.lane.b32.xlu0 %v2986_v21, %s3203_s3  ;;  %v2988_v0 = vpop.eup %2987 }
 0x91d   :  { %v2990_v22 = vpop.eup %2989 }
 0x91e   :  { %1009 = vrot.lane.b32.xlu1 %v2990_v22, %s3203_s3  ;;  %v2992_v23 = vpop.eup %2991 }
 0x91f   :  { %v2994_v10 = vpop.eup %2993 }
 0x920   :  { %955 = vrot.lane.b32.xlu0 %v2988_v0, %s3203_s3  ;;  %v938_v12 = vadd.f32 1.0, %v2994_v10  ;;  %v2996_v27 = vpop.eup %2995 }
 0x921   :  { %v2998_v35 = vpop.eup %2997  ;;  %v937_v47 = vadd.f32 1.0, %v2996_v27 }
 0x922   :  { %1011 = vrot.lane.b32.xlu1 %v2992_v23, %s3203_s3  ;;  %3001 = vrcp.f32 %v938_v12  ;;  %v991_v52 = vadd.f32 1.0, %v2998_v35  ;;  %v3000_v63 = vpop.eup %2999 }
 0x923   :  { %3003 = vrcp.f32 %v937_v47  ;;  %v992_v54 = vadd.f32 1.0, %v3000_v63 }
 0x924   :  { %3005 = vrcp.f32 %v991_v52 }
 0x925   :  { %3007 = vrcp.f32 %v992_v54 }
 0x92f   :  { %v3002_v8 = vpop.eup %3001 }
 0x930   :  { %v3004_v41 = vpop.eup %3003  ;;  %v952_v57 = vmul.f32 %v3002_v8, %v948_v56  ;;  %v3748_v56 = vld [vmem:[%s4389_s2 + $0x30] sm:$0xff] }
 0x931   :  { %v3006_v38 = vpop.eup %3005  ;;  %v951_v9 = vmul.f32 %v3004_v41, %v947_v3  ;;  %v3766_v3 = vld [vmem:[%s4389_s2 + $0x18] sm:$0xff] }
 0x932   :  { %v3008_v13 = vpop.eup %3007  ;;  %v1005_v11 = vmul.f32 %v3006_v38, %v1001_v7  ;;  %v3772_v7 = vld [vmem:[%s4389_s2 + $0x10] sm:$0xff] }
 0x933   :  { %v1006_v50 = vmul.f32 %v3008_v13, %v1002_v19 }
 0x98e   :  { %v958_v32 = vpop.permute.xlu0 %957 }
 0x98f   :  { %v962_v18 = vmul.f32 %v3002_v8, %v958_v32 }
 0x990   :  { %v1010_v53 = vpop.permute.xlu1 %1009 }
 0x991   :  { %967 = vrot.lane.b32.xlu0 %v962_v18, %s3204_s12  ;;  %v1015_v55 = vmul.f32 %v3006_v38, %v1010_v53  ;;  %v3712_v53 = vld [vmem:[%s4389_s2 + $0x60] sm:$0xff] }
 0x992   :  { %v956_v51 = vpop.permute.xlu0 %955 }
 0x993   :  { %v961_v43 = vmul.f32 %v3004_v41, %v956_v51  ;;  %1019 = vrot.lane.b32.xlu1 %v1015_v55, %s3204_s12  ;;  %v3699_v51 = vld [vmem:[%s4389_s2 + $0x70] sm:$0xff] }
 0x994   :  { %v1012_v34 = vpop.permute.xlu1 %1011  ;;  %v3724_v55 = vld [vmem:[%s4389_s2 + $0x50] sm:$0xff] }
 0x995   :  { %965 = vrot.lane.b32.xlu0 %v961_v43, %s3204_s12  ;;  %v1016_v39 = vmul.f32 %v3008_v13, %v1012_v34  ;;  %v3718_v43 = vld [vmem:[%s4389_s2 + $0x58] sm:$0xff]  ;;  %v3736_v34 = vld [vmem:[%s4389_s2 + $0x40] sm:$0xff] }
 0x997   :  { %1021 = vrot.lane.b32.xlu1 %v1016_v39, %s3204_s12  ;;  %v3742_v39 = vld [vmem:[%s4389_s2 + $0x38] sm:$0xff] }
 0xa03   :  { %v968_v1 = vpop.permute.xlu0 %967 }
 0xa04   :  { %v3662_v5 = vadd.f32 %v968_v1, %v952_v57  ;;  %v3754_v57 = vld [vmem:[%s4389_s2 + $0x28] sm:$0xff]  ;;  %v3760_v1 = vld [vmem:[%s4389_s2 + $0x20] sm:$0xff] }
 0xa05   :  { %v1020_v16 = vpop.permute.xlu1 %1019 }
 0xa06   :  { %3009 = vtanh.f32 %v3662_v5  ;;  %v3669_v21 = vadd.f32 %v1020_v16, %v1005_v11  ;;  %v3784_v11 = vld [vmem:[%s4389_s2] sm:$0xff] }
 0xa07   :  { %v966_v14 = vpop.permute.xlu0 %965 }
 0xa08   :  { %v3666_v17 = vadd.f32 %v966_v14, %v951_v9  ;;  %v3778_v9 = vld [vmem:[%s4389_s2 + $0x8] sm:$0xff] }
 0xa09   :  { %v1022_v31 = vpop.permute.xlu1 %1021 }
 0xa0a   :  { %3011 = vtanh.f32 %v3666_v17  ;;  %v3673_v0 = vadd.f32 %v1022_v31, %v1006_v50 }
 0xa0b   :  { %3013 = vtanh.f32 %v3669_v21 }
 0xa0c   :  { %3015 = vtanh.f32 %v3673_v0 }
 0xa13   :  { %v3010_v15 = vpop.eup %3009 }
 0xa14   :  { %979 = vrot.lane.b32.xlu0 %v3010_v15, %s3203_s3 }
 0xa17   :  { %v3012_v22 = vpop.eup %3011 }
 0xa18   :  { %v3014_v23 = vpop.eup %3013  ;;  %977 = vrot.lane.b32.xlu0 %v3012_v22, %s3203_s3 }
 0xa19   :  { %1031 = vrot.lane.b32.xlu1 %v3014_v23, %s3203_s3  ;;  %v3016_v30 = vpop.eup %3015 }
 0xa1d   :  { %1033 = vrot.lane.b32.xlu1 %v3016_v30, %s3203_s3 }
 0xa86   :  { %v980_v25 = vpop.permute.xlu0 %979 }
 0xa87   :  { %v3680_v26 = vmul.f32 %v3002_v8, %v980_v25 }
 0xa89   :  { %v1041_v2 = vrot.slane %v3680_v26, 7 }
 0xa8a   :  { %v978_v48 = vpop.permute.xlu0 %977 }
 0xa8b   :  { %v1032_v10 = vpop.permute.xlu1 %1031  ;;  %v3683_v12 = vmul.f32 %v3004_v41, %v978_v48 }
 0xa8c   :  { %v3685_v27 = vmul.f32 %v3006_v38, %v1032_v10  ;;  %v3706_v38 = vld [vmem:[%s4389_s2 + $0x68] sm:$0xff] }
 0xa8d   :  { %v1043_v35 = vsel %vm1042_vm5, %v1041_v2, %v3683_v12 }
 0xa8e   :  { %1044 = vrot.lane.b32.xlu0 %v1043_v35, %s3204_s12  ;;  %v1049_v52 = vrot.slane %v3685_v27, 1 }
 0xa8f   :  { %v1034_v47 = vpop.permute.xlu1 %1033 }
 0xa90   :  { %v3690_v63 = vmul.f32 %v3008_v13, %v1034_v47  ;;  %v3730_v13 = vld [vmem:[%s4389_s2 + $0x48] sm:$0xff] }
 0xa92   :  { %v1050_v54 = vsel %vm1042_vm5, %v3690_v63, %v1049_v52  ;;  %vm1525_vm5 = vcmask 259077  }
 0xa93   :  { %1051 = vrot.lane.b32.xlu1 %v1050_v54, %s3203_s3 }
 0xb00   :  { %v1045_v8 = vpop.permute.xlu0 %1044 }
 0xb05   :  { %v1052_v32 = vpop.permute.xlu1 %1051 }
 0xb06   :  { %v1054_v18 = vsel %vm61_vm0, %v1045_v8, %v1052_v32 }
 0xb07   :  { %v1074_v41 = vrot.slane %v1054_v18, 3 }
 0xb09   :  { %2685 = vmatmul.mubr.msk.f32.vlgmr.msra.gmra.mxu1 %vm161_vm2, %v1074_v41 }
 0xb0a   :  { %1558 = vmatpush1.msra.mxu1 %v3699_v51  ;;  %1605 = vmatprep.mubr.f32.mxu1 %v3202_v20 }
 0xb0b   :  { %1559 = vmatprep.subr.mxu1 %v3706_v38 }
 0xb0c   :  { %1560 = vmatpush1.msra.mxu1 %v3712_v53 }
 0xb0d   :  { %1561 = vmatprep.subr.mxu1 %v3718_v43 }
 0xb0e   :  { %1562 = vmatpush1.msra.mxu1 %v3724_v55 }
 0xb0f   :  { %1563 = vmatprep.subr.mxu1 %v3730_v13 }
 0xb10   :  { %1564 = vmatpush1.msra.mxu1 %v3736_v34 }
 0xb11   :  { %1565 = vmatprep.subr.mxu1 %v3742_v39 }
 0xb12   :  { %1566 = vmatpush1.msra.mxu1 %v3748_v56 }
 0xb13   :  { %1567 = vmatprep.subr.mxu1 %v3754_v57 }
 0xb14   :  { %1568 = vmatpush1.msra.mxu1 %v3760_v1 }
 0xb15   :  { %1569 = vmatprep.subr.mxu1 %v3766_v3 }
 0xb16   :  { %1570 = vmatpush1.msra.mxu1 %v3772_v7 }
 0xb17   :  { %1571 = vmatprep.subr.mxu1 %v3778_v9 }
 0xb18   :  { %1572 = vmatpush1.msra.mxu1 %v3784_v11 }
 0xbc9   :  { %v1143_v14 = vpop.f32.mrf.mxu1 }
 0xbca   :  { %v1150_v16 = vrot.slane %v1143_v14, 5  ;;  %v1149_v22 = vrot.slane %v1143_v14, 4 }
 0xbcb   :  { %v1145_v19 = vpop.f32.mrf.mxu1 }
 0xbcc   :  { %v1154_v50 = vadd.f32 %v1150_v16, %v3445_v36  ;;  %v1156_v31 = vrot.slane %v1145_v19, 5  ;;  %v1157_v15 = vrot.slane %v1145_v19, 6  ;;  %v1153_v25 = vadd.f32 %v1149_v22, %v3456_v49 }
 0xbce   :  { %3017 = vtanh.f32 %v1154_v50  ;;  %v1160_v23 = vadd.f32 %v1156_v31, %v3450_v44  ;;  %v1161_v30 = vadd.f32 %v1157_v15, %v3452_v46  ;;  %v2687_v47 = vmul.f32 -1.442695, %v1154_v50 }
 0xbcf   :  { %v2686_v8 = vmul.f32 -1.442695, %v1153_v25 }
 0xbd0   :  { %3019 = vtanh.f32 %v1160_v23  ;;  %v2688_v52 = vmul.f32 -1.442695, %v1160_v23  ;;  %v2689_v54 = vmul.f32 -1.442695, %v1161_v30 }
 0xbd1   :  { %3021 = vtanh.f32 %v1161_v30 }
 0xbd2   :  { %3023 = vtanh.f32 %v1153_v25 }
 0xbd3   :  { %3025 = vpow2.f32 %v2687_v47 }
 0xbd4   :  { %3027 = vpow2.f32 %v2688_v52 }
 0xbd5   :  { %3029 = vpow2.f32 %v2689_v54 }
 0xbd6   :  { %3031 = vpow2.f32 %v2686_v8  ;;  %v1179_v8 = vrot.slane %v3662_v5, 7 }
 0xbdb   :  { %v3018_v48 = vpop.eup %3017 }
 0xbdc   :  { %1188 = vrot.lane.b32.xlu0 %v3018_v48, %s3203_s3 }
 0xbdd   :  { %v3020_v2 = vpop.eup %3019 }
 0xbde   :  { %v3022_v10 = vpop.eup %3021  ;;  %1240 = vrot.lane.b32.xlu1 %v3020_v2, %s3203_s3 }
 0xbdf   :  { %v3024_v35 = vpop.eup %3023 }
 0xbe0   :  { %1242 = vrot.lane.b32.xlu0 %v3022_v10, %s3203_s3  ;;  %v3026_v32 = vpop.eup %3025 }
 0xbe1   :  { %v1169_v18 = vadd.f32 1.0, %v3026_v32  ;;  %v3028_v41 = vpop.eup %3027 }
 0xbe2   :  { %1186 = vrot.lane.b32.xlu1 %v3024_v35, %s3203_s3  ;;  %v3030_v14 = vpop.eup %3029  ;;  %v1222_v16 = vadd.f32 1.0, %v3028_v41 }
 0xbe3   :  { %3033 = vrcp.f32 %v1169_v18  ;;  %v3032_v19 = vpop.eup %3031  ;;  %v1223_v31 = vadd.f32 1.0, %v3030_v14  ;;  %v1232_v14 = vrot.slane %v3669_v21, 1 }
 0xbe4   :  { %v1168_v15 = vadd.f32 1.0, %v3032_v19  ;;  %3035 = vrcp.f32 %v1222_v16  ;;  %v1233_v16 = vrot.slane %v3673_v0, 1 }
 0xbe5   :  { %3037 = vrcp.f32 %v1223_v31 }
 0xbe6   :  { %3039 = vrcp.f32 %v1168_v15 }
 0xbf0   :  { %v3034_v50 = vpop.eup %3033 }
 0xbf1   :  { %v3036_v30 = vpop.eup %3035  ;;  %v1183_v32 = vmul.f32 %v3034_v50, %v1179_v8 }
 0xbf2   :  { %v3038_v48 = vpop.eup %3037  ;;  %v1236_v19 = vmul.f32 %v3036_v30, %v1232_v14 }
 0xbf3   :  { %v3040_v47 = vpop.eup %3039  ;;  %v1237_v15 = vmul.f32 %v3038_v48, %v1233_v16 }
 0xc4e   :  { %v1189_v22 = vpop.permute.xlu0 %1188 }
 0xc4f   :  { %v1193_v23 = vmul.f32 %v3034_v50, %v1189_v22  ;;  %v1178_v22 = vrot.slane %v3666_v17, 7 }
 0xc50   :  { %v1241_v25 = vpop.permute.xlu1 %1240 }
 0xc51   :  { %1198 = vrot.lane.b32.xlu0 %v1193_v23, %s3204_s12  ;;  %v1246_v2 = vmul.f32 %v3036_v30, %v1241_v25  ;;  %v1182_v5 = vmul.f32 %v3040_v47, %v1178_v22 }
 0xc52   :  { %v1243_v10 = vpop.permute.xlu0 %1242 }
 0xc53   :  { %v1247_v35 = vmul.f32 %v3038_v48, %v1243_v10  ;;  %1250 = vrot.lane.b32.xlu1 %v1246_v2, %s3204_s12 }
 0xc54   :  { %v1187_v52 = vpop.permute.xlu1 %1186 }
 0xc55   :  { %1252 = vrot.lane.b32.xlu0 %v1247_v35, %s3204_s12  ;;  %v1192_v54 = vmul.f32 %v3040_v47, %v1187_v52 }
 0xc57   :  { %1196 = vrot.lane.b32.xlu1 %v1192_v54, %s3204_s12 }
 0xcc3   :  { %v1199_v18 = vpop.permute.xlu0 %1198 }
 0xcc4   :  { %v3800_v41 = vadd.f32 %v1199_v18, %v1183_v32 }
 0xcc5   :  { %v1251_v31 = vpop.permute.xlu1 %1250 }
 0xcc6   :  { %3041 = vtanh.f32 %v3800_v41  ;;  %v3806_v23 = vadd.f32 %v1251_v31, %v1236_v19 }
 0xcc7   :  { %v1253_v25 = vpop.permute.xlu0 %1252 }
 0xcc8   :  { %v3808_v2 = vadd.f32 %v1253_v25, %v1237_v15  ;;  %3043 = vtanh.f32 %v3806_v23 }
 0xcc9   :  { %v1197_v21 = vpop.permute.xlu1 %1196 }
 0xcca   :  { %3045 = vtanh.f32 %v3808_v2  ;;  %v3812_v10 = vadd.f32 %v1197_v21, %v1182_v5 }
 0xccc   :  { %3047 = vtanh.f32 %v3812_v10 }
 0xcd3   :  { %v3042_v0 = vpop.eup %3041 }
 0xcd4   :  { %1210 = vrot.lane.b32.xlu0 %v3042_v0, %s3203_s3 }
 0xcd5   :  { %v3044_v35 = vpop.eup %3043 }
 0xcd6   :  { %1262 = vrot.lane.b32.xlu1 %v3044_v35, %s3203_s3 }
 0xcd7   :  { %v3046_v17 = vpop.eup %3045 }
 0xcd8   :  { %1264 = vrot.lane.b32.xlu0 %v3046_v17, %s3203_s3 }
 0xcd9   :  { %v3048_v52 = vpop.eup %3047 }
 0xcda   :  { %1208 = vrot.lane.b32.xlu1 %v3048_v52, %s3203_s3 }
 0xd46   :  { %v1211_v54 = vpop.permute.xlu0 %1210 }
 0xd47   :  { %v3819_v32 = vmul.f32 %v3034_v50, %v1211_v54 }
 0xd48   :  { %v1263_v8 = vpop.permute.xlu1 %1262 }
 0xd49   :  { %v3821_v18 = vmul.f32 %v3036_v30, %v1263_v8  ;;  %v1272_v22 = vrot.slane %v3819_v32, 7 }
 0xd4a   :  { %v1265_v14 = vpop.permute.xlu0 %1264 }
 0xd4b   :  { %v3823_v16 = vmul.f32 %v3038_v48, %v1265_v14  ;;  %v1280_v19 = vrot.slane %v3821_v18, 7 }
 0xd4c   :  { %v1209_v15 = vpop.permute.xlu1 %1208 }
 0xd4d   :  { %v1281_v31 = vrot.slane %v3823_v16, 6  ;;  %v3828_v25 = vmul.f32 %v3040_v47, %v1209_v15 }
 0xd4f   :  { %v1282_v5 = vsel %vm1273_vm6, %v1281_v31, %v1280_v19  ;;  %v1274_v50 = vsel %vm1273_vm6, %v1272_v22, %v3828_v25  ;;  %vm1302_vm6 = vcmask 519427  }
 0xd50   :  { %1283 = vrot.lane.b32.xlu1 %v1282_v5, %s3203_s3  ;;  %1275 = vrot.lane.b32.xlu0 %v1274_v50, %s3204_s12 }
 0xdc2   :  { %v1284_v30 = vpop.permute.xlu1 %1283  ;;  %v1276_v48 = vpop.permute.xlu0 %1275 }
 0xdc3   :  { %v1286_v21 = vsel %vm61_vm0, %v1276_v48, %v1284_v30 }
 0xdc4   :  { %v1306_v0 = vrot.slane %v1286_v21, 4 }
 0xdc6   :  { %2690 = vmatmul.mubr.msk.f32.vlgmr.msra.gmra.mxu0 %vm161_vm2, %v1306_v0 }
 0xdc7   :  { %1789 = vmatpush1.msra.mxu0 %v3699_v51  ;;  %1836 = vmatprep.mubr.f32.mxu0 %v3202_v20 }
 0xdc8   :  { %1790 = vmatprep.subr.mxu0 %v3706_v38 }
 0xdc9   :  { %1791 = vmatpush1.msra.mxu0 %v3712_v53 }
 0xdca   :  { %1792 = vmatprep.subr.mxu0 %v3718_v43 }
 0xdcb   :  { %1793 = vmatpush1.msra.mxu0 %v3724_v55 }
 0xdcc   :  { %1794 = vmatprep.subr.mxu0 %v3730_v13 }
 0xdcd   :  { %1795 = vmatpush1.msra.mxu0 %v3736_v34 }
 0xdce   :  { %1796 = vmatprep.subr.mxu0 %v3742_v39 }
 0xdcf   :  { %1797 = vmatpush1.msra.mxu0 %v3748_v56 }
 0xdd0   :  { %1798 = vmatprep.subr.mxu0 %v3754_v57 }
 0xdd1   :  { %1799 = vmatpush1.msra.mxu0 %v3760_v1 }
 0xdd2   :  { %1800 = vmatprep.subr.mxu0 %v3766_v3 }
 0xdd3   :  { %1801 = vmatpush1.msra.mxu0 %v3772_v7 }
 0xdd4   :  { %1802 = vmatprep.subr.mxu0 %v3778_v9 }
 0xdd5   :  { %1803 = vmatpush1.msra.mxu0 %v3784_v11 }
 0xe86   :  { %v1375_v51 = vpop.f32.mrf.mxu0 }
 0xe87   :  { %v1382_v38 = vrot.slane %v1375_v51, 4  ;;  %v1381_v34 = vrot.slane %v1375_v51, 3 }
 0xe88   :  { %v1377_v53 = vpop.f32.mrf.mxu0 }
 0xe89   :  { %v1386_v43 = vadd.f32 %v1382_v38, %v3445_v36  ;;  %v1388_v55 = vrot.slane %v1377_v53, 6  ;;  %v1389_v13 = vrot.slane %v1377_v53, 7  ;;  %v1385_v57 = vadd.f32 %v1381_v34, %v3456_v49 }
 0xe8a   :  { %v1411_v34 = vrot.slane %v3800_v41, 7 }
 0xe8b   :  { %3049 = vtanh.f32 %v1386_v43  ;;  %v1392_v39 = vadd.f32 %v1388_v55, %v3450_v44  ;;  %v1393_v56 = vadd.f32 %v1389_v13, %v3452_v46  ;;  %v2692_v11 = vmul.f32 -1.442695, %v1386_v43 }
 0xe8c   :  { %v2691_v17 = vmul.f32 -1.442695, %v1385_v57 }
 0xe8d   :  { %3051 = vtanh.f32 %v1392_v39  ;;  %v2693_v47 = vmul.f32 -1.442695, %v1392_v39  ;;  %v2694_v35 = vmul.f32 -1.442695, %v1393_v56 }
 0xe8e   :  { %3053 = vtanh.f32 %v1393_v56 }
 0xe8f   :  { %3055 = vtanh.f32 %v1385_v57 }
 0xe90   :  { %3057 = vpow2.f32 %v2692_v11 }
 0xe91   :  { %3059 = vpow2.f32 %v2693_v47  ;;  %v1410_v47 = vrot.slane %v3812_v10, 7 }
 0xe92   :  { %3061 = vpow2.f32 %v2694_v35 }
 0xe93   :  { %3063 = vpow2.f32 %v2691_v17 }
 0xe98   :  { %v3050_v1 = vpop.eup %3049 }
 0xe99   :  { %1420 = vrot.lane.b32.xlu0 %v3050_v1, %s3203_s3  ;;  %v1464_v1 = vrot.slane %v3806_v23, 1 }
 0xe9a   :  { %v3052_v3 = vpop.eup %3051 }
 0xe9b   :  { %v3054_v7 = vpop.eup %3053  ;;  %1472 = vrot.lane.b32.xlu1 %v3052_v3, %s3203_s3  ;;  %v1465_v3 = vrot.slane %v3808_v2, 1 }
 0xe9c   :  { %v3056_v9 = vpop.eup %3055 }
 0xe9d   :  { %1474 = vrot.lane.b32.xlu0 %v3054_v7, %s3203_s3  ;;  %v3058_v52 = vpop.eup %3057 }
 0xe9e   :  { %v1401_v54 = vadd.f32 1.0, %v3058_v52  ;;  %v3060_v8 = vpop.eup %3059 }
 0xe9f   :  { %1418 = vrot.lane.b32.xlu1 %v3056_v9, %s3203_s3  ;;  %v3062_v14 = vpop.eup %3061  ;;  %v1454_v19 = vadd.f32 1.0, %v3060_v8 }
 0xea0   :  { %3065 = vrcp.f32 %v1401_v54  ;;  %v3064_v31 = vpop.eup %3063  ;;  %v1455_v15 = vadd.f32 1.0, %v3062_v14 }
 0xea1   :  { %v1400_v22 = vadd.f32 1.0, %v3064_v31  ;;  %3067 = vrcp.f32 %v1454_v19 }
 0xea2   :  { %3069 = vrcp.f32 %v1455_v15 }
 0xea3   :  { %3071 = vrcp.f32 %v1400_v22 }
 0xead   :  { %v3066_v5 = vpop.eup %3065 }
 0xeae   :  { %v3068_v48 = vpop.eup %3067  ;;  %v1415_v39 = vmul.f32 %v3066_v5, %v1411_v34 }
 0xeaf   :  { %v3070_v0 = vpop.eup %3069  ;;  %v1468_v7 = vmul.f32 %v3068_v48, %v1464_v1 }
 0xeb0   :  { %v3072_v43 = vpop.eup %3071  ;;  %v1469_v11 = vmul.f32 %v3070_v0, %v1465_v3 }
 0xeb1   :  { %v1414_v41 = vmul.f32 %v3072_v43, %v1410_v47 }
 0xf0b   :  { %v1421_v50 = vpop.permute.xlu0 %1420 }
 0xf0c   :  { %v1425_v30 = vmul.f32 %v3066_v5, %v1421_v50 }
 0xf0d   :  { %v1473_v21 = vpop.permute.xlu1 %1472 }
 0xf0e   :  { %1430 = vrot.lane.b32.xlu0 %v1425_v30, %s3204_s12  ;;  %v1478_v51 = vmul.f32 %v3068_v48, %v1473_v21 }
 0xf0f   :  { %v1475_v38 = vpop.permute.xlu0 %1474 }
 0xf10   :  { %v1479_v53 = vmul.f32 %v3070_v0, %v1475_v38  ;;  %1482 = vrot.lane.b32.xlu1 %v1478_v51, %s3204_s12 }
 0xf11   :  { %v1419_v55 = vpop.permute.xlu1 %1418 }
 0xf12   :  { %1484 = vrot.lane.b32.xlu0 %v1479_v53, %s3204_s12  ;;  %v1424_v13 = vmul.f32 %v3072_v43, %v1419_v55 }
 0xf14   :  { %1428 = vrot.lane.b32.xlu1 %v1424_v13, %s3204_s12 }
 0xf80   :  { %v1431_v56 = vpop.permute.xlu0 %1430 }
 0xf81   :  { %v3864_v57 = vadd.f32 %v1431_v56, %v1415_v39 }
 0xf82   :  { %v1483_v9 = vpop.permute.xlu1 %1482 }
 0xf83   :  { %3073 = vtanh.f32 %v3864_v57  ;;  %v3870_v35 = vadd.f32 %v1483_v9, %v1468_v7 }
 0xf84   :  { %v1485_v17 = vpop.permute.xlu0 %1484 }
 0xf85   :  { %v3872_v52 = vadd.f32 %v1485_v17, %v1469_v11  ;;  %3075 = vtanh.f32 %v3870_v35 }
 0xf86   :  { %v1429_v23 = vpop.permute.xlu1 %1428 }
 0xf87   :  { %3077 = vtanh.f32 %v3872_v52  ;;  %v3876_v54 = vadd.f32 %v1429_v23, %v1414_v41 }
 0xf89   :  { %3079 = vtanh.f32 %v3876_v54 }
 0xf90   :  { %v3074_v2 = vpop.eup %3073 }
 0xf91   :  { %1442 = vrot.lane.b32.xlu0 %v3074_v2, %s3203_s3 }
 0xf92   :  { %v3076_v8 = vpop.eup %3075 }
 0xf93   :  { %1494 = vrot.lane.b32.xlu1 %v3076_v8, %s3203_s3 }
 0xf94   :  { %v3078_v10 = vpop.eup %3077 }
 0xf95   :  { %1496 = vrot.lane.b32.xlu0 %v3078_v10, %s3203_s3 }
 0xf96   :  { %v3080_v14 = vpop.eup %3079 }
 0xf97   :  { %1440 = vrot.lane.b32.xlu1 %v3080_v14, %s3203_s3 }
0x1003   :  { %v1443_v19 = vpop.permute.xlu0 %1442 }
0x1004   :  { %v3883_v15 = vmul.f32 %v3066_v5, %v1443_v19 }
0x1005   :  { %v1495_v31 = vpop.permute.xlu1 %1494 }
0x1006   :  { %v3885_v22 = vmul.f32 %v3068_v48, %v1495_v31  ;;  %v1504_v53 = vrot.slane %v3883_v15, 7 }
0x1007   :  { %v1497_v50 = vpop.permute.xlu0 %1496 }
0x1008   :  { %v3887_v30 = vmul.f32 %v3070_v0, %v1497_v50  ;;  %v1512_v21 = vrot.slane %v3885_v22, 5 }
0x1009   :  { %v1441_v38 = vpop.permute.xlu1 %1440 }
0x100a   :  { %v1513_v51 = vrot.slane %v3887_v30, 4  ;;  %v3892_v55 = vmul.f32 %v3072_v43, %v1441_v38 }
0x100c   :  { %v1514_v13 = vsel %vm1505_vm7, %v1513_v51, %v1512_v21  ;;  %v1506_v5 = vsel %vm1505_vm7, %v1504_v53, %v3892_v55  ;;  %vm1756_vm7 = vcmask 260102  }
0x100d   :  { %1515 = vrot.lane.b32.xlu1 %v1514_v13, %s3203_s3  ;;  %1507 = vrot.lane.b32.xlu0 %v1506_v5, %s3204_s12 }
0x107f   :  { %v1516_v48 = vpop.permute.xlu1 %1515  ;;  %v1508_v0 = vpop.permute.xlu0 %1507 }
0x1080   :  { %v1518_v34 = vsel %vm61_vm0, %v1508_v0, %v1516_v48 }
0x1081   :  { %v1538_v39 = vrot.slane %v1518_v34, 5 }
0x1083   :  { %2695 = vmatmul.mubr.msk.f32.vlgmr.msra.gmra.mxu1 %vm161_vm2, %v1538_v39 }
0x1084   :  { %2099 = vmatprep.mubr.f32.mxu1 %v3202_v20 }
0x1143   :  { %v1607_v56 = vpop.f32.mrf.mxu1 }
0x1144   :  { %v1614_v1 = vrot.slane %v1607_v56, 3  ;;  %v1613_v9 = vrot.slane %v1607_v56, 2 }
0x1145   :  { %v1609_v43 = vpop.f32.mrf.mxu1 }
0x1146   :  { %v1618_v3 = vadd.f32 %v1614_v1, %v3445_v36  ;;  %v1620_v7 = vrot.slane %v1609_v43, 7  ;;  %v1624_v47 = vadd.f32 %v1609_v43, %v3452_v46  ;;  %v1617_v17 = vadd.f32 %v1613_v9, %v3456_v49 }
0x1148   :  { %3081 = vtanh.f32 %v1618_v3  ;;  %v1623_v11 = vadd.f32 %v1620_v7, %v3450_v44  ;;  %v2697_v10 = vmul.f32 -1.442695, %v1618_v3  ;;  %v2699_v19 = vmul.f32 -1.442695, %v1624_v47 }
0x1149   :  { %v2696_v31 = vmul.f32 -1.442695, %v1617_v17 }
0x114a   :  { %3083 = vtanh.f32 %v1623_v11  ;;  %v2698_v14 = vmul.f32 -1.442695, %v1623_v11 }
0x114b   :  { %3085 = vtanh.f32 %v1624_v47 }
0x114c   :  { %3087 = vtanh.f32 %v1617_v17 }
0x114d   :  { %3089 = vpow2.f32 %v2697_v10  ;;  %v1695_v10 = vrot.slane %v3870_v35, 1 }
0x114e   :  { %3091 = vpow2.f32 %v2698_v14  ;;  %v1696_v14 = vrot.slane %v3872_v52, 1 }
0x114f   :  { %3093 = vpow2.f32 %v2699_v19 }
0x1150   :  { %3095 = vpow2.f32 %v2696_v31 }
0x1155   :  { %v3082_v41 = vpop.eup %3081 }
0x1156   :  { %1651 = vrot.lane.b32.xlu0 %v3082_v41, %s3203_s3  ;;  %v1642_v41 = vrot.slane %v3864_v57, 7 }
0x1157   :  { %v3084_v23 = vpop.eup %3083 }
0x1158   :  { %v3086_v2 = vpop.eup %3085  ;;  %1703 = vrot.lane.b32.xlu1 %v3084_v23, %s3203_s3 }
0x1159   :  { %v3088_v8 = vpop.eup %3087 }
0x115a   :  { %1705 = vrot.lane.b32.xlu0 %v3086_v2, %s3203_s3  ;;  %v3090_v50 = vpop.eup %3089 }
0x115b   :  { %v1632_v21 = vadd.f32 1.0, %v3090_v50  ;;  %v3092_v51 = vpop.eup %3091 }
0x115c   :  { %1649 = vrot.lane.b32.xlu1 %v3088_v8, %s3203_s3  ;;  %v3094_v38 = vpop.eup %3093  ;;  %v1685_v53 = vadd.f32 1.0, %v3092_v51 }
0x115d   :  { %3097 = vrcp.f32 %v1632_v21  ;;  %v3096_v13 = vpop.eup %3095  ;;  %v1686_v5 = vadd.f32 1.0, %v3094_v38  ;;  %v1641_v21 = vrot.slane %v3876_v54, 7 }
0x115e   :  { %v1631_v48 = vadd.f32 1.0, %v3096_v13  ;;  %3099 = vrcp.f32 %v1685_v53 }
0x115f   :  { %3101 = vrcp.f32 %v1686_v5 }
0x1160   :  { %3103 = vrcp.f32 %v1631_v48 }
0x116a   :  { %v3098_v0 = vpop.eup %3097 }
0x116b   :  { %v3100_v56 = vpop.eup %3099  ;;  %v1646_v23 = vmul.f32 %v3098_v0, %v1642_v41 }
0x116c   :  { %v3102_v43 = vpop.eup %3101  ;;  %v1699_v19 = vmul.f32 %v3100_v56, %v1695_v10 }
0x116d   :  { %v3104_v11 = vpop.eup %3103  ;;  %v1700_v50 = vmul.f32 %v3102_v43, %v1696_v14 }
0x116e   :  { %v1645_v57 = vmul.f32 %v3104_v11, %v1641_v21 }
0x11c8   :  { %v1652_v34 = vpop.permute.xlu0 %1651 }
0x11c9   :  { %v1656_v39 = vmul.f32 %v3098_v0, %v1652_v34 }
0x11ca   :  { %v1704_v1 = vpop.permute.xlu1 %1703 }
0x11cb   :  { %1661 = vrot.lane.b32.xlu0 %v1656_v39, %s3204_s12  ;;  %v1709_v3 = vmul.f32 %v3100_v56, %v1704_v1 }
0x11cc   :  { %v1706_v7 = vpop.permute.xlu0 %1705 }
0x11cd   :  { %v1710_v9 = vmul.f32 %v3102_v43, %v1706_v7  ;;  %1713 = vrot.lane.b32.xlu1 %v1709_v3, %s3204_s12 }
0x11ce   :  { %v1650_v47 = vpop.permute.xlu1 %1649 }
0x11cf   :  { %1715 = vrot.lane.b32.xlu0 %v1710_v9, %s3204_s12  ;;  %v1655_v17 = vmul.f32 %v3104_v11, %v1650_v47 }
0x11d1   :  { %1659 = vrot.lane.b32.xlu1 %v1655_v17, %s3204_s12 }
0x123d   :  { %v1662_v2 = vpop.permute.xlu0 %1661 }
0x123e   :  { %v3913_v8 = vadd.f32 %v1662_v2, %v1646_v23 }
0x123f   :  { %v1714_v31 = vpop.permute.xlu1 %1713 }
0x1240   :  { %3105 = vtanh.f32 %v3913_v8  ;;  %v3919_v51 = vadd.f32 %v1714_v31, %v1699_v19 }
0x1241   :  { %v1716_v38 = vpop.permute.xlu0 %1715 }
0x1242   :  { %v3921_v53 = vadd.f32 %v1716_v38, %v1700_v50  ;;  %3107 = vtanh.f32 %v3919_v51 }
0x1243   :  { %v1660_v35 = vpop.permute.xlu1 %1659 }
0x1244   :  { %3109 = vtanh.f32 %v3921_v53  ;;  %v3925_v13 = vadd.f32 %v1660_v35, %v1645_v57 }
0x1246   :  { %3111 = vtanh.f32 %v3925_v13 }
0x124d   :  { %v3106_v52 = vpop.eup %3105 }
0x124e   :  { %1673 = vrot.lane.b32.xlu0 %v3106_v52, %s3203_s3 }
0x124f   :  { %v3108_v5 = vpop.eup %3107 }
0x1250   :  { %1725 = vrot.lane.b32.xlu1 %v3108_v5, %s3203_s3 }
0x1251   :  { %v3110_v54 = vpop.eup %3109 }
0x1252   :  { %1727 = vrot.lane.b32.xlu0 %v3110_v54, %s3203_s3 }
0x1253   :  { %v3112_v48 = vpop.eup %3111 }
0x1254   :  { %1671 = vrot.lane.b32.xlu1 %v3112_v48, %s3203_s3 }
0x12c0   :  { %v1674_v34 = vpop.permute.xlu0 %1673 }
0x12c1   :  { %v3932_v1 = vmul.f32 %v3098_v0, %v1674_v34 }
0x12c2   :  { %v1726_v39 = vpop.permute.xlu1 %1725 }
0x12c3   :  { %v3934_v3 = vmul.f32 %v3100_v56, %v1726_v39  ;;  %v1735_v23 = vrot.slane %v3932_v1, 7 }
0x12c4   :  { %v1728_v7 = vpop.permute.xlu0 %1727 }
0x12c5   :  { %v3936_v9 = vmul.f32 %v3102_v43, %v1728_v7  ;;  %v1743_v47 = vrot.slane %v3934_v3, 3 }
0x12c6   :  { %v1672_v41 = vpop.permute.xlu1 %1671 }
0x12c7   :  { %v1744_v17 = vrot.slane %v3936_v9, 2  ;;  %v3941_v2 = vmul.f32 %v3104_v11, %v1672_v41 }
0x12c9   :  { %v1745_v10 = vsel %vm1736_vm8, %v1744_v17, %v1743_v47  ;;  %v1737_v0 = vsel %vm1736_vm8, %v1735_v23, %v3941_v2  ;;  %vm1534_vm8 = vcmask 518402  }
0x12ca   :  { %1746 = vrot.lane.b32.xlu1 %v1745_v10, %s3203_s3  ;;  %1738 = vrot.lane.b32.xlu0 %v1737_v0, %s3204_s12 }
0x133c   :  { %v1747_v56 = vpop.permute.xlu1 %1746  ;;  %v1739_v43 = vpop.permute.xlu0 %1738 }
0x133d   :  { %v1749_v14 = vsel %vm61_vm0, %v1739_v43, %v1747_v56  ;;  %vm2251_vm0 = vcmask 1045504  }
0x133e   :  { %v1769_v19 = vrot.slane %v1749_v14, 6 }
0x1340   :  { %2700 = vmatmul.mubr.msk.f32.vlgmr.msra.gmra.mxu0 %vm161_vm2, %v1769_v19 }
0x1400   :  { %v1838_v31 = vpop.f32.mrf.mxu0 }
0x1401   :  { %v1844_v50 = vrot.slane %v1838_v31, 1  ;;  %v1845_v21 = vrot.slane %v1838_v31, 2 }
0x1402   :  { %v1840_v38 = vpop.f32.mrf.mxu0 }
0x1403   :  { %v1848_v11 = vadd.f32 %v1844_v50, %v3456_v49  ;;  %v1849_v57 = vadd.f32 %v1845_v21, %v3445_v36  ;;  %v1851_v35 = vrot.slane %v1840_v38, 1  ;;  %v1854_v52 = vadd.f32 %v1840_v38, %v3450_v44 }
0x1405   :  { %3113 = vtanh.f32 %v1848_v11  ;;  %v1855_v5 = vadd.f32 %v1851_v35, %v3452_v46  ;;  %v2701_v36 = vmul.f32 -1.442695, %v1848_v11  ;;  %v2702_v44 = vmul.f32 -1.442695, %v1849_v57 }
0x1406   :  { %3115 = vtanh.f32 %v1849_v57  ;;  %v2703_v39 = vmul.f32 -1.442695, %v1854_v52 }
0x1407   :  { %3117 = vtanh.f32 %v1854_v52  ;;  %v2704_v46 = vmul.f32 -1.442695, %v1855_v5 }
0x1408   :  { %3119 = vtanh.f32 %v1855_v5 }
0x1409   :  { %3121 = vpow2.f32 %v2701_v36 }
0x140a   :  { %3123 = vpow2.f32 %v2702_v44  ;;  %v1926_v44 = vrot.slane %v3919_v51, 1 }
0x140b   :  { %3125 = vpow2.f32 %v2703_v39 }
0x140c   :  { %3127 = vpow2.f32 %v2704_v46 }
0x1412   :  { %v3114_v54 = vpop.eup %3113 }
0x1413   :  { %1880 = vrot.lane.b32.xlu0 %v3114_v54, %s3203_s3  ;;  %v3116_v48 = vpop.eup %3115  ;;  %v1872_v54 = vrot.slane %v3925_v13, 7 }
0x1414   :  { %v3118_v34 = vpop.eup %3117 }
0x1415   :  { %1934 = vrot.lane.b32.xlu1 %v3118_v34, %s3203_s3  ;;  %v3120_v49 = vpop.eup %3119 }
0x1416   :  { %v3122_v7 = vpop.eup %3121 }
0x1417   :  { %1882 = vrot.lane.b32.xlu0 %v3116_v48, %s3203_s3  ;;  %v1862_v47 = vadd.f32 1.0, %v3122_v7  ;;  %v3124_v17 = vpop.eup %3123 }
0x1418   :  { %v3126_v41 = vpop.eup %3125  ;;  %v1863_v23 = vadd.f32 1.0, %v3124_v17 }
0x1419   :  { %1936 = vrot.lane.b32.xlu1 %v3120_v49, %s3203_s3  ;;  %3129 = vrcp.f32 %v1862_v47  ;;  %v1916_v10 = vadd.f32 1.0, %v3126_v41  ;;  %v3128_v0 = vpop.eup %3127  ;;  %v1873_v49 = vrot.slane %v3913_v8, 7 }
0x141a   :  { %3131 = vrcp.f32 %v1863_v23  ;;  %v1917_v56 = vadd.f32 1.0, %v3128_v0 }
0x141b   :  { %3133 = vrcp.f32 %v1916_v10 }
0x141c   :  { %3135 = vrcp.f32 %v1917_v56 }
0x1426   :  { %v3956_v43 = vpop.eup %3129 }
0x1427   :  { %v3960_v31 = vpop.eup %3131  ;;  %v1876_v48 = vmul.f32 %v3956_v43, %v1872_v54  ;;  %v4131_v54 = vld [vmem:[%s4393_s6 + $0x158] sm:$0x3f] }
0x1428   :  { %v3963_v11 = vpop.eup %3133  ;;  %v1877_v39 = vmul.f32 %v3960_v31, %v1873_v49 }
0x1429   :  { %v3968_v35 = vpop.eup %3135 }
0x1485   :  { %v1881_v14 = vpop.permute.xlu0 %1880 }
0x1486   :  { %v1886_v19 = vmul.f32 %v3956_v43, %v1881_v14 }
0x1487   :  { %v1935_v38 = vpop.permute.xlu1 %1934 }
0x1488   :  { %1890 = vrot.lane.b32.xlu0 %v1886_v19, %s3204_s12  ;;  %v1940_v57 = vmul.f32 %v3963_v11, %v1935_v38  ;;  %v2224_v38 = vld [vmem:[%s4393_s6 + $0xf8] sm:$0xff] }
0x1489   :  { %v1883_v50 = vpop.permute.xlu0 %1882 }
0x148a   :  { %v1887_v21 = vmul.f32 %v3960_v31, %v1883_v50  ;;  %1944 = vrot.lane.b32.xlu1 %v1940_v57, %s3204_s12 }
0x148b   :  { %v1937_v52 = vpop.permute.xlu1 %1936 }
0x148c   :  { %1892 = vrot.lane.b32.xlu0 %v1887_v21, %s3204_s12  ;;  %v1941_v5 = vmul.f32 %v3968_v35, %v1937_v52 }
0x148e   :  { %1946 = vrot.lane.b32.xlu1 %v1941_v5, %s3204_s12 }
0x1490   :  { %362 = vrot.lane.b32.xlu0 %v3492_v4, %s3204_s12  ;;  %v1930_v4 = vmul.f32 %v3963_v11, %v1926_v44 }
0x1492   :  { %371 = vrot.lane.b32.xlu1 %v3483_v58, %s3203_s3  ;;  %v1927_v58 = vrot.slane %v3921_v53, 1 }
0x1494   :  { %v1931_v8 = vmul.f32 %v3968_v35, %v1927_v58 }
0x14fa   :  { %v1891_v34 = vpop.permute.xlu0 %1890 }
0x14fb   :  { %v1896_v36 = vadd.f32 %v1891_v34, %v1876_v48 }
0x14fc   :  { %v1945_v47 = vpop.permute.xlu1 %1944 }
0x14fd   :  { %3137 = vtanh.f32 %v1896_v36  ;;  %v1950_v13 = vadd.f32 %v1945_v47, %v1930_v4 }
0x14fe   :  { %v1893_v46 = vpop.permute.xlu0 %1892 }
0x14ff   :  { %v1897_v7 = vadd.f32 %v1893_v46, %v1877_v39 }
0x1500   :  { %v1947_v51 = vpop.permute.xlu1 %1946 }
0x1501   :  { %3139 = vtanh.f32 %v1897_v7  ;;  %v1951_v41 = vadd.f32 %v1947_v51, %v1931_v8 }
0x1502   :  { %v363_v17 = vpop.permute.xlu0 %362  ;;  %3141 = vtanh.f32 %v1950_v13 }
0x1503   :  { %369 = vst.msk [vmem:[#allocation2] sm:$0x1] %vm368_vm9, %v363_v17  ;;  %3143 = vtanh.f32 %v1951_v41 }
0x1504   :  { %v372_v23 = vpop.permute.xlu1 %371 }
0x1505   :  { %378 = vst.msk [vmem:[#allocation2] sm:$0x80] %vm377_vm10, %v372_v23 }
0x150a   :  { %v3138_v10 = vpop.eup %3137 }
0x150b   :  { %1902 = vrot.lane.b32.xlu0 %v3138_v10, %s3203_s3 }
0x150e   :  { %v3140_v0 = vpop.eup %3139 }
0x150f   :  { %1904 = vrot.lane.b32.xlu0 %v3140_v0, %s3203_s3  ;;  %v3142_v53 = vpop.eup %3141 }
0x1510   :  { %1956 = vrot.lane.b32.xlu1 %v3142_v53, %s3203_s3  ;;  %v3144_v56 = vpop.eup %3143 }
0x1513   :  { %592 = vrot.lane.b32.xlu0 %v3558_v24, %s3204_s12  ;;  %v2004_v24 = vld [vmem:[%s4391_s4 + $0x80] sm:$0xff] }
0x1514   :  { %1958 = vrot.lane.b32.xlu1 %v3144_v56, %s3203_s3 }
0x1517   :  { %824 = vrot.lane.b32.xlu0 %v3624_v45, %s3204_s12  ;;  %v2000_v45 = vld [vmem:[%s4391_s4 + $0x60] sm:$0xff] }
0x1518   :  { %601 = vrot.lane.b32.xlu1 %v3552_v62, %s3203_s3  ;;  %v2006_v62 = vld [vmem:[%s4391_s4 + $0x90] sm:$0xff] }
0x151b   :  { %1055 = vrot.lane.b32.xlu0 %v3683_v12, %s3204_s12  ;;  %v2005_v12 = vld [vmem:[%s4391_s4 + $0x88] sm:$0xff] }
0x151c   :  { %833 = vrot.lane.b32.xlu1 %v3617_v40, %s3203_s3  ;;  %v2008_v40 = vld [vmem:[%s4391_s4 + $0xa0] sm:$0xff] }
0x151f   :  { %1287 = vrot.lane.b32.xlu0 %v3828_v25, %s3204_s12  ;;  %v1999_v25 = vld [vmem:[%s4391_s4 + $0x58] sm:$0xff] }
0x1520   :  { %1064 = vrot.lane.b32.xlu1 %v3685_v27, %s3203_s3  ;;  %v1997_v27 = vld [vmem:[%s4391_s4 + $0x48] sm:$0xff] }
0x1523   :  { %1519 = vrot.lane.b32.xlu0 %v3892_v55, %s3204_s12  ;;  %v1996_v55 = vld [vmem:[%s4391_s4 + $0x40] sm:$0xff] }
0x1524   :  { %1296 = vrot.lane.b32.xlu1 %v3821_v18, %s3203_s3  ;;  %v1994_v18 = vld [vmem:[%s4391_s4 + $0x30] sm:$0xff] }
0x1527   :  { %1750 = vrot.lane.b32.xlu0 %v3941_v2, %s3204_s12 }
0x1528   :  { %1528 = vrot.lane.b32.xlu1 %v3885_v22, %s3203_s3  ;;  %v1991_v22 = vld [vmem:[%s4391_s4 + $0x18] sm:$0xff] }
0x152b   :  { %364 = vrot.lane.b32.xlu0 %v3485_v59, %s3204_s12  ;;  %v2010_v59 = vld [vmem:[%s4391_s4 + $0xb0] sm:$0xff] }
0x152c   :  { %1759 = vrot.lane.b32.xlu1 %v3934_v3, %s3203_s3  ;;  %2051 = vmatprep.subr.mxu1 %v2010_v59  ;;  %v1988_v3 = vld [vmem:[%s4391_s4] sm:$0xff] }
0x152f   :  { %594 = vrot.lane.b32.xlu0 %v3550_v61, %s3204_s12  ;;  %v2007_v61 = vld [vmem:[%s4391_s4 + $0x98] sm:$0xff] }
0x1530   :  { %373 = vrot.lane.b32.xlu1 %v3487_v60, %s3203_s3  ;;  %v2009_v60 = vld [vmem:[%s4391_s4 + $0xa8] sm:$0xff] }
0x1531   :  { %2052 = vmatpush1.msra.mxu1 %v2009_v60 }
0x1532   :  { %2053 = vmatprep.subr.mxu1 %v2007_v61 }
0x1533   :  { %826 = vrot.lane.b32.xlu0 %v3615_v37, %s3204_s12  ;;  %v2003_v37 = vld [vmem:[%s4391_s4 + $0x78] sm:$0xff]  ;;  %2054 = vmatpush1.msra.mxu1 %v2006_v62 }
0x1534   :  { %603 = vrot.lane.b32.xlu1 %v3554_v6, %s3203_s3  ;;  %v2011_v6 = vld [vmem:[%s4391_s4 + $0xb8] sm:$0xff]  ;;  %2055 = vmatprep.subr.mxu1 %v2004_v24 }
0x1535   :  { %2799 = vmatprep.subr.mxu0 %v2011_v6  ;;  %2056 = vmatpush1.msra.mxu1 %v2003_v37  ;;  %v2223_v37 = vld [vmem:[%s4393_s6 + $0xf0] sm:$0xff] }
0x1536   :  { %2800 = vmatpush3.msra.mxu0 %v2011_v6  ;;  %v2208_v6 = vld [vmem:[%s4393_s6 + $0x78] sm:$0xff] }
0x1537   :  { %1057 = vrot.lane.b32.xlu0 %v3680_v26, %s3204_s12  ;;  %2801 = vmatprep.subr.mxu0 %v2008_v40  ;;  %v1998_v26 = vld [vmem:[%s4391_s4 + $0x50] sm:$0xff] }
0x1538   :  { %835 = vrot.lane.b32.xlu1 %v3619_v42, %s3203_s3  ;;  %v2001_v42 = vld [vmem:[%s4391_s4 + $0x68] sm:$0xff]  ;;  %2802 = vmatpush3.msra.mxu0 %v2008_v40  ;;  %v2207_v40 = vld [vmem:[%s4393_s6 + $0x70] sm:$0xff] }
0x1539   :  { %2057 = vmatprep.subr.mxu1 %v2001_v42  ;;  %2803 = vmatprep.subr.mxu0 %v2005_v12  ;;  %v2222_v42 = vld [vmem:[%s4393_s6 + $0xe8] sm:$0xff] }
0x153a   :  { %2058 = vmatpush1.msra.mxu1 %v2000_v45  ;;  %2804 = vmatpush3.msra.mxu0 %v2005_v12  ;;  %v2221_v12 = vld [vmem:[%s4393_s6 + $0xe0] sm:$0xff] }
0x153b   :  { %1289 = vrot.lane.b32.xlu0 %v3819_v32, %s3204_s12  ;;  %2059 = vmatprep.subr.mxu1 %v1998_v26  ;;  %v2002_v32 = vld [vmem:[%s4391_s4 + $0x70] sm:$0xff]  ;;  %v2206_v26 = vld [vmem:[%s4393_s6 + $0x68] sm:$0xff] }
0x153c   :  { %1066 = vrot.lane.b32.xlu1 %v3690_v63, %s3203_s3  ;;  %v1995_v63 = vld [vmem:[%s4391_s4 + $0x38] sm:$0xff]  ;;  %2060 = vmatpush1.msra.mxu1 %v1997_v27  ;;  %v2205_v27 = vld [vmem:[%s4393_s6 + $0x60] sm:$0xff] }
0x153d   :  { %2061 = vmatprep.subr.mxu1 %v1995_v63  ;;  %2805 = vmatprep.subr.mxu0 %v2002_v32  ;;  %v2220_v63 = vld [vmem:[%s4393_s6 + $0xd8] sm:$0xff] }
0x153e   :  { %2062 = vmatpush1.msra.mxu1 %v1994_v18  ;;  %2806 = vmatpush3.msra.mxu0 %v2002_v32  ;;  %v2204_v32 = vld [vmem:[%s4393_s6 + $0x58] sm:$0xff]  ;;  %v2219_v18 = vld [vmem:[%s4393_s6 + $0xd0] sm:$0xff] }
0x153f   :  { %1521 = vrot.lane.b32.xlu0 %v3883_v15, %s3204_s12  ;;  %2807 = vmatprep.subr.mxu0 %v1999_v25 }
0x1540   :  { %1298 = vrot.lane.b32.xlu1 %v3823_v16, %s3203_s3  ;;  %v1992_v16 = vld [vmem:[%s4391_s4 + $0x20] sm:$0xff]  ;;  %2808 = vmatpush3.msra.mxu0 %v1999_v25  ;;  %v2218_v25 = vld [vmem:[%s4393_s6 + $0xc8] sm:$0xff] }
0x1541   :  { %2063 = vmatprep.subr.mxu1 %v1992_v16  ;;  %2809 = vmatprep.subr.mxu0 %v1996_v55  ;;  %v2203_v16 = vld [vmem:[%s4393_s6 + $0x50] sm:$0xff] }
0x1542   :  { %2064 = vmatpush1.msra.mxu1 %v1991_v22  ;;  %2810 = vmatpush3.msra.mxu0 %v1996_v55  ;;  %v2235_v22 = vld [vmem:[%s4393_s6 + $0x150] sm:$0xff]  ;;  %v2201_v55 = vld [vmem:[%s4393_s6 + $0x40] sm:$0xff] }
0x1543   :  { %1752 = vrot.lane.b32.xlu0 %v3932_v1, %s3204_s12 }
0x1544   :  { %1530 = vrot.lane.b32.xlu1 %v3887_v30, %s3203_s3  ;;  %v1989_v30 = vld [vmem:[%s4391_s4 + $0x8] sm:$0xff] }
0x1545   :  { %2065 = vmatprep.subr.mxu1 %v1989_v30  ;;  %v2217_v30 = vld [vmem:[%s4393_s6 + $0xc0] sm:$0xff] }
0x1546   :  { %2066 = vmatpush1.msra.mxu1 %v1988_v3  ;;  %v2216_v3 = vld [vmem:[%s4393_s6 + $0xb8] sm:$0xff] }
0x1547   :  { %2728 = vmatprep.subr.mxu1 %v2224_v38  ;;  %v2231_v38 = vld [vmem:[%s4393_s6 + $0x130] sm:$0xff] }
0x1548   :  { %1761 = vrot.lane.b32.xlu1 %v3936_v9, %s3203_s3  ;;  %v1993_v9 = vld [vmem:[%s4391_s4 + $0x28] sm:$0xff] }
0x1549   :  { %2811 = vmatprep.subr.mxu0 %v1993_v9 }
0x154a   :  { %2812 = vmatpush3.msra.mxu0 %v1993_v9  ;;  %v2200_v9 = vld [vmem:[%s4393_s6 + $0x38] sm:$0xff] }
0x157d   :  { %v1903_v15 = vpop.permute.xlu0 %1902 }
0x157e   :  { %v1908_v1 = vmul.f32 %v3956_v43, %v1903_v15  ;;  %v1990_v43 = vld [vmem:[%s4391_s4 + $0x10] sm:$0xff]  ;;  %v2202_v15 = vld [vmem:[%s4393_s6 + $0x48] sm:$0xff]  ;;  %s3180_s4 = scalar_lea.vmem %s2657_s28, 32 }
0x157f   :  { %2813 = vmatprep.subr.mxu0 %v1990_v43  ;;  %p3181_p0 = scmp.ne.s32.totalorder %s2657_s28, %s3180_s4  ;;  %p3186_p2 = scmp.lt.s32.totalorder %s3180_s4, %s3180_s4 }
0x1580   :  { %1966 = vrot.lane.b32.xlu0 %v1908_v1, %s3204_s12  ;;  %2814 = vmatpush3.msra.mxu0 %v1990_v43  ;;  %v2234_v1 = vld [vmem:[%s4393_s6 + $0x148] sm:$0xff]  ;;  %v2215_v43 = vld [vmem:[%s4393_s6 + $0xb0] sm:$0xff] }
0x1581   :  { %v1905_v2 = vpop.permute.xlu0 %1904  ;;  %2818 = vmatprep.subr.msk.mxu0 %vm2251_vm0, %v4131_v54  ;;  %p3187_p3 = por %p3186_p2, %p3185_p1 }
0x1582   :  { %v1909_v14 = vmul.f32 %v3960_v31, %v1905_v2  ;;  %v1957_v19 = vpop.permute.xlu1 %1956  ;;  %v2233_v2 = vld [vmem:[%s4393_s6 + $0x140] sm:$0xff] }
0x1583   :  { %v1962_v50 = vmul.f32 %v3963_v11, %v1957_v19  ;;  %v2232_v19 = vld [vmem:[%s4393_s6 + $0x138] sm:$0xff]  ;;  %p3188_p4 = pnand %p3187_p3, %p3181_p0 }
0x1584   :  { %1968 = vrot.lane.b32.xlu0 %v1909_v14, %s3204_s12  ;;  %v2199_v14 = vld [vmem:[%s4393_s6 + $0x30] sm:$0xff] }
0x1585   :  { %v593_v21 = vpop.permute.xlu0 %592  ;;  %1977 = vrot.lane.b32.xlu1 %v1962_v50, %s3203_s3  ;;  %v2214_v50 = vld [vmem:[%s4393_s6 + $0xa8] sm:$0xff] }
0x1586   :  { %599 = vst.msk [vmem:[#allocation2] sm:$0x2] %vm598_vm11, %v593_v21  ;;  %v1959_v31 = vpop.permute.xlu1 %1958  ;;  %v2198_v21 = vld [vmem:[%s4393_s6 + $0x28] sm:$0xff] }
0x1587   :  { %v1963_v57 = vmul.f32 %v3968_v35, %v1959_v31  ;;  %v2213_v31 = vld [vmem:[%s4393_s6 + $0xa0] sm:$0xff] }
0x1589   :  { %v825_v11 = vpop.permute.xlu0 %824  ;;  %1979 = vrot.lane.b32.xlu1 %v1963_v57, %s3203_s3  ;;  %v2197_v57 = vld [vmem:[%s4393_s6 + $0x20] sm:$0xff] }
0x158a   :  { %831 = vst.msk [vmem:[#allocation2] sm:$0x4] %vm830_vm12, %v825_v11  ;;  %v602_v52 = vpop.permute.xlu1 %601  ;;  %v2230_v11 = vld [vmem:[%s4393_s6 + $0x128] sm:$0xff] }
0x158b   :  { %608 = vst.msk [vmem:[#allocation2] sm:$0x40] %vm607_vm13, %v602_v52  ;;  %v2212_v52 = vld [vmem:[%s4393_s6 + $0x98] sm:$0xff] }
0x158d   :  { %v1056_v5 = vpop.permute.xlu0 %1055 }
0x158e   :  { %1062 = vst.msk [vmem:[#allocation2] sm:$0x8] %vm1061_vm14, %v1056_v5  ;;  %v834_v35 = vpop.permute.xlu1 %833  ;;  %v2196_v5 = vld [vmem:[%s4393_s6 + $0x18] sm:$0xff] }
0x158f   :  { %840 = vst.msk [vmem:[#allocation2] sm:$0x20] %vm839_vm15, %v834_v35  ;;  %v2211_v35 = vld [vmem:[%s4393_s6 + $0x90] sm:$0xff] }
0x1591   :  { %v1288_v48 = vpop.permute.xlu0 %1287 }
0x1592   :  { %v1065_v34 = vpop.permute.xlu1 %1064 }
0x1593   :  { %1071 = vst.msk [vmem:[#allocation2] sm:$0x10] %vm1070_vm3, %v1065_v34  ;;  %v2228_v34 = vld [vmem:[%s4393_s6 + $0x118] sm:$0xff] }
0x1594   :  { %1294 = vst.msk [vmem:[#allocation2] sm:$0x10] %vm1293_vm4, %v1288_v48  ;;  %v2195_v48 = vld [vmem:[%s4393_s6 + $0x10] sm:$0xff] }
0x1595   :  { %v1520_v49 = vpop.permute.xlu0 %1519 }
0x1596   :  { %1526 = vst.msk [vmem:[#allocation2] sm:$0x20] %vm1525_vm5, %v1520_v49  ;;  %v1297_v36 = vpop.permute.xlu1 %1296  ;;  %v2210_v49 = vld [vmem:[%s4393_s6 + $0x88] sm:$0xff] }
0x1597   :  { %1303 = vst.msk [vmem:[#allocation2] sm:$0x8] %vm1302_vm6, %v1297_v36  ;;  %v2194_v36 = vld [vmem:[%s4393_s6 + $0x8] sm:$0xff] }
0x1599   :  { %v1751_v44 = vpop.permute.xlu0 %1750 }
0x159a   :  { %1757 = vst.msk [vmem:[#allocation2] sm:$0x40] %vm1756_vm7, %v1751_v44  ;;  %v1529_v39 = vpop.permute.xlu1 %1528  ;;  %v2227_v44 = vld [vmem:[%s4393_s6 + $0x110] sm:$0xff] }
0x159b   :  { %1535 = vst.msk [vmem:[#allocation2] sm:$0x4] %vm1534_vm8, %v1529_v39  ;;  %v2209_v39 = vld [vmem:[%s4393_s6 + $0x80] sm:$0xff] }
0x159d   :  { %v365_v46 = vpop.permute.xlu0 %364 }
0x159e   :  { %370 = vst.msk [vmem:[#allocation2 + $0x8] sm:$0x1] %vm368_vm9, %v365_v46  ;;  %v1760_v4 = vpop.permute.xlu1 %1759  ;;  %vm1972_vm9 = vcmask 261127   ;;  %v2193_v46 = vld [vmem:[%s4393_s6] sm:$0xff] }
0x159f   :  { %1766 = vst.msk [vmem:[#allocation2] sm:$0x2] %vm1765_vm1, %v1760_v4  ;;  %v2226_v4 = vld [vmem:[%s4393_s6 + $0x108] sm:$0xff] }
0x15a1   :  { %v595_v7 = vpop.permute.xlu0 %594 }
0x15a2   :  { %600 = vst.msk [vmem:[#allocation2 + $0x8] sm:$0x2] %vm598_vm11, %v595_v7  ;;  %v374_v47 = vpop.permute.xlu1 %373  ;;  %v2225_v7 = vld [vmem:[%s4393_s6 + $0x100] sm:$0xff]  ;;  %vm2488_vm11 = vcmask 244736  }
0x15a3   :  { %379 = vst.msk [vmem:[#allocation2 + $0x8] sm:$0x80] %vm377_vm10, %v374_v47  ;;  %vm1983_vm10 = vcmask 516352   ;;  %v2412_v47 = vld [vmem:[%s4395_s8 + $0x38] sm:$0xff] }
0x15a5   :  { %v827_v58 = vpop.permute.xlu0 %826 }
0x15a6   :  { %832 = vst.msk [vmem:[#allocation2 + $0x8] sm:$0x4] %vm830_vm12, %v827_v58  ;;  %v604_v13 = vpop.permute.xlu1 %603  ;;  %v2012_v58 = vld [vmem:[%s4392_s5] sm:$0x7]  ;;  %vm3206_vm12 = vmmov 0  }
0x15a7   :  { %609 = vst.msk [vmem:[#allocation2 + $0x8] sm:$0x40] %vm607_vm13, %v604_v13  ;;  %v2017_v13 = vrot.slane %v2012_v58, %v53_v29  ;;  %vm2539_vm13 = vcmask 490496  }
0x15a9   :  { %v1058_v17 = vpop.permute.xlu0 %1057 }
0x15aa   :  { %1063 = vst.msk [vmem:[#allocation2 + $0x8] sm:$0x8] %vm1061_vm14, %v1058_v17  ;;  %v836_v8 = vpop.permute.xlu1 %835  ;;  %v2021_v17 = vrot.slane %v2012_v58, %v57_v33  ;;  %vm4400_vm14 = vcmask 1041409  }
0x15ab   :  { %841 = vst.msk [vmem:[#allocation2 + $0x8] sm:$0x20] %vm839_vm15, %v836_v8  ;;  %v2024_v8 = vsub.s32 2, %v3436_v28  ;;  %vm2648_vm15 = vcmask 9216  }
0x15ad   :  { %v1290_v51 = vpop.permute.xlu0 %1289 }
0x15ae   :  { %v1067_v41 = vpop.permute.xlu1 %1066 }
0x15af   :  { %1072 = vst.msk [vmem:[#allocation2 + $0x8] sm:$0x10] %vm1070_vm3, %v1067_v41 }
0x15b0   :  { %1295 = vst.msk [vmem:[#allocation2 + $0x8] sm:$0x10] %vm1293_vm4, %v1290_v51 }
0x15b1   :  { %v1522_v23 = vpop.permute.xlu0 %1521 }
0x15b2   :  { %1527 = vst.msk [vmem:[#allocation2 + $0x8] sm:$0x20] %vm1525_vm5, %v1522_v23  ;;  %v1299_v10 = vpop.permute.xlu1 %1298 }
0x15b3   :  { %1304 = vst.msk [vmem:[#allocation2 + $0x8] sm:$0x8] %vm1302_vm6, %v1299_v10 }
0x15b5   :  { %v1753_v0 = vpop.permute.xlu0 %1752 }
0x15b6   :  { %1758 = vst.msk [vmem:[#allocation2 + $0x8] sm:$0x40] %vm1756_vm7, %v1753_v0  ;;  %v1531_v53 = vpop.permute.xlu1 %1530  ;;  %v2025_v0 = vrot.slane %v2012_v58, %v2024_v8 }
0x15b7   :  { %1536 = vst.msk [vmem:[#allocation2 + $0x8] sm:$0x4] %vm1534_vm8, %v1531_v53 }
0x15ba   :  { %v1762_v56 = vpop.permute.xlu1 %1761 }
0x15bb   :  { %1767 = vst.msk [vmem:[#allocation2 + $0x8] sm:$0x2] %vm1765_vm1, %v1762_v56  ;;  %vm2244_vm1 = vcmask 769024  }
0x15f2   :  { %v1967_v59 = vpop.permute.xlu0 %1966 }
0x15f3   :  { %1973 = vst.msk [vmem:[#allocation2] sm:$0x80] %vm1972_vm9, %v1967_v59 }
0x15f6   :  { %v1969_v60 = vpop.permute.xlu0 %1968 }
0x15f7   :  { %1974 = vst.msk [vmem:[#allocation2 + $0x8] sm:$0x80] %vm1972_vm9, %v1969_v60  ;;  %v1978_v61 = vpop.permute.xlu1 %1977 }
0x15f8   :  { %1984 = vst.msk [vmem:[#allocation2] sm:$0x1] %vm1983_vm10, %v1978_v61 }
0x15fb   :  { %v1980_v62 = vpop.permute.xlu1 %1979 }
0x15fc   :  { %1985 = vst.msk [vmem:[#allocation2 + $0x8] sm:$0x1] %vm1983_vm10, %v1980_v62 }
0x15ff   :  { %v4161_v24 = vld [vmem:[#allocation2] sm:$0xff] }
0x1600   :  { %2705 = vmatmul.mubr.msk.f32.vlgmr.msra.gmra.mxu1 %vm161_vm2, %v4161_v24  ;;  %2815 = vmatprep.mubr.msk.f32.mxu0 %vm161_vm2, %v4161_v24 }
0x1601   :  { %2105 = vmatprep.mubr.f32.mxu1 %v3202_v20  ;;  %2729 = vmatpush3.msra.mxu1 %v2208_v6 }
0x1602   :  { %2730 = vmatprep.subr.mxu1 %v2223_v37 }
0x1603   :  { %v4177_v45 = vld [vmem:[#allocation2 + $0x8] sm:$0xff]  ;;  %2731 = vmatpush3.msra.mxu1 %v2207_v40 }
0x1604   :  { %2706 = vmatmul.mubr.msk.f32.gmra.mxu1 %vm161_vm2, %v4177_v45  ;;  %2816 = vmatmul.mubr.msk.f32.vlgmr.msra.gmra.mxu0 %vm161_vm2, %v4177_v45 }
0x1605   :  { %2732 = vmatprep.subr.mxu1 %v2222_v42  ;;  %2819 = vmatpush3.msk.msra.mxu0 %vm2251_vm0, %v4131_v54  ;;  %v2229_v54 = vld [vmem:[%s4393_s6 + $0x120] sm:$0xff] }
0x1606   :  { %2733 = vmatpush3.msra.mxu1 %v2206_v26  ;;  %2820 = vmatprep.subr.mxu0 %v2235_v22 }
0x1607   :  { %2734 = vmatprep.subr.mxu1 %v2221_v12  ;;  %2821 = vmatpush3.msra.mxu0 %v2235_v22  ;;  %v2411_v12 = vld [vmem:[%s4395_s8 + $0x30] sm:$0xff]  ;;  %v2709_v22 = vld [vmem:[%s4394_s7] ss:$0 sm:$0xff] }
0x1608   :  { %2735 = vmatpush3.msra.mxu1 %v2205_v27  ;;  %2822 = vmatprep.subr.mxu0 %v2234_v1  ;;  %v2410_v27 = vld [vmem:[%s4395_s8 + $0x28] sm:$0xff] }
0x1609   :  { %2736 = vmatprep.subr.mxu1 %v2220_v63  ;;  %2823 = vmatpush3.msra.mxu0 %v2234_v1  ;;  %v2409_v63 = vld [vmem:[%s4395_s8 + $0x20] sm:$0xff] }
0x160a   :  { %2737 = vmatpush3.msra.mxu1 %v2204_v32  ;;  %2824 = vmatprep.subr.mxu0 %v2233_v2  ;;  %v2408_v32 = vld [vmem:[%s4395_s8 + $0x18] sm:$0xff] }
0x160b   :  { %2738 = vmatprep.subr.mxu1 %v2219_v18  ;;  %2825 = vmatpush3.msra.mxu0 %v2233_v2  ;;  %v2406_v18 = vld [vmem:[%s4395_s8 + $0x8] sm:$0xff] }
0x160c   :  { %2739 = vmatpush3.msra.mxu1 %v2203_v16  ;;  %2826 = vmatprep.subr.mxu0 %v2232_v19  ;;  %v2405_v16 = vld [vmem:[%s4395_s8] sm:$0xff] }
0x160d   :  { %2740 = vmatprep.subr.mxu1 %v2218_v25  ;;  %2827 = vmatpush3.msra.mxu0 %v2232_v19 }
0x160e   :  { %2741 = vmatpush3.msra.mxu1 %v2202_v15  ;;  %2828 = vmatprep.subr.mxu0 %v2231_v38 }
0x160f   :  { %2742 = vmatprep.subr.mxu1 %v2217_v30  ;;  %2829 = vmatpush3.msra.mxu0 %v2231_v38 }
0x1610   :  { %2743 = vmatpush3.msra.mxu1 %v2201_v55  ;;  %2830 = vmatprep.subr.mxu0 %v2230_v11 }
0x1611   :  { %2744 = vmatprep.subr.mxu1 %v2216_v3  ;;  %2831 = vmatpush3.msra.mxu0 %v2230_v11 }
0x1612   :  { %2745 = vmatpush3.msra.mxu1 %v2200_v9  ;;  %2832 = vmatprep.subr.mxu0 %v2229_v54 }
0x1613   :  { %2746 = vmatprep.subr.mxu1 %v2215_v43  ;;  %2833 = vmatpush3.msra.mxu0 %v2229_v54 }
0x1614   :  { %2747 = vmatpush3.msra.mxu1 %v2199_v14  ;;  %2834 = vmatprep.subr.mxu0 %v2228_v34 }
0x1615   :  { %2748 = vmatprep.subr.mxu1 %v2214_v50  ;;  %2835 = vmatpush3.msra.mxu0 %v2228_v34 }
0x1616   :  { %2749 = vmatpush3.msra.mxu1 %v2198_v21  ;;  %2836 = vmatprep.subr.mxu0 %v2227_v44 }
0x1617   :  { %2750 = vmatprep.subr.mxu1 %v2213_v31  ;;  %2837 = vmatpush3.msra.mxu0 %v2227_v44 }
0x1618   :  { %2751 = vmatpush3.msra.mxu1 %v2197_v57  ;;  %2838 = vmatprep.subr.mxu0 %v2226_v4 }
0x1619   :  { %2752 = vmatprep.subr.mxu1 %v2212_v52  ;;  %2839 = vmatpush3.msra.mxu0 %v2226_v4 }
0x161a   :  { %2753 = vmatpush3.msra.mxu1 %v2196_v5  ;;  %2840 = vmatprep.subr.mxu0 %v2225_v7 }
0x161b   :  { %2754 = vmatprep.subr.mxu1 %v2211_v35  ;;  %2841 = vmatpush3.msra.mxu0 %v2225_v7 }
0x161c   :  { %2755 = vmatpush3.msra.mxu1 %v2195_v48  ;;  %2845 = vmatprep.subr.mxu0 %v2412_v47 }
0x161d   :  { %2756 = vmatprep.subr.mxu1 %v2210_v49 }
0x161e   :  { %2757 = vmatpush3.msra.mxu1 %v2194_v36 }
0x161f   :  { %2758 = vmatprep.subr.mxu1 %v2209_v39 }
0x1620   :  { %2759 = vmatpush3.msra.mxu1 %v2193_v46 }
0x1621   :  { %2864 = vmatprep.subr.mxu1 %v3202_v20 }
0x16c0   :  { %v2101_v51 = vpop.f32.mrf.mxu1 }
0x16c1   :  { %v2102_v41 = vadd.f32 %v2101_v51, %v2017_v13 }
0x16c2   :  { %v2103_v23 = vpop.f32.mrf.mxu1 }
0x16c3   :  { %v2104_v10 = vadd.f32 %v2103_v23, %v2021_v17 }
0x16c4   :  { %v2107_v53 = vpop.f32.mrf.mxu1  ;;  %v2817_v56 = vpop.f32.mrf.mxu0 }
0x16c5   :  { %3145 = vtanh.f32 %v2104_v10  ;;  %v2108_v59 = vadd.f32 %v2107_v53, %v2017_v13  ;;  %v2184_v62 = vadd.f32 %v2817_v56, %v2025_v0 }
0x16c6   :  { %3147 = vtanh.f32 %v2102_v41  ;;  %v2109_v60 = vpop.f32.mrf.mxu1  ;;  %v2178_v61 = vpop.f32.mrf.mxu0 }
0x16c7   :  { %v2110_v6 = vadd.f32 %v2109_v60, %v2021_v17  ;;  %v2179_v29 = vadd.f32 %v2178_v61, %v2025_v0  ;;  %3149 = vtanh.f32 %v2108_v59 }
0x16c9   :  { %3151 = vtanh.f32 %v2110_v6  ;;  %v2560_v6 = vld [vmem:[%s4396_s9 + $0x30] sm:$0xff] }
0x16ca   :  { %3153 = vtanh.f32 %v2179_v29 }
0x16cb   :  { %3155 = vtanh.f32 %v2184_v62  ;;  %v2561_v62 = vld [vmem:[%s4396_s9 + $0x38] sm:$0xf] }
0x16d2   :  { %v3146_v28 = vpop.eup %3145 }
0x16d3   :  { %v3148_v33 = vpop.eup %3147  ;;  %2319 = vmatprep.mubr.f32.mxu1 %v3146_v28  ;;  %v2559_v28 = vld [vmem:[%s4396_s9 + $0x28] sm:$0xff] }
0x16d4   :  { %2320 = vmatmul.mubr.f32.vlgmr.msra.gmra.mxu1 %v3148_v33  ;;  %v3150_v37 = vpop.eup %3149 }
0x16d6   :  { %v3152_v40 = vpop.eup %3151 }
0x16d7   :  { %v3154_v42 = vpop.eup %3153  ;;  %2324 = vmatprep.mubr.f32.mxu1 %v3152_v40 }
0x16d8   :  { %v3156_v26 = vpop.eup %3155  ;;  %2842 = vmatprep.mubr.msk.f32.mxu0 %vm2244_vm1, %v3154_v42  ;;  %2325 = vmatmul.mubr.f32.gmra.mxu1 %v3150_v37  ;;  %v2558_v37 = vld [vmem:[%s4396_s9 + $0x20] sm:$0xff] }
0x16d9   :  { %2843 = vmatmul.mubr.msk.f32.vlgmr.msra.gmra.mxu0 %vm2244_vm1, %v3156_v26  ;;  %v2557_v26 = vld [vmem:[%s4396_s9 + $0x18] sm:$0xff]  ;;  %2880 = vmatprep.mubr.msk.f32.mxu1 %vm3206_vm12, %v3202_v20 }
0x16da   :  { %2846 = vmatpush3.msra.mxu0 %v2412_v47  ;;  %2861 = vmatprep.mubr.msk.f32.mxu0 %vm161_vm2, %v4161_v24  ;;  %v2407_v24 = vld [vmem:[%s4395_s8 + $0x10] sm:$0xff] }
0x16db   :  { %2847 = vmatprep.subr.mxu0 %v2411_v12 }
0x16dc   :  { %2848 = vmatpush3.msra.mxu0 %v2411_v12  ;;  %v2556_v12 = vld [vmem:[%s4396_s9 + $0x10] sm:$0xff] }
0x16dd   :  { %2849 = vmatprep.subr.mxu0 %v2410_v27 }
0x16de   :  { %2850 = vmatpush3.msra.mxu0 %v2410_v27  ;;  %v2555_v27 = vld [vmem:[%s4396_s9 + $0x8] sm:$0xff] }
0x16df   :  { %2851 = vmatprep.subr.mxu0 %v2409_v63 }
0x16e0   :  { %2852 = vmatpush3.msra.mxu0 %v2409_v63  ;;  %v2554_v63 = vld [vmem:[%s4396_s9] sm:$0xff] }
0x16e1   :  { %2853 = vmatprep.subr.mxu0 %v2408_v32 }
0x16e2   :  { %2854 = vmatpush3.msra.mxu0 %v2408_v32 }
0x16e3   :  { %2855 = vmatprep.subr.mxu0 %v2407_v24 }
0x16e4   :  { %2856 = vmatpush3.msra.mxu0 %v2407_v24 }
0x16e5   :  { %2857 = vmatprep.subr.mxu0 %v2406_v18 }
0x16e6   :  { %2858 = vmatpush3.msra.mxu0 %v2406_v18 }
0x16e7   :  { %2859 = vmatprep.subr.mxu0 %v2405_v16 }
0x16e8   :  { %2860 = vmatpush3.msra.mxu0 %v2405_v16 }
0x16e9   :  { %2862 = vmatmul.mubr.msk.f32.vlgmr.msra.gmra.mxu0 %vm161_vm2, %v4177_v45  ;;  %vm2574_vm2 = vcmask 1043456  }
0x16ea   :  { %2865 = vmatpush3.msk.msra.mxu1 %vm2574_vm2, %v2561_v62 }
0x16eb   :  { %2866 = vmatprep.subr.mxu1 %v3202_v20 }
0x16ec   :  { %2867 = vmatpush3.msra.mxu1 %v2560_v6 }
0x16ed   :  { %2868 = vmatprep.subr.mxu1 %v3202_v20 }
0x16ee   :  { %2869 = vmatpush3.msra.mxu1 %v2559_v28 }
0x16ef   :  { %2870 = vmatprep.subr.mxu1 %v3202_v20 }
0x16f0   :  { %2871 = vmatpush3.msra.mxu1 %v2558_v37 }
0x16f1   :  { %2872 = vmatprep.subr.mxu1 %v3202_v20 }
0x16f2   :  { %2873 = vmatpush3.msra.mxu1 %v2557_v26 }
0x16f3   :  { %2874 = vmatprep.subr.mxu1 %v3202_v20 }
0x16f4   :  { %2875 = vmatpush3.msra.mxu1 %v2556_v12 }
0x16f5   :  { %2876 = vmatprep.subr.mxu1 %v3202_v20 }
0x16f6   :  { %2877 = vmatpush3.msra.mxu1 %v2555_v27 }
0x16f7   :  { %2878 = vmatprep.subr.mxu1 %v3202_v20 }
0x16f8   :  { %2879 = vmatpush3.msra.mxu1 %v2554_v63 }
0x1794   :  { %v2760_v25 = vpop.f32.mrf.mxu1 }
0x1796   :  { %v2761_v15 = vpop.f32.mrf.mxu1 }
0x1797   :  { %v2762_v30 = vadd.f32 %v2761_v15, %v2760_v25 }
0x1798   :  { %v2763_v55 = vpop.f32.mrf.mxu1 }
0x1799   :  { %v2844_v1 = vpop.f32.mrf.mxu0  ;;  %v2322_v3 = vadd.f32 %v2762_v30, %v2709_v22 }
0x179a   :  { %v2764_v9 = vpop.f32.mrf.mxu1 }
0x179b   :  { %v2765_v2 = vadd.f32 %v2764_v9, %v2763_v55  ;;  %v2396_v43 = vpop.f32.mrf.mxu0 }
0x179c   :  { %v2397_v14 = vadd.f32 %v2396_v43, %v2322_v3 }
0x179d   :  { %v2327_v19 = vadd.f32 %v2765_v2, %v2709_v22 }
0x179e   :  { %v2489_v50 = vsel %vm2488_vm11, %v2397_v14, -inf }
0x179f   :  { %v2402_v21 = vadd.f32 %v2844_v1, %v2327_v19  ;;  %v2490_v45 = vrot.slane %v2489_v50, 4 }
0x17a1   :  { %v2496_v38 = vsel %vm2488_vm11, %v2402_v21, -inf  ;;  %v2491_v31 = vmax.f32 %v2489_v50, %v2490_v45 }
0x17a2   :  { %v2497_v57 = vrot.slane %v2496_v38, 4 }
0x17a3   :  { %v2492_v11 = vrot.slane %v2491_v31, 2 }
0x17a4   :  { %v2498_v52 = vmax.f32 %v2496_v38, %v2497_v57 }
0x17a5   :  { %v2493_v5 = vmax.f32 %v2491_v31, %v2492_v11  ;;  %v2715_v11 = vld [vmem:[%s4397_s10] ss:$0 sm:$0xff] }
0x17a6   :  { %v2499_v54 = vrot.slane %v2498_v52, 2 }
0x17a7   :  { %v2494_v35 = vrot.slane %v2493_v5, 1 }
0x17a8   :  { %v2500_v48 = vmax.f32 %v2498_v52, %v2499_v54 }
0x17a9   :  { %v2495_v34 = vmax.f32 %v2493_v5, %v2494_v35  ;;  %v2863_v32 = vpop.f32.mrf.mxu0 }
0x17aa   :  { %v2501_v49 = vrot.slane %v2500_v48, 1 }
0x17ab   :  { %v2503_v36 = vsub.f32 %v2397_v14, %v2495_v34  ;;  %v2479_v18 = vpop.f32.mrf.mxu0 }
0x17ac   :  { %v2502_v44 = vmax.f32 %v2500_v48, %v2501_v49 }
0x17ad   :  { %v2505_v39 = vmul.f32 1.442695, %v2503_v36 }
0x17ae   :  { %v2504_v46 = vsub.f32 %v2402_v21, %v2502_v44 }
0x17af   :  { %3157 = vpow2.f32 %v2505_v39 }
0x17b0   :  { %v2507_v4 = vmul.f32 1.442695, %v2504_v46 }
0x17b2   :  { %3159 = vpow2.f32 %v2507_v4 }
0x17bc   :  { %v3158_v7 = vpop.eup %3157 }
0x17bd   :  { %v2509_v47 = vsel %vm2488_vm11, %v3158_v7, 0.0 }
0x17be   :  { %v2510_v58 = vrot.slane %v2509_v47, 4 }
0x17bf   :  { %v3160_v13 = vpop.eup %3159 }
0x17c0   :  { %v2516_v17 = vsel %vm2488_vm11, %v3160_v13, 0.0  ;;  %v2511_v8 = vadd.f32 %v2510_v58, %v2509_v47 }
0x17c1   :  { %v2517_v51 = vrot.slane %v2516_v17, 4 }
0x17c2   :  { %v2512_v41 = vrot.slane %v2511_v8, 2 }
0x17c3   :  { %v2518_v23 = vadd.f32 %v2517_v51, %v2516_v17 }
0x17c4   :  { %v2513_v10 = vadd.f32 %v2512_v41, %v2511_v8 }
0x17c5   :  { %v2519_v0 = vrot.slane %v2518_v23, 2 }
0x17c6   :  { %v2514_v53 = vrot.slane %v2513_v10, 1 }
0x17c7   :  { %v2520_v56 = vadd.f32 %v2519_v0, %v2518_v23 }
0x17c8   :  { %v2515_v59 = vadd.f32 %v2514_v53, %v2513_v10 }
0x17c9   :  { %v2521_v60 = vrot.slane %v2520_v56, 1 }
0x17ca   :  { %3161 = vrcp.f32 %v2515_v59 }
0x17cb   :  { %v2522_v61 = vadd.f32 %v2521_v60, %v2520_v56 }
0x17cd   :  { %3163 = vrcp.f32 %v2522_v61 }
0x17d7   :  { %v3162_v29 = vpop.eup %3161 }
0x17d8   :  { %v2524_v33 = vmul.f32 %v3162_v29, %v3158_v7 }
0x17da   :  { %v3164_v40 = vpop.eup %3163  ;;  %2529 = vrot.lane.b32.xlu0 %v2524_v33, %s3205_s20 }
0x17db   :  { %v2526_v42 = vmul.f32 %v3164_v40, %v3160_v13 }
0x17dd   :  { %2531 = vrot.lane.b32.xlu1 %v2526_v42, %s3205_s20 }
0x184c   :  { %v2530_v24 = vpop.permute.xlu0 %2529 }
0x184d   :  { %v2535_v16 = vsel %vm2488_vm11, %v2524_v33, %v2530_v24 }
0x184e   :  { %v2537_v25 = vmul.f32 %v2535_v16, %v2479_v18 }
0x184f   :  { %v2532_v15 = vpop.permute.xlu1 %2531 }
0x1850   :  { %v2540_v22 = vsel %vm2539_vm13, %v2537_v25, 0.0  ;;  %v2536_v30 = vsel %vm2488_vm11, %v2526_v42, %v2532_v15 }
0x1851   :  { %v2541_v55 = vrot.slane %v2540_v22, 4  ;;  %v2538_v1 = vmul.f32 %v2863_v32, %v2536_v30 }
0x1853   :  { %v2542_v3 = vadd.f32 %v2541_v55, %v2540_v22  ;;  %v2547_v9 = vsel %vm2539_vm13, %v2538_v1, 0.0 }
0x1854   :  { %v2548_v2 = vrot.slane %v2547_v9, 4 }
0x1855   :  { %v2543_v20 = vrot.slane %v2542_v3, 2 }
0x1856   :  { %v2549_v43 = vadd.f32 %v2548_v2, %v2547_v9 }
0x1857   :  { %v2544_v14 = vadd.f32 %v2543_v20, %v2542_v3 }
0x1858   :  { %v2550_v19 = vrot.slane %v2549_v43, 2 }
0x1859   :  { %v2545_v50 = vrot.slane %v2544_v14, 1 }
0x185a   :  { %v2551_v21 = vadd.f32 %v2550_v19, %v2549_v43 }
0x185b   :  { %v2546_v38 = vadd.f32 %v2545_v50, %v2544_v14 }
0x185c   :  { %v2552_v45 = vrot.slane %v2551_v21, 1 }
0x185e   :  { %v2553_v31 = vadd.f32 %v2552_v45, %v2551_v21 }
0x1860   :  { %v2571_v57 = vsel %vm4400_vm14, %v2553_v31, %v2546_v38 }
0x1861   :  { %2881 = vmatmul.mubr.msk.f32.vlgmr.msra.gmra.mxu1 %vm2539_vm13, %v2571_v57 }
0x1921   :  { %v2644_v52 = vpop.f32.mrf.mxu1 }
0x1922   :  { %v2645_v5 = vadd.f32 %v2715_v11, %v2644_v52 }
0x1923   :  { %v2882_v54 = vpop.f32.mrf.mxu1 }
0x1924   :  { %2649 = vst.msk [vmem:[#allocation3] sm:$0x3] %vm2648_vm15, %v2645_v5 }
0x1925   :  { %3191 = shalt.err (!%p3188_p4)
}
0x1926   :  { %2659 = dma.vmem_to_hbm [thread:$0]  %s2657_s28, 32, %s4398_s11, [#allocation4]  }
0x1927   :  { %3200 = dma.done.wait [#allocation4], 32  }
0x1928   :  { %3201 = vsyncadd [#allocation4], 4294967264 }
0x1929   :  { %2663 = vsyncpa [#allocation4], 1 }

</bundles_post_ra>
